<compile_context>
chip_gen: v7x
topology: tpu7x:2x2x1
jax: 0.10.0
libtpu: 0.0.40
codegen_flags: <defaults>
</compile_context>

<pallas_src>
import math
import functools

import jax
import jax.numpy as jnp
from jax.experimental import pallas as pl
from jax.experimental.pallas import tpu as pltpu

F32 = jnp.float32
BF16 = jnp.bfloat16

try:
    _VMEM_CAP = getattr(pltpu.get_tpu_info(), "vmem_capacity_bytes", 64 * 1024 * 1024)
except Exception:  # pragma: no cover - conservative fallback
    _VMEM_CAP = 64 * 1024 * 1024
VMEM_LIMIT = int(min(_VMEM_CAP * 3 // 4, 100 * 1024 * 1024))


def _round_up(x, m):
    return (x + m - 1) // m * m


def _layernorm(x, w, b, eps):
    mu = jnp.mean(x, axis=-1, keepdims=True)
    var = jnp.mean((x - mu) ** 2, axis=-1, keepdims=True)
    return (x - mu) * jax.lax.rsqrt(var + eps) * w + b


# ----------------------------------------------------------------------------
# Fused ViT kernel: grid = (batch, layer)
# ----------------------------------------------------------------------------
def _vit_kernel(
    # per-image input
    patches_ref,                                   # (1, Np, F)   bf16
    # constants
    cls_ref, pos_ref,                              # (1, D) f32, (S_pad, D) f32
    # per-layer inputs (leading layer axis selected by the grid)
    prompt_ref,                                    # (1, P, D)    f32
    ln1w_ref, ln1b_ref,                            # (1, 1, D)    f32
    wqkv_ref, bqkv_ref,                            # (1, D, 3D) bf16, (1, 1, 3D) f32
    wo_ref, bo_ref,                                # (1, D, D)  bf16, (1, 1, D)  f32
    ln2w_ref, ln2b_ref,                            # (1, 1, D)    f32
    w1_ref, b1_ref,                                # (1, D, M)  bf16, (1, 1, M)  f32
    w2_ref, b2_ref,                                # (1, M, D)  bf16, (1, 1, D)  f32
    # constants (patch embed + final LN + head)
    wpatch_ref, bpatch_ref,                        # (F, D) bf16, (1, D) f32
    lnfw_ref, lnfb_ref,                            # (1, D) f32
    headw_ref, headb_ref,                          # (D, C_pad) bf16, (1, C_pad) f32
    # output
    logits_ref,                                    # (1, 1, C_pad) f32
    # scratch
    resid_ref,                                     # (S_pad, D) f32 residual stream
    *, num_heads, seq_len, prompt_len, eps,
):
    l = pl.program_id(1)
    n_layers = pl.num_programs(1)
    S_pad, D = resid_ref.shape
    hd = D // num_heads
    n_valid = seq_len + prompt_len                 # real tokens: [seq | prompt]; rest pad

    # ---- layer 0: patch-embed + class token + positional embedding, all in VMEM ----
    @pl.when(l == 0)
    def _():
        tok = jnp.dot(patches_ref[0], wpatch_ref[...],
                      preferred_element_type=jnp.float32) + bpatch_ref[...]   # (Np, D)
        tail = jnp.zeros((S_pad - seq_len, D), jnp.float32)
        resid_ref[...] = (
            jnp.concatenate([cls_ref[...], tok, tail], axis=0) + pos_ref[...])

    x = resid_ref[...]                             # (S_pad, D) f32 residual stream
    # splice this layer's prompt tokens into rows [seq_len, seq_len + P)
    x = jnp.concatenate(
        [x[:seq_len], prompt_ref[0], x[seq_len + prompt_len:]], axis=0)

    # ---- LayerNorm 1 + fused QKV projection (bf16 MXU inputs, f32 accumulation) ----
    xn = _layernorm(x, ln1w_ref[0], ln1b_ref[0], eps)
    qkv = jnp.dot(xn.astype(BF16), wqkv_ref[0],
                  preferred_element_type=jnp.float32) + bqkv_ref[0]           # (S_pad, 3D)
    qkv_bf = qkv.astype(BF16)

    # key-padding mask: keys >= seq_len + prompt_len are invalid
    key_idx = jax.lax.broadcasted_iota(jnp.int32, (1, S_pad), 1)
    neg_mask = jnp.where(key_idx < n_valid, 0.0, -1e30)                       # (1, S_pad)
    scale = 1.0 / math.sqrt(hd)

    wo_l = wo_ref[0]                               # (D, D) bf16 (single load, sliced below)

    # ---- attention: per-head 2-D MXU matmuls on value-level lane slices ----
    # (no (H, S, hd) scratch, no masked hd-wide stores; the head-concat + out-projection
    #  is folded into a per-head (S, hd) @ (hd, D) accumulation)
    attn = jnp.zeros((S_pad, D), jnp.float32)
    for h in range(num_heads):
        q_h = qkv_bf[:, h * hd:(h + 1) * hd]                                  # (S, hd)
        k_h = qkv_bf[:, D + h * hd:D + (h + 1) * hd]
        v_h = qkv_bf[:, 2 * D + h * hd:2 * D + (h + 1) * hd]

        s = jax.lax.dot_general(q_h, k_h, (((1,), (1,)), ((), ())),
                                preferred_element_type=jnp.float32) * scale   # (S, S)
        s = s + neg_mask
        s = s - jnp.max(s, axis=-1, keepdims=True)
        p = jnp.exp(s)
        p = p * pl.reciprocal(jnp.sum(p, axis=-1, keepdims=True), approx=True)

        o_h = jnp.dot(p.astype(BF16), v_h, preferred_element_type=jnp.float32)  # (S, hd)
        attn = attn + jnp.dot(o_h.astype(BF16), wo_l[h * hd:(h + 1) * hd, :],
                              preferred_element_type=jnp.float32)
    attn = attn + bo_ref[0]

    # residual 1 (dropout p=0 -> identity)
    x2 = attn + x

    # ---- LayerNorm 2 + MLP (Linear -> exact GELU -> Linear) ----
    yn = _layernorm(x2, ln2w_ref[0], ln2b_ref[0], eps)
    h1 = jnp.dot(yn.astype(BF16), w1_ref[0],
                 preferred_element_type=jnp.float32) + b1_ref[0]
    h1 = 0.5 * h1 * (1.0 + jax.lax.erf(h1 * (1.0 / math.sqrt(2.0))))          # exact GELU
    h2 = jnp.dot(h1.astype(BF16), w2_ref[0],
                 preferred_element_type=jnp.float32) + b2_ref[0]

    out = x2 + h2
    # prompt rows are overwritten by the next layer's fresh prompt (== torch's strip+cat);
    # padded rows are never read as keys (masked) and never leave VMEM.
    resid_ref[...] = out

    # ---- last layer: final LayerNorm + classifier head on the class token (row 0) ----
    @pl.when(l == n_layers - 1)
    def _():
        c = _layernorm(out[0:1, :], lnfw_ref[...], lnfb_ref[...], eps)        # (1, D)
        logits_ref[0] = (
            jnp.dot(c.astype(BF16), headw_ref[...],
                    preferred_element_type=jnp.float32) + headb_ref[...])


# ----------------------------------------------------------------------------
# Wrapper: patch extraction (layout only), weight stacking, single pallas_call
# ----------------------------------------------------------------------------
def extract_patches(x, p):
    """NCHW image -> (B, nh*nw, C*p*p), patch flattened in (c, ph, pw) order."""
    B, C, H, W = x.shape
    nh, nw = H // p, W // p
    x = x.reshape(B, C, nh, p, nw, p)
    x = x.transpose(0, 2, 4, 1, 3, 5)              # (B, nh, nw, C, p, p)
    return x.reshape(B, nh * nw, C * p * p)


def vit_forward(x, prompts, params, cfg):
    B = x.shape[0]
    p = cfg["patch_size"]
    D = cfg["hidden_dim"]
    H = cfg["num_heads"]
    L = cfg["num_layers"]
    M = cfg["mlp_dim"]
    C = cfg["num_classes"]
    P = prompts.shape[2]
    eps = 1e-6

    patches = extract_patches(x, p).astype(BF16)                    # (B, Np, F)
    Np, F_in = patches.shape[1], patches.shape[2]
    seq_len = Np + 1
    n_valid = seq_len + P
    # pad the token axis ONCE to a multiple of 128: lane-dense scores/softmax, valid
    # bf16 sublane tiling; padded keys are masked inside the kernel.
    S_pad = _round_up(max(n_valid, 128), 128)

    # positional embedding padded to S_pad rows (prompt/pad rows get no pos, like torch)
    pos_pad = jnp.zeros((S_pad, D), F32).at[:seq_len].set(params["pos_embedding"][0])

    # classifier head padded to a lane-dense 128-multiple output width
    C_pad = _round_up(max(C, 128), 128)
    head_w = jnp.zeros((D, C_pad), F32).at[:, :C].set(params["head_w"]).astype(BF16)
    head_b = jnp.zeros((1, C_pad), F32).at[:, :C].set(params["head_b"].reshape(1, C))

    # stack per-layer weights along a leading layer axis (layer grid axis prefetches them)
    layers = params["layers"]
    ln1w = jnp.stack([lp["ln1w"] for lp in layers]).reshape(L, 1, D)
    ln1b = jnp.stack([lp["ln1b"] for lp in layers]).reshape(L, 1, D)
    wqkv = jnp.stack([lp["wqkv"] for lp in layers]).astype(BF16)            # (L, D, 3D)
    bqkv = jnp.stack([lp["bqkv"] for lp in layers]).reshape(L, 1, 3 * D)
    wo = jnp.stack([lp["wo"] for lp in layers]).astype(BF16)                # (L, D, D)
    bo = jnp.stack([lp["bo"] for lp in layers]).reshape(L, 1, D)
    ln2w = jnp.stack([lp["ln2w"] for lp in layers]).reshape(L, 1, D)
    ln2b = jnp.stack([lp["ln2b"] for lp in layers]).reshape(L, 1, D)
    w1 = jnp.stack([lp["w1"] for lp in layers]).astype(BF16)                # (L, D, M)
    b1 = jnp.stack([lp["b1"] for lp in layers]).reshape(L, 1, M)
    w2 = jnp.stack([lp["w2"] for lp in layers]).astype(BF16)                # (L, M, D)
    b2 = jnp.stack([lp["b2"] for lp in layers]).reshape(L, 1, D)

    kernel = functools.partial(_vit_kernel, num_heads=H, seq_len=seq_len,
                               prompt_len=P, eps=eps)

    def const(shape):
        n = len(shape)
        # NOTE: on v7x these resident constants could use pipeline_mode=pl.Buffered(1)
        # to avoid double-buffering; omitted for portability.
        return pl.BlockSpec(shape, lambda b, l: (0,) * n)

    def perlayer(shape):
        n = len(shape)
        return pl.BlockSpec((1,) + shape, lambda b, l: (l,) + (0,) * n)

    logits = pl.pallas_call(
        kernel,
        out_shape=jax.ShapeDtypeStruct((B, 1, C_pad), F32),
        grid=(B, L),
        in_specs=[
            pl.BlockSpec((1, Np, F_in), lambda b, l: (b, 0, 0)),   # patches (per image)
            const((1, D)),                                         # class token
            const((S_pad, D)),                                     # padded pos embedding
            perlayer((P, D)),                                      # per-layer prompt
            perlayer((1, D)), perlayer((1, D)),                    # ln1 w, b
            perlayer((D, 3 * D)), perlayer((1, 3 * D)),            # qkv proj
            perlayer((D, D)), perlayer((1, D)),                    # out proj
            perlayer((1, D)), perlayer((1, D)),                    # ln2 w, b
            perlayer((D, M)), perlayer((1, M)),                    # mlp fc1
            perlayer((M, D)), perlayer((1, D)),                    # mlp fc2
            const((F_in, D)), const((1, D)),                       # patch embed w, b
            const((1, D)), const((1, D)),                          # final ln w, b
            const((D, C_pad)), const((1, C_pad)),                  # head w, b
        ],
        out_specs=pl.BlockSpec((1, 1, C_pad), lambda b, l: (b, 0, 0)),
        scratch_shapes=[pltpu.VMEM((S_pad, D), F32)],              # residual stream
        compiler_params=pltpu.CompilerParams(
            dimension_semantics=("parallel", "arbitrary"),         # batch -> megacore
            vmem_limit_bytes=VMEM_LIMIT,
        ),
    )(
        patches,
        params["class_token"].reshape(1, D),
        pos_pad,
        prompts[0],                                                # (L, P, D)
        ln1w, ln1b, wqkv, bqkv, wo, bo, ln2w, ln2b, w1, b1, w2, b2,
        params["w_patch"].astype(BF16), params["b_patch"].reshape(1, D),
        params["ln_w"].reshape(1, D), params["ln_b"].reshape(1, D),
        head_w, head_b,
    )
    return logits.reshape(B, C_pad)[:, :C]


# ----------------------------------------------------------------------------
# Deterministic parameter construction (shapes follow the PyTorch __init__)
# ----------------------------------------------------------------------------
def init_params(key, cfg):
    D = cfg["hidden_dim"]
    M = cfg["mlp_dim"]
    C = cfg["num_classes"]
    p = cfg["patch_size"]
    seq_len = (cfg["image_size"] // p) ** 2 + 1
    in_feats = 3 * p * p

    def nrm(k, shape, std=0.02):
        return std * jax.random.normal(k, shape, dtype=jnp.float32)

    keys = iter(jax.random.split(key, 64))
    params = {
        # conv_proj weight (D, 3, p, p) flattened -> (3*p*p, D) in x @ W orientation
        "w_patch": nrm(next(keys), (in_feats, D), math.sqrt(1.0 / in_feats)),
        "b_patch": jnp.zeros((D,), jnp.float32),
        "class_token": nrm(next(keys), (1, 1, D)),
        "pos_embedding": nrm(next(keys), (1, seq_len, D)),
        "ln_w": jnp.ones((D,), jnp.float32),
        "ln_b": jnp.zeros((D,), jnp.float32),
        # NOTE: torch zero-inits the head; use small random values for a non-trivial output.
        "head_w": nrm(next(keys), (D, C)),
        "head_b": jnp.zeros((C,), jnp.float32),
        "layers": [],
    }
    for _ in range(cfg["num_layers"]):
        params["layers"].append(
            {
                "ln1w": jnp.ones((D,), jnp.float32),
                "ln1b": jnp.zeros((D,), jnp.float32),
                "wqkv": nrm(next(keys), (D, 3 * D)),
                "bqkv": nrm(next(keys), (3 * D,), 0.01),
                "wo": nrm(next(keys), (D, D)),
                "bo": jnp.zeros((D,), jnp.float32),
                "ln2w": jnp.ones((D,), jnp.float32),
                "ln2b": jnp.zeros((D,), jnp.float32),
                "w1": nrm(next(keys), (D, M)),
                "b1": nrm(next(keys), (M,), 1e-6),
                "w2": nrm(next(keys), (M, D)),
                "b2": nrm(next(keys), (D,), 1e-6),
            }
        )
    return params


# ----------------------------------------------------------------------------
# Main
# ----------------------------------------------------------------------------
if __name__ == "__main__":
    cfg = dict(
        image_size=16,
        patch_size=4,
        num_layers=2,
        num_heads=4,
        hidden_dim=32,
        mlp_dim=64,
        num_classes=10,
    )
    batch = 2
    prompt_len = 4

    key = jax.random.PRNGKey(0)
    k_x, k_p, k_w = jax.random.split(key, 3)

    x = jax.random.normal(k_x, (batch, 3, cfg["image_size"], cfg["image_size"]),
                          dtype=jnp.float32)                       # NCHW, like torch
    prompts = 0.02 * jax.random.normal(
        k_p, (1, cfg["num_layers"], prompt_len, cfg["hidden_dim"]), dtype=jnp.float32
    )
    params = init_params(k_w, cfg)

    # TODO(synk): conv_stem_configs / representation_size branches of the torch module are
    # not exercised (defaults None) and are not implemented here.
    logits = vit_forward(x, prompts, params, cfg)
    jax.block_until_ready(logits)
    assert logits.shape == (batch, cfg["num_classes"])
    print("KERNEL_OK")
</pallas_src>

<mosaic_0001>
module attributes {stable_mosaic.version = 11 : i64} {
  func.func @_vit_kernel(%arg0: i32, %arg1: i32, %arg2: memref<1x16x48xbf16, #tpu.memory_space<vmem>>, %arg3: memref<1x32xf32, #tpu.memory_space<vmem>>, %arg4: memref<128x32xf32, #tpu.memory_space<vmem>>, %arg5: memref<1x4x32xf32, #tpu.memory_space<vmem>>, %arg6: memref<1x1x32xf32, #tpu.memory_space<vmem>>, %arg7: memref<1x1x32xf32, #tpu.memory_space<vmem>>, %arg8: memref<1x32x96xbf16, #tpu.memory_space<vmem>>, %arg9: memref<1x1x96xf32, #tpu.memory_space<vmem>>, %arg10: memref<1x32x32xbf16, #tpu.memory_space<vmem>>, %arg11: memref<1x1x32xf32, #tpu.memory_space<vmem>>, %arg12: memref<1x1x32xf32, #tpu.memory_space<vmem>>, %arg13: memref<1x1x32xf32, #tpu.memory_space<vmem>>, %arg14: memref<1x32x64xbf16, #tpu.memory_space<vmem>>, %arg15: memref<1x1x64xf32, #tpu.memory_space<vmem>>, %arg16: memref<1x64x32xbf16, #tpu.memory_space<vmem>>, %arg17: memref<1x1x32xf32, #tpu.memory_space<vmem>>, %arg18: memref<48x32xbf16, #tpu.memory_space<vmem>>, %arg19: memref<1x32xf32, #tpu.memory_space<vmem>>, %arg20: memref<1x32xf32, #tpu.memory_space<vmem>>, %arg21: memref<1x32xf32, #tpu.memory_space<vmem>>, %arg22: memref<32x128xbf16, #tpu.memory_space<vmem>>, %arg23: memref<1x128xf32, #tpu.memory_space<vmem>>, %arg24: memref<1x1x128xf32, #tpu.memory_space<vmem>>, %arg25: memref<128x32xf32, #tpu.memory_space<vmem>>) attributes {dimension_semantics = [#tpu.dimension_semantics<parallel>, #tpu.dimension_semantics<arbitrary>], iteration_bounds = array<i64: 2, 2>, scalar_prefetch = 0 : i64, scratch_operands = 1 : i64, tpu.core_type = #tpu.core_type<tc>, window_params = [{transform_indices = @transform_0, window_bounds = array<i64: 1, 16, 48>}, {pipeline_mode = #tpu.pipeline_mode<synchronous>, transform_indices = @transform_1, window_bounds = array<i64: 1, 32>}, {pipeline_mode = #tpu.pipeline_mode<synchronous>, transform_indices = @transform_2, window_bounds = array<i64: 128, 32>}, {transform_indices = @transform_3, window_bounds = array<i64: 1, 4, 32>}, {transform_indices = @transform_4, window_bounds = array<i64: 1, 1, 32>}, {transform_indices = @transform_5, window_bounds = array<i64: 1, 1, 32>}, {transform_indices = @transform_6, window_bounds = array<i64: 1, 32, 96>}, {transform_indices = @transform_7, window_bounds = array<i64: 1, 1, 96>}, {transform_indices = @transform_8, window_bounds = array<i64: 1, 32, 32>}, {transform_indices = @transform_9, window_bounds = array<i64: 1, 1, 32>}, {transform_indices = @transform_10, window_bounds = array<i64: 1, 1, 32>}, {transform_indices = @transform_11, window_bounds = array<i64: 1, 1, 32>}, {transform_indices = @transform_12, window_bounds = array<i64: 1, 32, 64>}, {transform_indices = @transform_13, window_bounds = array<i64: 1, 1, 64>}, {transform_indices = @transform_14, window_bounds = array<i64: 1, 64, 32>}, {transform_indices = @transform_15, window_bounds = array<i64: 1, 1, 32>}, {pipeline_mode = #tpu.pipeline_mode<synchronous>, transform_indices = @transform_16, window_bounds = array<i64: 48, 32>}, {pipeline_mode = #tpu.pipeline_mode<synchronous>, transform_indices = @transform_17, window_bounds = array<i64: 1, 32>}, {pipeline_mode = #tpu.pipeline_mode<synchronous>, transform_indices = @transform_18, window_bounds = array<i64: 1, 32>}, {pipeline_mode = #tpu.pipeline_mode<synchronous>, transform_indices = @transform_19, window_bounds = array<i64: 1, 32>}, {pipeline_mode = #tpu.pipeline_mode<synchronous>, transform_indices = @transform_20, window_bounds = array<i64: 32, 128>}, {pipeline_mode = #tpu.pipeline_mode<synchronous>, transform_indices = @transform_21, window_bounds = array<i64: 1, 128>}, {transform_indices = @transform_22, window_bounds = array<i64: 1, 1, 128>}]} {
    %c0_i32 = arith.constant 0 : i32
    %0 = arith.cmpi eq, %arg1, %c0_i32 : i32
    %1 = arith.extui %0 : i1 to i32
    %c0_i32_0 = arith.constant 0 : i32
    %2 = arith.cmpi ne, %1, %c0_i32_0 : i32
    scf.if %2 {
      %c0_86 = arith.constant 0 : index
      %c0_87 = arith.constant 0 : index
      %c0_88 = arith.constant 0 : index
      %209 = vector.load %arg2[%c0_86, %c0_87, %c0_88] : memref<1x16x48xbf16, #tpu.memory_space<vmem>>, vector<1x16x48xbf16>
      %210 = vector.shape_cast %209 : vector<1x16x48xbf16> to vector<16x48xbf16>
      %c0_89 = arith.constant 0 : index
      %c0_90 = arith.constant 0 : index
      %211 = vector.load %arg18[%c0_89, %c0_90] : memref<48x32xbf16, #tpu.memory_space<vmem>>, vector<48x32xbf16>
      %cst_91 = arith.constant dense<0.000000e+00> : vector<16x32xf32>
      %212 = tpu.matmul %210, %211, %cst_91 {dimension_numbers = #tpu.dot_dimension_numbers<[1], [0], [0], [1], [0, 0, 1, 1], [], []>} : vector<16x48xbf16>, vector<48x32xbf16>, vector<16x32xf32> -> vector<16x32xf32>
      %c0_92 = arith.constant 0 : index
      %c0_93 = arith.constant 0 : index
      %213 = vector.load %arg19[%c0_92, %c0_93] : memref<1x32xf32, #tpu.memory_space<vmem>>, vector<1x32xf32>
      %214 = vector.broadcast %213 : vector<1x32xf32> to vector<16x32xf32>
      %215 = arith.addf %212, %214 : vector<16x32xf32>
      %cst_94 = arith.constant 0.000000e+00 : f32
      %216 = vector.broadcast %cst_94 : f32 to vector<111x32xf32>
      %c0_95 = arith.constant 0 : index
      %c0_96 = arith.constant 0 : index
      %217 = vector.load %arg3[%c0_95, %c0_96] : memref<1x32xf32, #tpu.memory_space<vmem>>, vector<1x32xf32>
      %218 = tpu.concatenate %217, %215, %216 in 0 : vector<1x32xf32>, vector<16x32xf32>, vector<111x32xf32> -> vector<128x32xf32>
      %c0_97 = arith.constant 0 : index
      %c0_98 = arith.constant 0 : index
      %219 = vector.load %arg4[%c0_97, %c0_98] : memref<128x32xf32, #tpu.memory_space<vmem>>, vector<128x32xf32>
      %220 = arith.addf %218, %219 : vector<128x32xf32>
      %c0_99 = arith.constant 0 : index
      %c0_100 = arith.constant 0 : index
      %221 = vector.load %arg25[%c0_99, %c0_100] : memref<128x32xf32, #tpu.memory_space<vmem>>, vector<128x32xf32>
      tpu.vector_store %arg25[%c0_99, %c0_100], %220 {strides = array<i32>} : memref<128x32xf32, #tpu.memory_space<vmem>>, vector<128x32xf32>,
    } else {
    }
    %c0 = arith.constant 0 : index
    %c0_1 = arith.constant 0 : index
    %3 = vector.load %arg25[%c0, %c0_1] : memref<128x32xf32, #tpu.memory_space<vmem>>, vector<128x32xf32>
    %4 = vector.extract_strided_slice %3 {offsets = [0, 0], sizes = [17, 32], strides = [1, 1]} : vector<128x32xf32> to vector<17x32xf32>
    %c0_2 = arith.constant 0 : index
    %c0_3 = arith.constant 0 : index
    %c0_4 = arith.constant 0 : index
    %5 = vector.load %arg5[%c0_2, %c0_3, %c0_4] : memref<1x4x32xf32, #tpu.memory_space<vmem>>, vector<1x4x32xf32>
    %6 = vector.shape_cast %5 : vector<1x4x32xf32> to vector<4x32xf32>
    %7 = vector.extract_strided_slice %3 {offsets = [21, 0], sizes = [107, 32], strides = [1, 1]} : vector<128x32xf32> to vector<107x32xf32>
    %8 = tpu.concatenate %4, %6, %7 in 0 : vector<17x32xf32>, vector<4x32xf32>, vector<107x32xf32> -> vector<128x32xf32>
    %c0_5 = arith.constant 0 : index
    %c0_6 = arith.constant 0 : index
    %c0_7 = arith.constant 0 : index
    %9 = vector.load %arg6[%c0_5, %c0_6, %c0_7] : memref<1x1x32xf32, #tpu.memory_space<vmem>>, vector<1x1x32xf32>
    %10 = vector.shape_cast %9 : vector<1x1x32xf32> to vector<1x32xf32>
    %c0_8 = arith.constant 0 : index
    %c0_9 = arith.constant 0 : index
    %c0_10 = arith.constant 0 : index
    %11 = vector.load %arg7[%c0_8, %c0_9, %c0_10] : memref<1x1x32xf32, #tpu.memory_space<vmem>>, vector<1x1x32xf32>
    %12 = vector.shape_cast %11 : vector<1x1x32xf32> to vector<1x32xf32>
    %cst = arith.constant dense<0.000000e+00> : vector<128xf32>
    %13 = vector.multi_reduction <add>, %8, %cst [1] : vector<128x32xf32> to vector<128xf32>
    %14 = vector.shape_cast %13 : vector<128xf32> to vector<128x1xf32>
    %cst_11 = arith.constant 3.200000e+01 : f32
    %15 = vector.broadcast %cst_11 : f32 to vector<128x1xf32>
    %16 = arith.divf %14, %15 : vector<128x1xf32>
    %17 = vector.broadcast %16 : vector<128x1xf32> to vector<128x32xf32>
    %18 = arith.subf %8, %17 : vector<128x32xf32>
    %19 = arith.mulf %18, %18 : vector<128x32xf32>
    %cst_12 = arith.constant dense<0.000000e+00> : vector<128xf32>
    %20 = vector.multi_reduction <add>, %19, %cst_12 [1] : vector<128x32xf32> to vector<128xf32>
    %21 = vector.shape_cast %20 : vector<128xf32> to vector<128x1xf32>
    %cst_13 = arith.constant 3.200000e+01 : f32
    %22 = vector.broadcast %cst_13 : f32 to vector<128x1xf32>
    %23 = arith.divf %21, %22 : vector<128x1xf32>
    %24 = vector.broadcast %16 : vector<128x1xf32> to vector<128x32xf32>
    %25 = arith.subf %8, %24 : vector<128x32xf32>
    %cst_14 = arith.constant 9.99999997E-7 : f32
    %26 = vector.broadcast %cst_14 : f32 to vector<128x1xf32>
    %27 = arith.addf %23, %26 : vector<128x1xf32>
    %28 = math.rsqrt %27 : vector<128x1xf32>
    %29 = vector.broadcast %28 : vector<128x1xf32> to vector<128x32xf32>
    %30 = arith.mulf %25, %29 : vector<128x32xf32>
    %31 = vector.broadcast %10 : vector<1x32xf32> to vector<128x32xf32>
    %32 = arith.mulf %30, %31 : vector<128x32xf32>
    %33 = vector.broadcast %12 : vector<1x32xf32> to vector<128x32xf32>
    %34 = arith.addf %32, %33 : vector<128x32xf32>
    %35 = arith.truncf %34 : vector<128x32xf32> to vector<128x32xbf16>
    %c0_15 = arith.constant 0 : index
    %c0_16 = arith.constant 0 : index
    %c0_17 = arith.constant 0 : index
    %36 = vector.load %arg8[%c0_15, %c0_16, %c0_17] : memref<1x32x96xbf16, #tpu.memory_space<vmem>>, vector<1x32x96xbf16>
    %37 = vector.shape_cast %36 : vector<1x32x96xbf16> to vector<32x96xbf16>
    %cst_18 = arith.constant dense<0.000000e+00> : vector<128x96xf32>
    %38 = tpu.matmul %35, %37, %cst_18 {dimension_numbers = #tpu.dot_dimension_numbers<[1], [0], [0], [1], [0, 0, 1, 1], [], []>} : vector<128x32xbf16>, vector<32x96xbf16>, vector<128x96xf32> -> vector<128x96xf32>
    %c0_19 = arith.constant 0 : index
    %c0_20 = arith.constant 0 : index
    %c0_21 = arith.constant 0 : index
    %39 = vector.load %arg9[%c0_19, %c0_20, %c0_21] : memref<1x1x96xf32, #tpu.memory_space<vmem>>, vector<1x1x96xf32>
    %40 = vector.shape_cast %39 : vector<1x1x96xf32> to vector<1x96xf32>
    %41 = vector.broadcast %40 : vector<1x96xf32> to vector<128x96xf32>
    %42 = arith.addf %38, %41 : vector<128x96xf32>
    %43 = arith.truncf %42 : vector<128x96xf32> to vector<128x96xbf16>
    %44 = tpu.iota {dimensions = array<i32: 1>} : vector<1x128xi32>
    %c21_i32 = arith.constant 21 : i32
    %45 = vector.broadcast %c21_i32 : i32 to vector<1x128xi32>
    %46 = arith.cmpi slt, %44, %45 : vector<1x128xi32>
    %cst_22 = arith.constant 0.000000e+00 : f32
    %cst_23 = arith.constant -1.000000e+30 : f32
    %47 = vector.broadcast %cst_22 : f32 to vector<1x128xf32>
    %48 = vector.broadcast %cst_23 : f32 to vector<1x128xf32>
    %49 = arith.select %46, %47, %48 : vector<1x128xi1>, vector<1x128xf32>
    %c0_24 = arith.constant 0 : index
    %c0_25 = arith.constant 0 : index
    %c0_26 = arith.constant 0 : index
    %50 = vector.load %arg10[%c0_24, %c0_25, %c0_26] : memref<1x32x32xbf16, #tpu.memory_space<vmem>>, vector<1x32x32xbf16>
    %51 = vector.shape_cast %50 : vector<1x32x32xbf16> to vector<32x32xbf16>
    %cst_27 = arith.constant 0.000000e+00 : f32
    %52 = vector.broadcast %cst_27 : f32 to vector<128x32xf32>
    %53 = vector.extract_strided_slice %43 {offsets = [0, 0], sizes = [128, 8], strides = [1, 1]} : vector<128x96xbf16> to vector<128x8xbf16>
    %54 = vector.extract_strided_slice %43 {offsets = [0, 32], sizes = [128, 8], strides = [1, 1]} : vector<128x96xbf16> to vector<128x8xbf16>
    %55 = vector.extract_strided_slice %43 {offsets = [0, 64], sizes = [128, 8], strides = [1, 1]} : vector<128x96xbf16> to vector<128x8xbf16>
    %cst_28 = arith.constant dense<0.000000e+00> : vector<128x128xf32>
    %56 = tpu.matmul %53, %54, %cst_28 {dimension_numbers = #tpu.dot_dimension_numbers<[1], [1], [0], [0], [0, 0, 1, 0], [], []>} : vector<128x8xbf16>, vector<128x8xbf16>, vector<128x128xf32> -> vector<128x128xf32>
    %cst_29 = arith.constant 0.353553385 : f32
    %57 = vector.broadcast %cst_29 : f32 to vector<128x128xf32>
    %58 = arith.mulf %56, %57 : vector<128x128xf32>
    %59 = vector.broadcast %49 : vector<1x128xf32> to vector<128x128xf32>
    %60 = arith.addf %58, %59 : vector<128x128xf32>
    %cst_30 = arith.constant dense<0xFF800000> : vector<128xf32>
    %61 = vector.multi_reduction <maximumf>, %60, %cst_30 [1] : vector<128x128xf32> to vector<128xf32>
    %62 = vector.shape_cast %61 : vector<128xf32> to vector<128x1xf32>
    %63 = vector.broadcast %62 : vector<128x1xf32> to vector<128x128xf32>
    %64 = arith.subf %60, %63 : vector<128x128xf32>
    %65 = math.exp %64 : vector<128x128xf32>
    %cst_31 = arith.constant dense<0.000000e+00> : vector<128xf32>
    %66 = vector.multi_reduction <add>, %65, %cst_31 [1] : vector<128x128xf32> to vector<128xf32>
    %67 = vector.shape_cast %66 : vector<128xf32> to vector<128x1xf32>
    %68 = tpu.reciprocal %67 {approx = true} : vector<128x1xf32> -> vector<128x1xf32>
    %69 = vector.broadcast %68 : vector<128x1xf32> to vector<128x128xf32>
    %70 = arith.mulf %65, %69 : vector<128x128xf32>
    %71 = arith.truncf %70 : vector<128x128xf32> to vector<128x128xbf16>
    %cst_32 = arith.constant dense<0.000000e+00> : vector<128x8xf32>
    %72 = tpu.matmul %71, %55, %cst_32 {dimension_numbers = #tpu.dot_dimension_numbers<[1], [0], [0], [1], [0, 0, 1, 1], [], []>} : vector<128x128xbf16>, vector<128x8xbf16>, vector<128x8xf32> -> vector<128x8xf32>
    %73 = arith.truncf %72 : vector<128x8xf32> to vector<128x8xbf16>
    %74 = vector.extract_strided_slice %51 {offsets = [0, 0], sizes = [8, 32], strides = [1, 1]} : vector<32x32xbf16> to vector<8x32xbf16>
    %cst_33 = arith.constant dense<0.000000e+00> : vector<128x32xf32>
    %75 = tpu.matmul %73, %74, %cst_33 {dimension_numbers = #tpu.dot_dimension_numbers<[1], [0], [0], [1], [0, 0, 1, 1], [], []>} : vector<128x8xbf16>, vector<8x32xbf16>, vector<128x32xf32> -> vector<128x32xf32>
    %76 = arith.addf %52, %75 : vector<128x32xf32>
    %77 = vector.extract_strided_slice %43 {offsets = [0, 8], sizes = [128, 8], strides = [1, 1]} : vector<128x96xbf16> to vector<128x8xbf16>
    %78 = vector.extract_strided_slice %43 {offsets = [0, 40], sizes = [128, 8], strides = [1, 1]} : vector<128x96xbf16> to vector<128x8xbf16>
    %79 = vector.extract_strided_slice %43 {offsets = [0, 72], sizes = [128, 8], strides = [1, 1]} : vector<128x96xbf16> to vector<128x8xbf16>
    %cst_34 = arith.constant dense<0.000000e+00> : vector<128x128xf32>
    %80 = tpu.matmul %77, %78, %cst_34 {dimension_numbers = #tpu.dot_dimension_numbers<[1], [1], [0], [0], [0, 0, 1, 0], [], []>} : vector<128x8xbf16>, vector<128x8xbf16>, vector<128x128xf32> -> vector<128x128xf32>
    %cst_35 = arith.constant 0.353553385 : f32
    %81 = vector.broadcast %cst_35 : f32 to vector<128x128xf32>
    %82 = arith.mulf %80, %81 : vector<128x128xf32>
    %83 = vector.broadcast %49 : vector<1x128xf32> to vector<128x128xf32>
    %84 = arith.addf %82, %83 : vector<128x128xf32>
    %cst_36 = arith.constant dense<0xFF800000> : vector<128xf32>
    %85 = vector.multi_reduction <maximumf>, %84, %cst_36 [1] : vector<128x128xf32> to vector<128xf32>
    %86 = vector.shape_cast %85 : vector<128xf32> to vector<128x1xf32>
    %87 = vector.broadcast %86 : vector<128x1xf32> to vector<128x128xf32>
    %88 = arith.subf %84, %87 : vector<128x128xf32>
    %89 = math.exp %88 : vector<128x128xf32>
    %cst_37 = arith.constant dense<0.000000e+00> : vector<128xf32>
    %90 = vector.multi_reduction <add>, %89, %cst_37 [1] : vector<128x128xf32> to vector<128xf32>
    %91 = vector.shape_cast %90 : vector<128xf32> to vector<128x1xf32>
    %92 = tpu.reciprocal %91 {approx = true} : vector<128x1xf32> -> vector<128x1xf32>
    %93 = vector.broadcast %92 : vector<128x1xf32> to vector<128x128xf32>
    %94 = arith.mulf %89, %93 : vector<128x128xf32>
    %95 = arith.truncf %94 : vector<128x128xf32> to vector<128x128xbf16>
    %cst_38 = arith.constant dense<0.000000e+00> : vector<128x8xf32>
    %96 = tpu.matmul %95, %79, %cst_38 {dimension_numbers = #tpu.dot_dimension_numbers<[1], [0], [0], [1], [0, 0, 1, 1], [], []>} : vector<128x128xbf16>, vector<128x8xbf16>, vector<128x8xf32> -> vector<128x8xf32>
    %97 = arith.truncf %96 : vector<128x8xf32> to vector<128x8xbf16>
    %98 = vector.extract_strided_slice %51 {offsets = [8, 0], sizes = [8, 32], strides = [1, 1]} : vector<32x32xbf16> to vector<8x32xbf16>
    %cst_39 = arith.constant dense<0.000000e+00> : vector<128x32xf32>
    %99 = tpu.matmul %97, %98, %cst_39 {dimension_numbers = #tpu.dot_dimension_numbers<[1], [0], [0], [1], [0, 0, 1, 1], [], []>} : vector<128x8xbf16>, vector<8x32xbf16>, vector<128x32xf32> -> vector<128x32xf32>
    %100 = arith.addf %76, %99 : vector<128x32xf32>
    %101 = vector.extract_strided_slice %43 {offsets = [0, 16], sizes = [128, 8], strides = [1, 1]} : vector<128x96xbf16> to vector<128x8xbf16>
    %102 = vector.extract_strided_slice %43 {offsets = [0, 48], sizes = [128, 8], strides = [1, 1]} : vector<128x96xbf16> to vector<128x8xbf16>
    %103 = vector.extract_strided_slice %43 {offsets = [0, 80], sizes = [128, 8], strides = [1, 1]} : vector<128x96xbf16> to vector<128x8xbf16>
    %cst_40 = arith.constant dense<0.000000e+00> : vector<128x128xf32>
    %104 = tpu.matmul %101, %102, %cst_40 {dimension_numbers = #tpu.dot_dimension_numbers<[1], [1], [0], [0], [0, 0, 1, 0], [], []>} : vector<128x8xbf16>, vector<128x8xbf16>, vector<128x128xf32> -> vector<128x128xf32>
    %cst_41 = arith.constant 0.353553385 : f32
    %105 = vector.broadcast %cst_41 : f32 to vector<128x128xf32>
    %106 = arith.mulf %104, %105 : vector<128x128xf32>
    %107 = vector.broadcast %49 : vector<1x128xf32> to vector<128x128xf32>
    %108 = arith.addf %106, %107 : vector<128x128xf32>
    %cst_42 = arith.constant dense<0xFF800000> : vector<128xf32>
    %109 = vector.multi_reduction <maximumf>, %108, %cst_42 [1] : vector<128x128xf32> to vector<128xf32>
    %110 = vector.shape_cast %109 : vector<128xf32> to vector<128x1xf32>
    %111 = vector.broadcast %110 : vector<128x1xf32> to vector<128x128xf32>
    %112 = arith.subf %108, %111 : vector<128x128xf32>
    %113 = math.exp %112 : vector<128x128xf32>
    %cst_43 = arith.constant dense<0.000000e+00> : vector<128xf32>
    %114 = vector.multi_reduction <add>, %113, %cst_43 [1] : vector<128x128xf32> to vector<128xf32>
    %115 = vector.shape_cast %114 : vector<128xf32> to vector<128x1xf32>
    %116 = tpu.reciprocal %115 {approx = true} : vector<128x1xf32> -> vector<128x1xf32>
    %117 = vector.broadcast %116 : vector<128x1xf32> to vector<128x128xf32>
    %118 = arith.mulf %113, %117 : vector<128x128xf32>
    %119 = arith.truncf %118 : vector<128x128xf32> to vector<128x128xbf16>
    %cst_44 = arith.constant dense<0.000000e+00> : vector<128x8xf32>
    %120 = tpu.matmul %119, %103, %cst_44 {dimension_numbers = #tpu.dot_dimension_numbers<[1], [0], [0], [1], [0, 0, 1, 1], [], []>} : vector<128x128xbf16>, vector<128x8xbf16>, vector<128x8xf32> -> vector<128x8xf32>
    %121 = arith.truncf %120 : vector<128x8xf32> to vector<128x8xbf16>
    %122 = vector.extract_strided_slice %51 {offsets = [16, 0], sizes = [8, 32], strides = [1, 1]} : vector<32x32xbf16> to vector<8x32xbf16>
    %cst_45 = arith.constant dense<0.000000e+00> : vector<128x32xf32>
    %123 = tpu.matmul %121, %122, %cst_45 {dimension_numbers = #tpu.dot_dimension_numbers<[1], [0], [0], [1], [0, 0, 1, 1], [], []>} : vector<128x8xbf16>, vector<8x32xbf16>, vector<128x32xf32> -> vector<128x32xf32>
    %124 = arith.addf %100, %123 : vector<128x32xf32>
    %125 = vector.extract_strided_slice %43 {offsets = [0, 24], sizes = [128, 8], strides = [1, 1]} : vector<128x96xbf16> to vector<128x8xbf16>
    %126 = vector.extract_strided_slice %43 {offsets = [0, 56], sizes = [128, 8], strides = [1, 1]} : vector<128x96xbf16> to vector<128x8xbf16>
    %127 = vector.extract_strided_slice %43 {offsets = [0, 88], sizes = [128, 8], strides = [1, 1]} : vector<128x96xbf16> to vector<128x8xbf16>
    %cst_46 = arith.constant dense<0.000000e+00> : vector<128x128xf32>
    %128 = tpu.matmul %125, %126, %cst_46 {dimension_numbers = #tpu.dot_dimension_numbers<[1], [1], [0], [0], [0, 0, 1, 0], [], []>} : vector<128x8xbf16>, vector<128x8xbf16>, vector<128x128xf32> -> vector<128x128xf32>
    %cst_47 = arith.constant 0.353553385 : f32
    %129 = vector.broadcast %cst_47 : f32 to vector<128x128xf32>
    %130 = arith.mulf %128, %129 : vector<128x128xf32>
    %131 = vector.broadcast %49 : vector<1x128xf32> to vector<128x128xf32>
    %132 = arith.addf %130, %131 : vector<128x128xf32>
    %cst_48 = arith.constant dense<0xFF800000> : vector<128xf32>
    %133 = vector.multi_reduction <maximumf>, %132, %cst_48 [1] : vector<128x128xf32> to vector<128xf32>
    %134 = vector.shape_cast %133 : vector<128xf32> to vector<128x1xf32>
    %135 = vector.broadcast %134 : vector<128x1xf32> to vector<128x128xf32>
    %136 = arith.subf %132, %135 : vector<128x128xf32>
    %137 = math.exp %136 : vector<128x128xf32>
    %cst_49 = arith.constant dense<0.000000e+00> : vector<128xf32>
    %138 = vector.multi_reduction <add>, %137, %cst_49 [1] : vector<128x128xf32> to vector<128xf32>
    %139 = vector.shape_cast %138 : vector<128xf32> to vector<128x1xf32>
    %140 = tpu.reciprocal %139 {approx = true} : vector<128x1xf32> -> vector<128x1xf32>
    %141 = vector.broadcast %140 : vector<128x1xf32> to vector<128x128xf32>
    %142 = arith.mulf %137, %141 : vector<128x128xf32>
    %143 = arith.truncf %142 : vector<128x128xf32> to vector<128x128xbf16>
    %cst_50 = arith.constant dense<0.000000e+00> : vector<128x8xf32>
    %144 = tpu.matmul %143, %127, %cst_50 {dimension_numbers = #tpu.dot_dimension_numbers<[1], [0], [0], [1], [0, 0, 1, 1], [], []>} : vector<128x128xbf16>, vector<128x8xbf16>, vector<128x8xf32> -> vector<128x8xf32>
    %145 = arith.truncf %144 : vector<128x8xf32> to vector<128x8xbf16>
    %146 = vector.extract_strided_slice %51 {offsets = [24, 0], sizes = [8, 32], strides = [1, 1]} : vector<32x32xbf16> to vector<8x32xbf16>
    %cst_51 = arith.constant dense<0.000000e+00> : vector<128x32xf32>
    %147 = tpu.matmul %145, %146, %cst_51 {dimension_numbers = #tpu.dot_dimension_numbers<[1], [0], [0], [1], [0, 0, 1, 1], [], []>} : vector<128x8xbf16>, vector<8x32xbf16>, vector<128x32xf32> -> vector<128x32xf32>
    %148 = arith.addf %124, %147 : vector<128x32xf32>
    %c0_52 = arith.constant 0 : index
    %c0_53 = arith.constant 0 : index
    %c0_54 = arith.constant 0 : index
    %149 = vector.load %arg11[%c0_52, %c0_53, %c0_54] : memref<1x1x32xf32, #tpu.memory_space<vmem>>, vector<1x1x32xf32>
    %150 = vector.shape_cast %149 : vector<1x1x32xf32> to vector<1x32xf32>
    %151 = vector.broadcast %150 : vector<1x32xf32> to vector<128x32xf32>
    %152 = arith.addf %148, %151 : vector<128x32xf32>
    %153 = arith.addf %152, %8 : vector<128x32xf32>
    %c0_55 = arith.constant 0 : index
    %c0_56 = arith.constant 0 : index
    %c0_57 = arith.constant 0 : index
    %154 = vector.load %arg12[%c0_55, %c0_56, %c0_57] : memref<1x1x32xf32, #tpu.memory_space<vmem>>, vector<1x1x32xf32>
    %155 = vector.shape_cast %154 : vector<1x1x32xf32> to vector<1x32xf32>
    %c0_58 = arith.constant 0 : index
    %c0_59 = arith.constant 0 : index
    %c0_60 = arith.constant 0 : index
    %156 = vector.load %arg13[%c0_58, %c0_59, %c0_60] : memref<1x1x32xf32, #tpu.memory_space<vmem>>, vector<1x1x32xf32>
    %157 = vector.shape_cast %156 : vector<1x1x32xf32> to vector<1x32xf32>
    %cst_61 = arith.constant dense<0.000000e+00> : vector<128xf32>
    %158 = vector.multi_reduction <add>, %153, %cst_61 [1] : vector<128x32xf32> to vector<128xf32>
    %159 = vector.shape_cast %158 : vector<128xf32> to vector<128x1xf32>
    %cst_62 = arith.constant 3.200000e+01 : f32
    %160 = vector.broadcast %cst_62 : f32 to vector<128x1xf32>
    %161 = arith.divf %159, %160 : vector<128x1xf32>
    %162 = vector.broadcast %161 : vector<128x1xf32> to vector<128x32xf32>
    %163 = arith.subf %153, %162 : vector<128x32xf32>
    %164 = arith.mulf %163, %163 : vector<128x32xf32>
    %cst_63 = arith.constant dense<0.000000e+00> : vector<128xf32>
    %165 = vector.multi_reduction <add>, %164, %cst_63 [1] : vector<128x32xf32> to vector<128xf32>
    %166 = vector.shape_cast %165 : vector<128xf32> to vector<128x1xf32>
    %cst_64 = arith.constant 3.200000e+01 : f32
    %167 = vector.broadcast %cst_64 : f32 to vector<128x1xf32>
    %168 = arith.divf %166, %167 : vector<128x1xf32>
    %169 = vector.broadcast %161 : vector<128x1xf32> to vector<128x32xf32>
    %170 = arith.subf %153, %169 : vector<128x32xf32>
    %cst_65 = arith.constant 9.99999997E-7 : f32
    %171 = vector.broadcast %cst_65 : f32 to vector<128x1xf32>
    %172 = arith.addf %168, %171 : vector<128x1xf32>
    %173 = math.rsqrt %172 : vector<128x1xf32>
    %174 = vector.broadcast %173 : vector<128x1xf32> to vector<128x32xf32>
    %175 = arith.mulf %170, %174 : vector<128x32xf32>
    %176 = vector.broadcast %155 : vector<1x32xf32> to vector<128x32xf32>
    %177 = arith.mulf %175, %176 : vector<128x32xf32>
    %178 = vector.broadcast %157 : vector<1x32xf32> to vector<128x32xf32>
    %179 = arith.addf %177, %178 : vector<128x32xf32>
    %180 = arith.truncf %179 : vector<128x32xf32> to vector<128x32xbf16>
    %c0_66 = arith.constant 0 : index
    %c0_67 = arith.constant 0 : index
    %c0_68 = arith.constant 0 : index
    %181 = vector.load %arg14[%c0_66, %c0_67, %c0_68] : memref<1x32x64xbf16, #tpu.memory_space<vmem>>, vector<1x32x64xbf16>
    %182 = vector.shape_cast %181 : vector<1x32x64xbf16> to vector<32x64xbf16>
    %cst_69 = arith.constant dense<0.000000e+00> : vector<128x64xf32>
    %183 = tpu.matmul %180, %182, %cst_69 {dimension_numbers = #tpu.dot_dimension_numbers<[1], [0], [0], [1], [0, 0, 1, 1], [], []>} : vector<128x32xbf16>, vector<32x64xbf16>, vector<128x64xf32> -> vector<128x64xf32>
    %c0_70 = arith.constant 0 : index
    %c0_71 = arith.constant 0 : index
    %c0_72 = arith.constant 0 : index
    %184 = vector.load %arg15[%c0_70, %c0_71, %c0_72] : memref<1x1x64xf32, #tpu.memory_space<vmem>>, vector<1x1x64xf32>
    %185 = vector.shape_cast %184 : vector<1x1x64xf32> to vector<1x64xf32>
    %186 = vector.broadcast %185 : vector<1x64xf32> to vector<128x64xf32>
    %187 = arith.addf %183, %186 : vector<128x64xf32>
    %cst_73 = arith.constant 5.000000e-01 : f32
    %188 = vector.broadcast %cst_73 : f32 to vector<128x64xf32>
    %189 = arith.mulf %188, %187 : vector<128x64xf32>
    %cst_74 = arith.constant 0.707106769 : f32
    %190 = vector.broadcast %cst_74 : f32 to vector<128x64xf32>
    %191 = arith.mulf %187, %190 : vector<128x64xf32>
    %192 = math.erf %191 : vector<128x64xf32>
    %cst_75 = arith.constant 1.000000e+00 : f32
    %193 = vector.broadcast %cst_75 : f32 to vector<128x64xf32>
    %194 = arith.addf %193, %192 : vector<128x64xf32>
    %195 = arith.mulf %189, %194 : vector<128x64xf32>
    %196 = arith.truncf %195 : vector<128x64xf32> to vector<128x64xbf16>
    %c0_76 = arith.constant 0 : index
    %c0_77 = arith.constant 0 : index
    %c0_78 = arith.constant 0 : index
    %197 = vector.load %arg16[%c0_76, %c0_77, %c0_78] : memref<1x64x32xbf16, #tpu.memory_space<vmem>>, vector<1x64x32xbf16>
    %198 = vector.shape_cast %197 : vector<1x64x32xbf16> to vector<64x32xbf16>
    %cst_79 = arith.constant dense<0.000000e+00> : vector<128x32xf32>
    %199 = tpu.matmul %196, %198, %cst_79 {dimension_numbers = #tpu.dot_dimension_numbers<[1], [0], [0], [1], [0, 0, 1, 1], [], []>} : vector<128x64xbf16>, vector<64x32xbf16>, vector<128x32xf32> -> vector<128x32xf32>
    %c0_80 = arith.constant 0 : index
    %c0_81 = arith.constant 0 : index
    %c0_82 = arith.constant 0 : index
    %200 = vector.load %arg17[%c0_80, %c0_81, %c0_82] : memref<1x1x32xf32, #tpu.memory_space<vmem>>, vector<1x1x32xf32>
    %201 = vector.shape_cast %200 : vector<1x1x32xf32> to vector<1x32xf32>
    %202 = vector.broadcast %201 : vector<1x32xf32> to vector<128x32xf32>
    %203 = arith.addf %199, %202 : vector<128x32xf32>
    %204 = arith.addf %153, %203 : vector<128x32xf32>
    %c0_83 = arith.constant 0 : index
    %c0_84 = arith.constant 0 : index
    %205 = vector.load %arg25[%c0_83, %c0_84] : memref<128x32xf32, #tpu.memory_space<vmem>>, vector<128x32xf32>
    tpu.vector_store %arg25[%c0_83, %c0_84], %204 {strides = array<i32>} : memref<128x32xf32, #tpu.memory_space<vmem>>, vector<128x32xf32>,
    %c1_i32 = arith.constant 1 : i32
    %206 = arith.cmpi eq, %arg1, %c1_i32 : i32
    %207 = arith.extui %206 : i1 to i32
    %c0_i32_85 = arith.constant 0 : i32
    %208 = arith.cmpi ne, %207, %c0_i32_85 : i32
    scf.if %208 {
      %209 = vector.extract_strided_slice %204 {offsets = [0, 0], sizes = [1, 32], strides = [1, 1]} : vector<128x32xf32> to vector<1x32xf32>
      %c0_86 = arith.constant 0 : index
      %c0_87 = arith.constant 0 : index
      %210 = vector.load %arg20[%c0_86, %c0_87] : memref<1x32xf32, #tpu.memory_space<vmem>>, vector<1x32xf32>
      %c0_88 = arith.constant 0 : index
      %c0_89 = arith.constant 0 : index
      %211 = vector.load %arg21[%c0_88, %c0_89] : memref<1x32xf32, #tpu.memory_space<vmem>>, vector<1x32xf32>
      %cst_90 = arith.constant dense<0.000000e+00> : vector<1xf32>
      %212 = vector.multi_reduction <add>, %209, %cst_90 [1] : vector<1x32xf32> to vector<1xf32>
      %213 = vector.shape_cast %212 : vector<1xf32> to vector<1x1xf32>
      %cst_91 = arith.constant 3.200000e+01 : f32
      %214 = vector.broadcast %cst_91 : f32 to vector<1x1xf32>
      %215 = arith.divf %213, %214 : vector<1x1xf32>
      %216 = vector.broadcast %215 : vector<1x1xf32> to vector<1x32xf32>
      %217 = arith.subf %209, %216 : vector<1x32xf32>
      %218 = arith.mulf %217, %217 : vector<1x32xf32>
      %cst_92 = arith.constant dense<0.000000e+00> : vector<1xf32>
      %219 = vector.multi_reduction <add>, %218, %cst_92 [1] : vector<1x32xf32> to vector<1xf32>
      %220 = vector.shape_cast %219 : vector<1xf32> to vector<1x1xf32>
      %cst_93 = arith.constant 3.200000e+01 : f32
      %221 = vector.broadcast %cst_93 : f32 to vector<1x1xf32>
      %222 = arith.divf %220, %221 : vector<1x1xf32>
      %223 = vector.broadcast %215 : vector<1x1xf32> to vector<1x32xf32>
      %224 = arith.subf %209, %223 : vector<1x32xf32>
      %cst_94 = arith.constant 9.99999997E-7 : f32
      %225 = vector.broadcast %cst_94 : f32 to vector<1x1xf32>
      %226 = arith.addf %222, %225 : vector<1x1xf32>
      %227 = math.rsqrt %226 : vector<1x1xf32>
      %228 = vector.broadcast %227 : vector<1x1xf32> to vector<1x32xf32>
      %229 = arith.mulf %224, %228 : vector<1x32xf32>
      %230 = arith.mulf %229, %210 : vector<1x32xf32>
      %231 = arith.addf %230, %211 : vector<1x32xf32>
      %232 = arith.truncf %231 : vector<1x32xf32> to vector<1x32xbf16>
      %c0_95 = arith.constant 0 : index
      %c0_96 = arith.constant 0 : index
      %233 = vector.load %arg22[%c0_95, %c0_96] : memref<32x128xbf16, #tpu.memory_space<vmem>>, vector<32x128xbf16>
      %cst_97 = arith.constant dense<0.000000e+00> : vector<1x128xf32>
      %234 = tpu.matmul %232, %233, %cst_97 {dimension_numbers = #tpu.dot_dimension_numbers<[1], [0], [0], [1], [0, 0, 1, 1], [], []>} : vector<1x32xbf16>, vector<32x128xbf16>, vector<1x128xf32> -> vector<1x128xf32>
      %c0_98 = arith.constant 0 : index
      %c0_99 = arith.constant 0 : index
      %235 = vector.load %arg23[%c0_98, %c0_99] : memref<1x128xf32, #tpu.memory_space<vmem>>, vector<1x128xf32>
      %236 = arith.addf %234, %235 : vector<1x128xf32>
      %c0_100 = arith.constant 0 : index
      %c0_101 = arith.constant 0 : index
      %c0_102 = arith.constant 0 : index
      %237 = vector.load %arg24[%c0_100, %c0_101, %c0_102] : memref<1x1x128xf32, #tpu.memory_space<vmem>>, vector<1x1x128xf32>
      %238 = vector.shape_cast %237 : vector<1x1x128xf32> to vector<1x128xf32>
      %239 = vector.shape_cast %236 : vector<1x128xf32> to vector<1x1x128xf32>
      tpu.vector_store %arg24[%c0_100, %c0_101, %c0_102], %239 {strides = array<i32>} : memref<1x1x128xf32, #tpu.memory_space<vmem>>, vector<1x1x128xf32>,
    } else {
    }
    return
  }
  func.func @transform_0(%arg0: i32, %arg1: i32) -> (i32, i32, i32) {
    %c0_i32 = arith.constant 0 : i32
    %c0_i32_0 = arith.constant 0 : i32
    %c0_i32_1 = arith.constant 0 : i32
    return %arg0, %c0_i32, %c0_i32_0 : i32, i32, i32
  }
  func.func @transform_1(%arg0: i32, %arg1: i32) -> (i32, i32) {
    %c0_i32 = arith.constant 0 : i32
    %c0_i32_0 = arith.constant 0 : i32
    %c0_i32_1 = arith.constant 0 : i32
    return %c0_i32, %c0_i32_0 : i32, i32
  }
  func.func @transform_2(%arg0: i32, %arg1: i32) -> (i32, i32) {
    %c0_i32 = arith.constant 0 : i32
    %c0_i32_0 = arith.constant 0 : i32
    %c0_i32_1 = arith.constant 0 : i32
    return %c0_i32, %c0_i32_0 : i32, i32
  }
  func.func @transform_3(%arg0: i32, %arg1: i32) -> (i32, i32, i32) {
    %c0_i32 = arith.constant 0 : i32
    %c0_i32_0 = arith.constant 0 : i32
    %c0_i32_1 = arith.constant 0 : i32
    return %arg1, %c0_i32, %c0_i32_0 : i32, i32, i32
  }
  func.func @transform_4(%arg0: i32, %arg1: i32) -> (i32, i32, i32) {
    %c0_i32 = arith.constant 0 : i32
    %c0_i32_0 = arith.constant 0 : i32
    %c0_i32_1 = arith.constant 0 : i32
    return %arg1, %c0_i32, %c0_i32_0 : i32, i32, i32
  }
  func.func @transform_5(%arg0: i32, %arg1: i32) -> (i32, i32, i32) {
    %c0_i32 = arith.constant 0 : i32
    %c0_i32_0 = arith.constant 0 : i32
    %c0_i32_1 = arith.constant 0 : i32
    return %arg1, %c0_i32, %c0_i32_0 : i32, i32, i32
  }
  func.func @transform_6(%arg0: i32, %arg1: i32) -> (i32, i32, i32) {
    %c0_i32 = arith.constant 0 : i32
    %c0_i32_0 = arith.constant 0 : i32
    %c0_i32_1 = arith.constant 0 : i32
    return %arg1, %c0_i32, %c0_i32_0 : i32, i32, i32
  }
  func.func @transform_7(%arg0: i32, %arg1: i32) -> (i32, i32, i32) {
    %c0_i32 = arith.constant 0 : i32
    %c0_i32_0 = arith.constant 0 : i32
    %c0_i32_1 = arith.constant 0 : i32
    return %arg1, %c0_i32, %c0_i32_0 : i32, i32, i32
  }
  func.func @transform_8(%arg0: i32, %arg1: i32) -> (i32, i32, i32) {
    %c0_i32 = arith.constant 0 : i32
    %c0_i32_0 = arith.constant 0 : i32
    %c0_i32_1 = arith.constant 0 : i32
    return %arg1, %c0_i32, %c0_i32_0 : i32, i32, i32
  }
  func.func @transform_9(%arg0: i32, %arg1: i32) -> (i32, i32, i32) {
    %c0_i32 = arith.constant 0 : i32
    %c0_i32_0 = arith.constant 0 : i32
    %c0_i32_1 = arith.constant 0 : i32
    return %arg1, %c0_i32, %c0_i32_0 : i32, i32, i32
  }
  func.func @transform_10(%arg0: i32, %arg1: i32) -> (i32, i32, i32) {
    %c0_i32 = arith.constant 0 : i32
    %c0_i32_0 = arith.constant 0 : i32
    %c0_i32_1 = arith.constant 0 : i32
    return %arg1, %c0_i32, %c0_i32_0 : i32, i32, i32
  }
  func.func @transform_11(%arg0: i32, %arg1: i32) -> (i32, i32, i32) {
    %c0_i32 = arith.constant 0 : i32
    %c0_i32_0 = arith.constant 0 : i32
    %c0_i32_1 = arith.constant 0 : i32
    return %arg1, %c0_i32, %c0_i32_0 : i32, i32, i32
  }
  func.func @transform_12(%arg0: i32, %arg1: i32) -> (i32, i32, i32) {
    %c0_i32 = arith.constant 0 : i32
    %c0_i32_0 = arith.constant 0 : i32
    %c0_i32_1 = arith.constant 0 : i32
    return %arg1, %c0_i32, %c0_i32_0 : i32, i32, i32
  }
  func.func @transform_13(%arg0: i32, %arg1: i32) -> (i32, i32, i32) {
    %c0_i32 = arith.constant 0 : i32
    %c0_i32_0 = arith.constant 0 : i32
    %c0_i32_1 = arith.constant 0 : i32
    return %arg1, %c0_i32, %c0_i32_0 : i32, i32, i32
  }
  func.func @transform_14(%arg0: i32, %arg1: i32) -> (i32, i32, i32) {
    %c0_i32 = arith.constant 0 : i32
    %c0_i32_0 = arith.constant 0 : i32
    %c0_i32_1 = arith.constant 0 : i32
    return %arg1, %c0_i32, %c0_i32_0 : i32, i32, i32
  }
  func.func @transform_15(%arg0: i32, %arg1: i32) -> (i32, i32, i32) {
    %c0_i32 = arith.constant 0 : i32
    %c0_i32_0 = arith.constant 0 : i32
    %c0_i32_1 = arith.constant 0 : i32
    return %arg1, %c0_i32, %c0_i32_0 : i32, i32, i32
  }
  func.func @transform_16(%arg0: i32, %arg1: i32) -> (i32, i32) {
    %c0_i32 = arith.constant 0 : i32
    %c0_i32_0 = arith.constant 0 : i32
    %c0_i32_1 = arith.constant 0 : i32
    return %c0_i32, %c0_i32_0 : i32, i32
  }
  func.func @transform_17(%arg0: i32, %arg1: i32) -> (i32, i32) {
    %c0_i32 = arith.constant 0 : i32
    %c0_i32_0 = arith.constant 0 : i32
    %c0_i32_1 = arith.constant 0 : i32
    return %c0_i32, %c0_i32_0 : i32, i32
  }
  func.func @transform_18(%arg0: i32, %arg1: i32) -> (i32, i32) {
    %c0_i32 = arith.constant 0 : i32
    %c0_i32_0 = arith.constant 0 : i32
    %c0_i32_1 = arith.constant 0 : i32
    return %c0_i32, %c0_i32_0 : i32, i32
  }
  func.func @transform_19(%arg0: i32, %arg1: i32) -> (i32, i32) {
    %c0_i32 = arith.constant 0 : i32
    %c0_i32_0 = arith.constant 0 : i32
    %c0_i32_1 = arith.constant 0 : i32
    return %c0_i32, %c0_i32_0 : i32, i32
  }
  func.func @transform_20(%arg0: i32, %arg1: i32) -> (i32, i32) {
    %c0_i32 = arith.constant 0 : i32
    %c0_i32_0 = arith.constant 0 : i32
    %c0_i32_1 = arith.constant 0 : i32
    return %c0_i32, %c0_i32_0 : i32, i32
  }
  func.func @transform_21(%arg0: i32, %arg1: i32) -> (i32, i32) {
    %c0_i32 = arith.constant 0 : i32
    %c0_i32_0 = arith.constant 0 : i32
    %c0_i32_1 = arith.constant 0 : i32
    return %c0_i32, %c0_i32_0 : i32, i32
  }
  func.func @transform_22(%arg0: i32, %arg1: i32) -> (i32, i32, i32) {
    %c0_i32 = arith.constant 0 : i32
    %c0_i32_0 = arith.constant 0 : i32
    %c0_i32_1 = arith.constant 0 : i32
    return %arg0, %c0_i32, %c0_i32_0 : i32, i32, i32
  }
}

</mosaic_0001>

<bundles_post_ra>
// kernel: tpu_custom_call.1
= control target key start
LH: loop header
LB: loop body
LE: loop exit
PB: predicated region body
PF: predicated region fallthrough
CT: control target
= control target key end

     0   :  { %s8408_s0 = inlined_call_operand.vmem [shape: bf16[2,16,48], index: 0, kind: input, shape index: {}]   ;;  %s8409_s1 = inlined_call_operand.vmem [shape: f32[1,32], index: 1, kind: input, shape index: {}]   ;;  %s8410_s2 = inlined_call_operand.vmem [shape: f32[128,32], index: 2, kind: input, shape index: {}]   ;;  %s8411_s3 = inlined_call_operand.vmem [shape: f32[2,4,32], index: 3, kind: input, shape index: {}]   ;;  %s8412_s4 = inlined_call_operand.vmem [shape: f32[2,1,32], index: 4, kind: input, shape index: {}]   ;;  %s8413_s5 = inlined_call_operand.vmem [shape: f32[2,1,32], index: 5, kind: input, shape index: {}]   ;;  %s8414_s6 = inlined_call_operand.vmem [shape: bf16[2,32,96], index: 6, kind: input, shape index: {}]   ;;  %s8415_s7 = inlined_call_operand.vmem [shape: f32[2,1,96], index: 7, kind: input, shape index: {}]   ;;  %s8416_s8 = inlined_call_operand.vmem [shape: bf16[2,32,32], index: 8, kind: input, shape index: {}]   ;;  %s8417_s9 = inlined_call_operand.vmem [shape: f32[2,1,32], index: 9, kind: input, shape index: {}]   ;;  %s8418_s10 = inlined_call_operand.vmem [shape: f32[2,1,32], index: 10, kind: input, shape index: {}]   ;;  %s8419_s11 = inlined_call_operand.vmem [shape: f32[2,1,32], index: 11, kind: input, shape index: {}]   ;;  %s8420_s12 = inlined_call_operand.vmem [shape: bf16[2,32,64], index: 12, kind: input, shape index: {}]   ;;  %s8421_s13 = inlined_call_operand.vmem [shape: f32[2,1,64], index: 13, kind: input, shape index: {}]   ;;  %s8422_s14 = inlined_call_operand.vmem [shape: bf16[2,64,32], index: 14, kind: input, shape index: {}]   ;;  %s8423_s15 = inlined_call_operand.vmem [shape: f32[2,1,32], index: 15, kind: input, shape index: {}]   ;;  %s8424_s16 = inlined_call_operand.vmem [shape: bf16[48,32], index: 16, kind: input, shape index: {}]   ;;  %s8425_s17 = inlined_call_operand.vmem [shape: f32[1,32], index: 17, kind: input, shape index: {}]   ;;  %s8426_s18 = inlined_call_operand.vmem [shape: f32[1,32], index: 18, kind: input, shape index: {}]   ;;  %s8427_s19 = inlined_call_operand.vmem [shape: f32[1,32], index: 19, kind: input, shape index: {}]   ;;  %s8428_s20 = inlined_call_operand.vmem [shape: bf16[32,128], index: 20, kind: input, shape index: {}]   ;;  %s8429_s21 = inlined_call_operand.vmem [shape: f32[1,128], index: 21, kind: input, shape index: {}]   ;;  %s8430_s22 = inlined_call_operand.hbm [shape: f32[2,1,128], index: 22, kind: output, shape index: {}]  }
   0x1   :  { %8456 = sst [smem:[#allocation28_spill]] %s8408_s0 }
   0x2   :  { %8457 = sst [smem:[#allocation29_spill]] %s8409_s1 }
   0x3   :  { %8458 = sst [smem:[#allocation30_spill]] %s8410_s2 }
   0x4   :  { %8459 = sst [smem:[#allocation31_spill]] %s8411_s3 }
   0x5   :  { %8460 = sst [smem:[#allocation32_spill]] %s8412_s4 }
   0x6   :  { %8461 = sst [smem:[#allocation33_spill]] %s8413_s5 }
   0x7   :  { %8462 = sst [smem:[#allocation34_spill]] %s8414_s6 }
   0x8   :  { %8463 = sst [smem:[#allocation35_spill]] %s8424_s16 }
   0x9   :  { %8464 = sst [smem:[#allocation36_spill]] %s8425_s17 }
   0xa   :  { %8465 = sst [smem:[#allocation37_spill]] %s8426_s18 }
   0xb   :  { %8466 = sst [smem:[#allocation38_spill]] %s8427_s19 }
   0xc   :  { %8467 = sst [smem:[#allocation39_spill]] %s8428_s20 }
   0xd   :  { %8468 = sst [smem:[#allocation40_spill]] %s8429_s21 }
   0xe   :  { %8469 = sst [smem:[#allocation41_spill]] %s8430_s22 }
   0xf   :  { %27 = vsyncpa [#allocation4], 0 }
  0x10   :  { %29 = vsyncpa [#allocation4 + $0x1], 0  ;;  %s6536_s3 = smov 0   ;;  %s6538_s28 = smov 0  }
  0x11   :  { %s6540_s29 = smov 0   ;;  %s6542_s30 = smov 0  }
  0x12   :  { %s6544_s4 = smov 0   ;;  %s6546_s0 = smov 0  }
  0x13   :  { %s6548_s23 = smov 0   ;;  %s6550_s1 = smov 0  }
  0x14 LB: > { %8470 = sst [smem:[#allocation6_spill]] %s6374_s3  ;;  %s5002_s5 = sadd.s32 4294967295, %s6402_s1   ;;  %s6402_s1 = sphi %s6550_s1, %s35_s1   ;;  %s6398_s23 = sphi %s6548_s23, %s8551_s23   ;;  %s6394_s0 = sphi %s6546_s0, %s8550_s0   ;;  %s6390_s4 = sphi %s6544_s4, %s8549_s4   ;;  %s6386_s30 = sphi %s6542_s30, %s8548_s30   ;;  %s6382_s29 = sphi %s6540_s29, %s8547_s29   ;;  %s6378_s28 = sphi %s6538_s28, %s8553_s28   ;;  %s6374_s3 = sphi %s6536_s3, %s8552_s3  }
  0x15   : > { %8471 = sst [smem:[#allocation7_spill]] %s6382_s29  ;;  %s5003_s24 = sadd.s32 4294967294, %s6402_s1  }
  0x16   : > { %8472 = sst [smem:[#allocation8_spill]] %s6386_s30  ;;  %s44_s6 = sadd.s32 1, %s6394_s0 }
  0x17   : > { %8473 = sst [smem:[#allocation9_spill]] %s6390_s4  ;;  %p45_p0 = scmp.ge.s32.totalorder %s44_s6, 2 }
  0x18   : > { %8474 = sst [smem:[#allocation10_spill]] %s6394_s0  ;;  %s47_s25 = sadd.s32 1, %s6398_s23 }
  0x19   : > { %8475 = sst [smem:[#allocation11_spill]] %s6398_s23  ;;  %p596_p1 = scmp.ne.s32.totalorder %s6382_s29, %s6378_s28 }
  0x1a   : > { %8476 = sst [smem:[#allocation12_spill]] %s6402_s1  ;;  %p597_p2 = scmp.eq.s32.totalorder %s5002_s5, 3 }
  0x1b   : > { %s8555_s6 = smov (%p45_p0, %s44_s6), 0  ;;  %s8557_s25 = smov (!%p45_p0, %s47_s25), %s6398_s23 }
  0x1c   : > { %8477 = sst [smem:[#allocation13_spill]] %s8555_s6  ;;  %p6585_p3 = por %p597_p2, %p596_p1 }
  0x1d   : > { %p602_p4 = scmp.ne.s32.totalorder %s6378_s28, %s6374_s3  ;;  %p49_p5 = scmp.ge.s32.totalorder %s8557_s25, 2 }
  0x1e   : > { %s8478_s26 = scalar_select %p6585_p3, 1, 0 }
  0x1f   : > { %p603_p6 = scmp.eq.s32.totalorder %s5003_s24, 3  ;;  %p5006_p7 = scmp.ge.s32.totalorder %s6402_s1, 1 }
  0x20   : > { %8479 = sst [smem:[#allocation14_spill]] %s8478_s26  ;;  %p740_p8 = scmp.lt.s32.totalorder %s6402_s1, 5 }
  0x21   : > { %s8559_s25 = smov (%p49_p5, %s8557_s25), 0  ;;  %p6595_p9 = por %p603_p6, %p602_p4 }
  0x22   : > { %8480 = sst [smem:[#allocation15_spill]] %s8559_s25  ;;  %p741_p10 = pnand %p5006_p7, %p740_p8 }
  0x23   : > { %s8481_s2 = scalar_select %p6595_p9, 1, 0 }
  0x24   : > { %s583_s27 = ssub.s32 %s6398_s23, %s8559_s25  ;;  %s586_s5 = sadd.s32 1, %s6382_s29 }
  0x25   : > { %8482 = sst [smem:[#allocation16_spill]] %s8481_s2  ;;  %p584_p11 = scmp.eq.s32.totalorder %s583_s27, 0 }
  0x26   : > { %744 = sbr.rel (%p741_p10) target bundleno = 4703 (0x125f), region = 108 }
  0x27   : > { %s6603_s6 = scalar_select %p584_p11, %s6382_s29, %s586_s5  }
  0x29   : > { %8483 = sst [smem:[#allocation17_spill]] %s6603_s6 }
  0x2d   : > { %p849_p12 = scmp.lt.s32.totalorder %s6390_s4, 1  ;;  %p854_p13 = scmp.lt.s32.totalorder %s6386_s30, 1 }
  0x2e   : > { %s8484_s23 = sld [smem:[#allocation28_spill]]  ;;  %s8486_s1 = sld [smem:[#allocation31_spill]] }
  0x2f   : > { %s850_s0 = scalar_select %p849_p12, %s6390_s4, 1 }
  0x30   : > { %s6610_s3 = scalar_select %p854_p13, %s6386_s30, 1 }
  0x31   : > { %s5136_s27 = sshll.u32 %s850_s0, 3  ;;  %s8490_s25 = sand.u32 1, %s6378_s28  }
  0x32   : > { %s5009_s6 = sshll.u32 %s6610_s3, 2  ;;  %s5137_s16 = sshll.u32 %s6610_s3, 4 }
  0x33   : > { %s6644_s2 = scalar_lea.vmem %s8416_s8, %s5137_s16  ;;  %s5140_s19 = sshll.u32 %s6610_s3, 5 }
  0x34   : > { %s6615_s24 = scalar_lea.vmem %s8484_s23, %s5136_s27  ;;  %s6621_s22 = scalar_lea.vmem %s8486_s1, %s5009_s6 }
  0x35   : > { %8485 = sst [smem:[#allocation18_spill]] %s6615_s24  ;;  %s8489_s23 = sld [smem:[#allocation34_spill]] }
  0x36   : > { %s6661_s24 = scalar_lea.vmem %s8420_s12, %s5137_s16  ;;  %s901_s18 = scalar_lea.vmem %s8423_s15, %s6610_s3 }
  0x37   : > { %s6675_s0 = scalar_lea.vmem %s8422_s14, %s5140_s19  ;;  %s6679_s5 = scalar_lea.vmem [#allocation3], %s8490_s25 }
  0x38   : > { %s8491_s17 = sld [smem:[#allocation8_spill]] }
  0x3b   : > { %s6635_s27 = scalar_lea.vmem %s8489_s23, %s5137_s16  ;;  %s885_s23 = scalar_lea.vmem %s8419_s11, %s6610_s3 }
  0x3e   : > { %p5018_p0 = scmp.ne.s32.totalorder %s8491_s17, 0 }
  0x3f   : > { %s8492_s1 = sld [smem:[#allocation35_spill]] (!%p5018_p0)  ;;  %s8494_s29 = sld [smem:[#allocation18_spill]] (!%p5018_p0)  ;;  %v6404_v1 = vmov (!%p5018_p0), 0.0   ;;  %vm6405_vm0 = vmmov (!%p5018_p0), 0   ;;  %vm945_vm1 = vcmask (!%p5018_p0), 392192   ;;  %vm1034_vm2 = vcmask (!%p5018_p0), 261120  }
  0x40   : > { %906 = sbr.rel (%p5018_p0) target bundleno = 303 (0x12f), region = 112  ;;  %5344 = vmatprep.subr.bf16.mxu0 (!%p5018_p0), %v6404_v1  ;;  %5350 = vmatprep.mubr.msk.bf16.mxu0 (!%p5018_p0), %vm6405_vm0, %v6404_v1  ;;  %s8495_s17 = sld [smem:[#allocation30_spill]] (!%p5018_p0)  ;;  %vm993_vm3 = vcmask (!%p5018_p0), 1040384  }
  0x41   : > { %s8497_s25 = sld [smem:[#allocation29_spill]] (!%p5018_p0) }
  0x45   : > { %s8493_s6 = smov (!%p5018_p0), %s8492_s1  ;;  %v5925_v0 = vld [vmem:[%s8492_s1] sm:$0xff] (!%p5018_p0)  }
  0x46   : > { %5345 = vmatpush3.bf16.msra.mxu0 (!%p5018_p0), %v5925_v0  ;;  %v5926_v2 = vld [vmem:[%s8493_s6 + $0x8] sm:$0xff] (!%p5018_p0)   ;;  %v5927_v3 = vld [vmem:[%s8493_s6 + $0x10] sm:$0xff] (!%p5018_p0)   ;;  %v5928_v4 = vld [vmem:[%s8494_s29] sm:$0xff] (!%p5018_p0)   ;;  %s8496_s29 = sld [smem:[#allocation36_spill]] (!%p5018_p0) }
  0x47   : > { %5346 = vmatprep.subr.bf16.mxu0 %v6404_v1  ;;  %v1005_v5 = vld [vmem:[%s8495_s17 + $0x18] sm:$0xff]  ;;  %v1006_v6 = vld [vmem:[%s8495_s17 + $0x20] sm:$0xff]  ;;  %v1007_v7 = vld [vmem:[%s8495_s17 + $0x28] sm:$0xff] }
  0x48   : > { %v1008_v8 = vld [vmem:[%s8495_s17 + $0x30] sm:$0xff]  ;;  %1038 = vst.msk [vmem:[#allocation2 + $0x18] sm:$0xff] %vm1034_vm2, %v1005_v5  ;;  %v1009_v9 = vld [vmem:[%s8495_s17 + $0x38] sm:$0xff]  ;;  %v1010_v10 = vld [vmem:[%s8495_s17 + $0x40] sm:$0xff] }
  0x49   : > { %v1011_v11 = vld [vmem:[%s8495_s17 + $0x48] sm:$0xff]  ;;  %1039 = vst.msk [vmem:[#allocation2 + $0x20] sm:$0xff] %vm1034_vm2, %v1006_v6  ;;  %1040 = vst.msk [vmem:[#allocation2 + $0x28] sm:$0xff] %vm1034_vm2, %v1007_v7  ;;  %v1012_v12 = vld [vmem:[%s8495_s17 + $0x50] sm:$0xff] }
  0x4a   : > { %5347 = vmatpush3.bf16.msra.mxu0 %v5926_v2  ;;  %1041 = vst.msk [vmem:[#allocation2 + $0x30] sm:$0xff] %vm1034_vm2, %v1008_v8  ;;  %v1013_v13 = vld [vmem:[%s8495_s17 + $0x58] sm:$0xff]  ;;  %v1014_v14 = vld [vmem:[%s8495_s17 + $0x60] sm:$0xff]  ;;  %1042 = vst.msk [vmem:[#allocation2 + $0x38] sm:$0xff] %vm1034_vm2, %v1009_v9 }
  0x4b   : > { %5348 = vmatprep.subr.bf16.mxu0 %v6404_v1  ;;  %1043 = vst.msk [vmem:[#allocation2 + $0x40] sm:$0xff] %vm1034_vm2, %v1010_v10  ;;  %1044 = vst.msk [vmem:[#allocation2 + $0x48] sm:$0xff] %vm1034_vm2, %v1011_v11  ;;  %v1015_v15 = vld [vmem:[%s8495_s17 + $0x68] sm:$0xff]  ;;  %v1016_v16 = vld [vmem:[%s8495_s17 + $0x70] sm:$0xff] }
  0x4c   : > { %v1017_v17 = vld [vmem:[%s8495_s17 + $0x78] sm:$0xff]  ;;  %1045 = vst.msk [vmem:[#allocation2 + $0x50] sm:$0xff] %vm1034_vm2, %v1012_v12  ;;  %1046 = vst.msk [vmem:[#allocation2 + $0x58] sm:$0xff] %vm1034_vm2, %v1013_v13  ;;  %v5019_v18 = vld [vmem:[%s8496_s29] ss:$0 sm:$0xff] }
  0x4d   : > { %1047 = vst.msk [vmem:[#allocation2 + $0x60] sm:$0xff] %vm1034_vm2, %v1014_v14  ;;  %1048 = vst.msk [vmem:[#allocation2 + $0x68] sm:$0xff] %vm1034_vm2, %v1015_v15  ;;  %v990_v23 = vld [vmem:[%s8497_s25] sm:$0x1]  ;;  %v1003_v30 = vld [vmem:[%s8495_s17 + $0x8] sm:$0xff] }
  0x4e   : > { %5349 = vmatpush3.bf16.msra.mxu0 %v5927_v3  ;;  %1049 = vst.msk [vmem:[#allocation2 + $0x70] sm:$0xff] %vm1034_vm2, %v1016_v16  ;;  %1050 = vst.msk [vmem:[#allocation2 + $0x78] sm:$0xff] %vm1034_vm2, %v1017_v17  ;;  %v1002_v26 = vld [vmem:[%s8495_s17] sm:$0xff]  ;;  %v1004_v31 = vld [vmem:[%s8495_s17 + $0x10] sm:$0xff] }
  0x51   : > { %5351 = vmatmul.mubr.msk.bf16.vlgmr.msra.gmra.mrb[0].mxu0 %vm945_vm1, %v5928_v4 }
 0x124   : > { %v983_v19 = vpop.f32.mrb[0].mxu0 }
 0x125   : > { %v984_v20 = vadd.f32 %v5019_v18, %v983_v19  ;;  %v5352_v21 = vpop.f32.mrb[1].mxu0 }
 0x126   : > { %v986_v22 = vpop.f32.mrb[2].mxu0 }
 0x127   : > { %v994_v24 = vrot.slane %v984_v20, 7  ;;  %v987_v25 = vadd.f32 %v5019_v18, %v986_v22  ;;  %v5353_v27 = vpop.f32.mrb[3].mxu0 }
 0x129   : > { %v995_v28 = vrot.slane %v987_v25, 7  ;;  %v1000_v29 = vsel %vm993_vm3, %v990_v23, %v994_v24 }
 0x12a   : > { %v1018_v32 = vadd.f32 %v1002_v26, %v1000_v29 }
 0x12b   : > { %v996_v33 = vsel %vm993_vm3, %v994_v24, %v995_v28  ;;  %v1001_v34 = vsel %vm993_vm3, %v995_v28, 0.0 }
 0x12c   : > { %v1019_v35 = vadd.f32 %v1003_v30, %v996_v33  ;;  %v1020_v36 = vadd.f32 %v1004_v31, %v1001_v34  ;;  %1035 = vst.msk [vmem:[#allocation2] sm:$0xff] %vm1034_vm2, %v1018_v32 }
 0x12e   : > { %1036 = vst.msk [vmem:[#allocation2 + $0x8] sm:$0xff] %vm1034_vm2, %v1019_v35  ;;  %1037 = vst.msk [vmem:[#allocation2 + $0x10] sm:$0xff] %vm1034_vm2, %v1020_v36 }
 0x12f PF: > { %vm1077_vm4 = vcmask 261120   ;;  %v1067_v39 = vld [vmem:[%s6621_s22] sm:$0xf]  ;;  %vm1071_vm5 = vcmask 1040384   ;;  %vm1073_vm6 = vcmask 1044480   ;;  %v6764_v43 = vld [vmem:[#allocation2 + $0x18] sm:$0xff]  ;;  %s8503_s4 = scalar_lea.vmem %s8415_s7, %s6610_s3 }
 0x130   : > { %v1069_v41 = vrot.slane %v1067_v39, 7  ;;  %v1055_v46 = vld [vmem:[#allocation2 + $0x20] sm:$0xff]  ;;  %v1087_v49 = vsel %vm1077_vm4, %v6764_v43, 0.0  ;;  %v6774_v51 = vld [vmem:[#allocation2 + $0x28] sm:$0xff]  ;;  %v6776_v52 = vld [vmem:[#allocation2 + $0x30] sm:$0xff]  ;;  %s8499_s29 = sld [smem:[#allocation32_spill]] }
 0x131   : > { %v1090_v50 = vsel %vm1077_vm4, %v1055_v46, 0.0  ;;  %v1093_v53 = vsel %vm1077_vm4, %v6774_v51, 0.0  ;;  %v1096_v54 = vsel %vm1077_vm4, %v6776_v52, 0.0  ;;  %v6782_v55 = vld [vmem:[#allocation2 + $0x38] sm:$0xff]  ;;  %v6784_v56 = vld [vmem:[#allocation2 + $0x40] sm:$0xff]  ;;  %v6790_v59 = vld [vmem:[#allocation2 + $0x48] sm:$0xff] }
 0x132   : > { %v1099_v57 = vsel %vm1077_vm4, %v6782_v55, 0.0  ;;  %v1102_v58 = vsel %vm1077_vm4, %v6784_v56, 0.0  ;;  %v6792_v60 = vld [vmem:[#allocation2 + $0x50] sm:$0xff]  ;;  %v1105_v61 = vsel %vm1077_vm4, %v6790_v59, 0.0  ;;  %v6798_v63 = vld [vmem:[#allocation2 + $0x58] sm:$0xff]  ;;  %v6800_v0 = vld [vmem:[#allocation2 + $0x60] sm:$0xff] }
 0x133   : > { %v1051_v37 = vld [vmem:[#allocation2] sm:$0xff]  ;;  %v1108_v62 = vsel %vm1077_vm4, %v6792_v60, 0.0  ;;  %v1111_v1 = vsel %vm1077_vm4, %v6798_v63, 0.0  ;;  %v1114_v2 = vsel %vm1077_vm4, %v6800_v0, 0.0  ;;  %v6806_v3 = vld [vmem:[#allocation2 + $0x68] sm:$0xff]  ;;  %v6808_v4 = vld [vmem:[#allocation2 + $0x70] sm:$0xff] }
 0x134   : > { %v1078_v40 = vsel %vm1077_vm4, %v1051_v37, 0.0  ;;  %v1117_v5 = vsel %vm1077_vm4, %v6806_v3, 0.0  ;;  %v1120_v6 = vsel %vm1077_vm4, %v6808_v4, 0.0  ;;  %v6814_v7 = vld [vmem:[#allocation2 + $0x78] sm:$0xff]  ;;  %s8501_s16 = sld [smem:[#allocation33_spill]]  ;;  %vm1523_vm7 = vcmask 64512  }
 0x135   : > { %v1053_v38 = vld [vmem:[#allocation2 + $0x10] sm:$0xff]  ;;  %v1052_v42 = vld [vmem:[#allocation2 + $0x8] sm:$0xff]  ;;  %1079 = vadd.xlane.f32.xlu0 %v1078_v40  ;;  %v1123_v8 = vsel %vm1077_vm4, %v6814_v7, 0.0  ;;  %s6406_s19 = smov 96   ;;  %s6407_s22 = smov 64   ;;  %vm2496_vm9 = vcmask 1043456  }
 0x136   : > { %v1072_v44 = vsel %vm1071_vm5, %v1053_v38, %v1069_v41  ;;  %v1081_v45 = vsel %vm1077_vm4, %v1052_v42, 0.0  ;;  %s8500_s20 = scalar_lea.vmem %s8499_s29, %s6610_s3  ;;  %s6410_s29 = smov 120   ;;  %vm4553_vm10 = vcmask 523264  }
 0x137   : > { %v6767_v47 = vsel %vm1073_vm6, %v1072_v44, %v1053_v38  ;;  %s6412_s26 = smov 112   ;;  %s6413_s25 = smov 56  }
 0x138   : > { %8498 = vst [vmem:[#allocation19_spill] sm:$0xff] %v6767_v47  ;;  %v1084_v48 = vsel %vm1077_vm4, %v6767_v47, 0.0  ;;  %s6416_s1 = smov 48   ;;  %s6417_s21 = smov 40  }
 0x139   : > { %1085 = vadd.xlane.f32.xlu1 %v1084_v48  ;;  %1082 = vadd.xlane.f32.xlu0 %v1081_v45 }
 0x13a   : > { %s8502_s30 = scalar_lea.vmem %s8501_s16, %s6610_s3  ;;  %s6414_s16 = smov 72  }
 0x13d   : > { %1088 = vadd.xlane.f32.xlu1 %v1087_v49  ;;  %1091 = vadd.xlane.f32.xlu0 %v1090_v50 }
 0x141   : > { %1094 = vadd.xlane.f32.xlu1 %v1093_v53  ;;  %1097 = vadd.xlane.f32.xlu0 %v1096_v54 }
 0x145   : > { %1100 = vadd.xlane.f32.xlu1 %v1099_v57  ;;  %1103 = vadd.xlane.f32.xlu0 %v1102_v58 }
 0x149   : > { %1106 = vadd.xlane.f32.xlu1 %v1105_v61  ;;  %1109 = vadd.xlane.f32.xlu0 %v1108_v62 }
 0x14d   : > { %1112 = vadd.xlane.f32.xlu1 %v1111_v1  ;;  %1115 = vadd.xlane.f32.xlu0 %v1114_v2 }
 0x151   : > { %1118 = vadd.xlane.f32.xlu1 %v1117_v5  ;;  %1121 = vadd.xlane.f32.xlu0 %v1120_v6 }
 0x155   : > { %1124 = vadd.xlane.f32.xlu1 %v1123_v8 }
 0x1c2   : > { %v1080_v9 = vpop.xlane.xlu0 %1079 }
 0x1c3   : > { %v1127_v10 = vmul.f32 0.03125, %v1080_v9 }
 0x1c5   : > { %v6818_v11 = vsub.f32 %v1051_v37, %v1127_v10 }
 0x1c6   : > { %v1086_v12 = vpop.xlane.xlu1 %1085  ;;  %v1083_v13 = vpop.xlane.xlu0 %1082 }
 0x1c7   : > { %v1129_v14 = vmul.f32 0.03125, %v1086_v12  ;;  %v1128_v15 = vmul.f32 0.03125, %v1083_v13  ;;  %v1159_v16 = vmul.f32 %v6818_v11, %v6818_v11 }
 0x1c9   : > { %v6823_v17 = vsub.f32 %v6767_v47, %v1129_v14  ;;  %v6825_v18 = vsub.f32 %v1052_v42, %v1128_v15  ;;  %v1175_v19 = vsel %vm1077_vm4, %v1159_v16, 0.0 }
 0x1ca   : > { %v1089_v20 = vpop.xlane.xlu1 %1088  ;;  %1176 = vadd.xlane.f32.xlu0 %v1175_v19  ;;  %v1092_v21 = vpop.xlane.xlu0 %1091 }
 0x1cb   : > { %v1130_v22 = vmul.f32 0.03125, %v1089_v20  ;;  %v1131_v23 = vmul.f32 0.03125, %v1092_v21  ;;  %v1161_v24 = vmul.f32 %v6823_v17, %v6823_v17  ;;  %v1160_v25 = vmul.f32 %v6825_v18, %v6825_v18 }
 0x1cd   : > { %v6833_v26 = vsub.f32 %v6764_v43, %v1130_v22  ;;  %v6835_v27 = vsub.f32 %v1055_v46, %v1131_v23  ;;  %v1181_v28 = vsel %vm1077_vm4, %v1161_v24, 0.0  ;;  %v1178_v29 = vsel %vm1077_vm4, %v1160_v25, 0.0 }
 0x1ce   : > { %v1095_v30 = vpop.xlane.xlu1 %1094  ;;  %1182 = vadd.xlane.f32.xlu0 %v1181_v28  ;;  %1179 = vadd.xlane.f32.xlu1 %v1178_v29  ;;  %v1098_v31 = vpop.xlane.xlu0 %1097 }
 0x1cf   : > { %v1132_v32 = vmul.f32 0.03125, %v1095_v30  ;;  %v1133_v33 = vmul.f32 0.03125, %v1098_v31  ;;  %v1162_v34 = vmul.f32 %v6833_v26, %v6833_v26  ;;  %v1163_v35 = vmul.f32 %v6835_v27, %v6835_v27 }
 0x1d1   : > { %v6844_v36 = vsub.f32 %v6774_v51, %v1132_v32  ;;  %v6847_v37 = vsub.f32 %v6776_v52, %v1133_v33  ;;  %v1184_v38 = vsel %vm1077_vm4, %v1162_v34, 0.0  ;;  %v1187_v39 = vsel %vm1077_vm4, %v1163_v35, 0.0  ;;  %v5929_v32 = vld [vmem:[%s6635_s27] sm:$0xff]   ;;  %v5930_v33 = vld [vmem:[%s6635_s27 + $0x8] sm:$0xff]   ;;  %s6408_s27 = smov 88  }
 0x1d2   : > { %v1101_v40 = vpop.xlane.xlu1 %1100  ;;  %1185 = vadd.xlane.f32.xlu1 %v1184_v38  ;;  %1188 = vadd.xlane.f32.xlu0 %v1187_v39  ;;  %v1104_v41 = vpop.xlane.xlu0 %1103 }
 0x1d3   : > { %v1134_v42 = vmul.f32 0.03125, %v1101_v40  ;;  %v1135_v43 = vmul.f32 0.03125, %v1104_v41  ;;  %v1164_v44 = vmul.f32 %v6844_v36, %v6844_v36  ;;  %v1165_v45 = vmul.f32 %v6847_v37, %v6847_v37  ;;  %5354 = vmatprep.subr.bf16.mxu0 %v5929_v32 }
 0x1d4   : > { %5355 = vmatpush3.bf16.msra.mxu0 %v5929_v32 }
 0x1d5   : > { %v6856_v46 = vsub.f32 %v6782_v55, %v1134_v42  ;;  %v6859_v48 = vsub.f32 %v6784_v56, %v1135_v43  ;;  %v1190_v49 = vsel %vm1077_vm4, %v1164_v44, 0.0  ;;  %v1193_v50 = vsel %vm1077_vm4, %v1165_v45, 0.0  ;;  %5356 = vmatprep.subr.bf16.mxu0 %v5930_v33 }
 0x1d6   : > { %v1107_v51 = vpop.xlane.xlu1 %1106  ;;  %1191 = vadd.xlane.f32.xlu1 %v1190_v49  ;;  %1194 = vadd.xlane.f32.xlu0 %v1193_v50  ;;  %v1110_v52 = vpop.xlane.xlu0 %1109 }
 0x1d7   : > { %v1136_v53 = vmul.f32 0.03125, %v1107_v51  ;;  %v1137_v54 = vmul.f32 0.03125, %v1110_v52  ;;  %v1166_v57 = vmul.f32 %v6856_v46, %v6856_v46  ;;  %v1167_v55 = vmul.f32 %v6859_v48, %v6859_v48 }
 0x1d8   : > { %5357 = vmatpush3.bf16.msra.mxu0 %v5930_v33 }
 0x1d9   : > { %v6868_v58 = vsub.f32 %v6790_v59, %v1136_v53  ;;  %v6871_v56 = vsub.f32 %v6792_v60, %v1137_v54  ;;  %v1196_v61 = vsel %vm1077_vm4, %v1166_v57, 0.0  ;;  %v1199_v62 = vsel %vm1077_vm4, %v1167_v55, 0.0 }
 0x1da   : > { %v1113_v1 = vpop.xlane.xlu1 %1112  ;;  %1197 = vadd.xlane.f32.xlu1 %v1196_v61  ;;  %1200 = vadd.xlane.f32.xlu0 %v1199_v62  ;;  %v1116_v2 = vpop.xlane.xlu0 %1115 }
 0x1db   : > { %v1138_v5 = vmul.f32 0.03125, %v1113_v1  ;;  %v1139_v6 = vmul.f32 0.03125, %v1116_v2  ;;  %v1168_v8 = vmul.f32 %v6868_v58, %v6868_v58  ;;  %v1169_v59 = vmul.f32 %v6871_v56, %v6871_v56 }
 0x1dd   : > { %v6880_v9 = vsub.f32 %v6798_v63, %v1138_v5  ;;  %v6883_v60 = vsub.f32 %v6800_v0, %v1139_v6  ;;  %v1202_v10 = vsel %vm1077_vm4, %v1168_v8, 0.0  ;;  %v1205_v12 = vsel %vm1077_vm4, %v1169_v59, 0.0 }
 0x1de   : > { %v1119_v13 = vpop.xlane.xlu1 %1118  ;;  %1203 = vadd.xlane.f32.xlu1 %v1202_v10  ;;  %1206 = vadd.xlane.f32.xlu0 %v1205_v12  ;;  %v1122_v14 = vpop.xlane.xlu0 %1121  ;;  %v6919_v10 = vld [vmem:[%s8500_s20] ss:$0 sm:$0xff]  ;;  %s6411_s20 = smov 80  }
 0x1df   : > { %v1140_v15 = vmul.f32 0.03125, %v1119_v13  ;;  %v1141_v16 = vmul.f32 0.03125, %v1122_v14  ;;  %v1170_v19 = vmul.f32 %v6880_v9, %v6880_v9  ;;  %v1171_v63 = vmul.f32 %v6883_v60, %v6883_v60 }
 0x1e1   : > { %v6892_v20 = vsub.f32 %v6806_v3, %v1140_v15  ;;  %v6895_v0 = vsub.f32 %v6808_v4, %v1141_v16  ;;  %v1208_v21 = vsel %vm1077_vm4, %v1170_v19, 0.0  ;;  %v1211_v22 = vsel %vm1077_vm4, %v1171_v63, 0.0 }
 0x1e2   : > { %v1125_v23 = vpop.xlane.xlu1 %1124  ;;  %1209 = vadd.xlane.f32.xlu1 %v1208_v21  ;;  %1212 = vadd.xlane.f32.xlu0 %v1211_v22 }
 0x1e3   : > { %v1142_v24 = vmul.f32 0.03125, %v1125_v23  ;;  %v1172_v25 = vmul.f32 %v6892_v20, %v6892_v20  ;;  %v1173_v3 = vmul.f32 %v6895_v0, %v6895_v0  ;;  %v6928_v23 = vld [vmem:[%s8502_s30] ss:$0 sm:$0xff]  ;;  %s6415_s30 = smov 104  }
 0x1e5   : > { %v6904_v28 = vsub.f32 %v6814_v7, %v1142_v24  ;;  %v1214_v4 = vsel %vm1077_vm4, %v1172_v25, 0.0  ;;  %v1217_v29 = vsel %vm1077_vm4, %v1173_v3, 0.0 }
 0x1e6   : > { %1215 = vadd.xlane.f32.xlu1 %v1214_v4  ;;  %1218 = vadd.xlane.f32.xlu0 %v1217_v29 }
 0x1e7   : > { %v1174_v30 = vmul.f32 %v6904_v28, %v6904_v28 }
 0x1e9   : > { %v1220_v31 = vsel %vm1077_vm4, %v1174_v30, 0.0 }
 0x1ea   : > { %1221 = vadd.xlane.f32.xlu1 %v1220_v31 }
 0x257   : > { %v1177_v7 = vpop.xlane.xlu0 %1176 }
 0x258   : > { %v1223_v34 = vmul.f32 0.03125, %v1177_v7 }
 0x25a   : > { %v1239_v35 = vadd.f32 1e-06, %v1223_v34 }
 0x25b   : > { %v1180_v38 = vpop.xlane.xlu1 %1179  ;;  %v1183_v39 = vpop.xlane.xlu0 %1182 }
 0x25c   : > { %5937 = vrsqrt.f32 %v1239_v35  ;;  %v1224_v40 = vmul.f32 0.03125, %v1180_v38  ;;  %v1225_v41 = vmul.f32 0.03125, %v1183_v39 }
 0x25e   : > { %v1240_v42 = vadd.f32 1e-06, %v1224_v40  ;;  %v1241_v43 = vadd.f32 1e-06, %v1225_v41 }
 0x25f   : > { %v1186_v44 = vpop.xlane.xlu1 %1185  ;;  %v1189_v45 = vpop.xlane.xlu0 %1188 }
 0x260   : > { %5939 = vrsqrt.f32 %v1240_v42  ;;  %v1226_v49 = vmul.f32 0.03125, %v1186_v44  ;;  %v1227_v50 = vmul.f32 0.03125, %v1189_v45 }
 0x261   : > { %5941 = vrsqrt.f32 %v1241_v43 }
 0x262   : > { %v1242_v51 = vadd.f32 1e-06, %v1226_v49  ;;  %v1243_v52 = vadd.f32 1e-06, %v1227_v50 }
 0x263   : > { %v1192_v53 = vpop.xlane.xlu1 %1191  ;;  %v1195_v54 = vpop.xlane.xlu0 %1194 }
 0x264   : > { %5943 = vrsqrt.f32 %v1242_v51  ;;  %v1228_v57 = vmul.f32 0.03125, %v1192_v53  ;;  %v1229_v55 = vmul.f32 0.03125, %v1195_v54 }
 0x265   : > { %5945 = vrsqrt.f32 %v1243_v52 }
 0x266   : > { %v5938_v61 = vpop.eup %5937  ;;  %v1244_v62 = vadd.f32 1e-06, %v1228_v57  ;;  %v1245_v1 = vadd.f32 1e-06, %v1229_v55 }
 0x267   : > { %v1198_v2 = vpop.xlane.xlu1 %1197  ;;  %v1201_v5 = vpop.xlane.xlu0 %1200  ;;  %v1271_v6 = vmul.f32 %v5938_v61, %v6818_v11 }
 0x268   : > { %5947 = vrsqrt.f32 %v1244_v62  ;;  %v1230_v8 = vmul.f32 0.03125, %v1198_v2  ;;  %v1231_v59 = vmul.f32 0.03125, %v1201_v5 }
 0x269   : > { %5949 = vrsqrt.f32 %v1245_v1  ;;  %v1293_v11 = vmul.f32 %v6919_v10, %v1271_v6 }
 0x26a   : > { %v5940_v12 = vpop.eup %5939  ;;  %v1246_v13 = vadd.f32 1e-06, %v1230_v8  ;;  %v1247_v14 = vadd.f32 1e-06, %v1231_v59 }
 0x26b   : > { %v5942_v15 = vpop.eup %5941  ;;  %v1204_v16 = vpop.xlane.xlu1 %1203  ;;  %v1272_v63 = vmul.f32 %v5940_v12, %v6825_v18  ;;  %v1315_v32 = vadd.f32 %v6928_v23, %v1293_v11 }
 0x26c   : > { %v1207_v19 = vpop.xlane.xlu0 %1206  ;;  %5951 = vrsqrt.f32 %v1246_v13  ;;  %v1232_v21 = vmul.f32 0.03125, %v1204_v16  ;;  %v1273_v24 = vmul.f32 %v5942_v15, %v6823_v17 }
 0x26d   : > { %v1233_v22 = vmul.f32 0.03125, %v1207_v19  ;;  %5953 = vrsqrt.f32 %v1247_v14  ;;  %v1294_v25 = vmul.f32 %v6919_v10, %v1272_v63 }
 0x26e   : > { %v5944_v3 = vpop.eup %5943  ;;  %v1248_v4 = vadd.f32 1e-06, %v1232_v21  ;;  %v1295_v34 = vmul.f32 %v6919_v10, %v1273_v24 }
 0x26f   : > { %v1249_v29 = vadd.f32 1e-06, %v1233_v22  ;;  %v5946_v18 = vpop.eup %5945  ;;  %v1210_v30 = vpop.xlane.xlu1 %1209  ;;  %v1316_v33 = vadd.f32 %v6928_v23, %v1294_v25  ;;  %v1274_v7 = vmul.f32 %v5944_v3, %v6833_v26 }
 0x270   : > { %v1213_v31 = vpop.xlane.xlu0 %1212  ;;  %5955 = vrsqrt.f32 %v1248_v4  ;;  %v1234_v35 = vmul.f32 0.03125, %v1210_v30  ;;  %v1275_v40 = vmul.f32 %v5946_v18, %v6835_v27  ;;  %v1317_v26 = vadd.f32 %v6928_v23, %v1295_v34 }
 0x271   : > { %v1235_v17 = vmul.f32 0.03125, %v1213_v31  ;;  %5957 = vrsqrt.f32 %v1249_v29  ;;  %v1331_v38 = vpack.c.bf16 %v1316_v33, %v1315_v32  ;;  %v1296_v39 = vmul.f32 %v6919_v10, %v1274_v7 }
 0x272   : > { %v5948_v41 = vpop.eup %5947  ;;  %v1250_v42 = vadd.f32 1e-06, %v1234_v35  ;;  %v1297_v52 = vmul.f32 %v6919_v10, %v1275_v40 }
 0x273   : > { %v1251_v43 = vadd.f32 1e-06, %v1235_v17  ;;  %v5950_v44 = vpop.eup %5949  ;;  %v1216_v45 = vpop.xlane.xlu1 %1215  ;;  %5358 = vmatprep.mubr.msk.bf16.mxu0 %vm1077_vm4, %v1331_v38  ;;  %v1318_v50 = vadd.f32 %v6928_v23, %v1296_v39  ;;  %v1276_v51 = vmul.f32 %v5948_v41, %v6844_v36 }
 0x274   : > { %v1219_v49 = vpop.xlane.xlu0 %1218  ;;  %5959 = vrsqrt.f32 %v1250_v42  ;;  %v1236_v53 = vmul.f32 0.03125, %v1216_v45  ;;  %v1277_v27 = vmul.f32 %v5950_v44, %v6847_v37  ;;  %v1319_v36 = vadd.f32 %v6928_v23, %v1297_v52 }
 0x275   : > { %v1237_v54 = vmul.f32 0.03125, %v1219_v49  ;;  %5961 = vrsqrt.f32 %v1251_v43  ;;  %v1332_v57 = vpack.c.bf16 %v1318_v50, %v1317_v26  ;;  %v1298_v55 = vmul.f32 %v6919_v10, %v1276_v51 }
 0x276   : > { %v5952_v61 = vpop.eup %5951  ;;  %v1252_v62 = vadd.f32 1e-06, %v1236_v53  ;;  %v1299_v59 = vmul.f32 %v6919_v10, %v1277_v27 }
 0x277   : > { %v1253_v1 = vadd.f32 1e-06, %v1237_v54  ;;  %v5954_v2 = vpop.eup %5953  ;;  %v1222_v5 = vpop.xlane.xlu1 %1221  ;;  %5359 = vmatmul.mubr.msk.bf16.vlgmr.msra.gmra.mrb[0].mxu0 %vm1077_vm4, %v1332_v57  ;;  %v1320_v6 = vadd.f32 %v6928_v23, %v1298_v55  ;;  %v1278_v8 = vmul.f32 %v5952_v61, %v6856_v46 }
 0x278   : > { %5963 = vrsqrt.f32 %v1252_v62  ;;  %v1238_v37 = vmul.f32 0.03125, %v1222_v5  ;;  %v1279_v12 = vmul.f32 %v5954_v2, %v6859_v48  ;;  %v1321_v63 = vadd.f32 %v6928_v23, %v1299_v59 }
 0x279   : > { %5965 = vrsqrt.f32 %v1253_v1  ;;  %v1333_v13 = vpack.c.bf16 %v1320_v6, %v1319_v36  ;;  %v1300_v14 = vmul.f32 %v6919_v10, %v1278_v8 }
 0x27a   : > { %v5956_v15 = vpop.eup %5955  ;;  %v1254_v16 = vadd.f32 1e-06, %v1238_v37  ;;  %v1301_v21 = vmul.f32 %v6919_v10, %v1279_v12 }
 0x27b   : > { %v5958_v19 = vpop.eup %5957  ;;  %5362 = vmatprep.mubr.msk.bf16.mxu0 %vm1077_vm4, %v1333_v13  ;;  %v1322_v11 = vadd.f32 %v6928_v23, %v1300_v14  ;;  %v1280_v46 = vmul.f32 %v5956_v15, %v6868_v58 }
 0x27c   : > { %5967 = vrsqrt.f32 %v1254_v16  ;;  %v1281_v48 = vmul.f32 %v5958_v19, %v6871_v56  ;;  %v1323_v4 = vadd.f32 %v6928_v23, %v1301_v21 }
 0x27d   : > { %v1334_v22 = vpack.c.bf16 %v1322_v11, %v1321_v63  ;;  %v1302_v24 = vmul.f32 %v6919_v10, %v1280_v46 }
 0x27e   : > { %v5960_v25 = vpop.eup %5959  ;;  %v1303_v58 = vmul.f32 %v6919_v10, %v1281_v48 }
 0x27f   : > { %v5962_v3 = vpop.eup %5961  ;;  %5363 = vmatmul.mubr.msk.bf16.gmra.mrb[4].mxu0 %vm1077_vm4, %v1334_v22  ;;  %v1324_v29 = vadd.f32 %v6928_v23, %v1302_v24  ;;  %v1282_v18 = vmul.f32 %v5960_v25, %v6880_v9 }
 0x280   : > { %v1283_v30 = vmul.f32 %v5962_v3, %v6883_v60  ;;  %v1325_v7 = vadd.f32 %v6928_v23, %v1303_v58 }
 0x281   : > { %v1335_v31 = vpack.c.bf16 %v1324_v29, %v1323_v4  ;;  %v1304_v56 = vmul.f32 %v6919_v10, %v1282_v18 }
 0x282   : > { %v5964_v32 = vpop.eup %5963  ;;  %v1305_v17 = vmul.f32 %v6919_v10, %v1283_v30 }
 0x283   : > { %v5966_v33 = vpop.eup %5965  ;;  %5366 = vmatprep.mubr.msk.bf16.mxu0 %vm1077_vm4, %v1335_v31  ;;  %v1326_v34 = vadd.f32 %v6928_v23, %v1304_v56  ;;  %v1284_v35 = vmul.f32 %v5964_v32, %v6892_v20 }
 0x284   : > { %v1285_v9 = vmul.f32 %v5966_v33, %v6895_v0  ;;  %v1327_v40 = vadd.f32 %v6928_v23, %v1305_v17 }
 0x285   : > { %v1336_v38 = vpack.c.bf16 %v1326_v34, %v1325_v7  ;;  %v1306_v60 = vmul.f32 %v6919_v10, %v1284_v35 }
 0x286   : > { %v5968_v39 = vpop.eup %5967  ;;  %v1307_v43 = vmul.f32 %v6919_v10, %v1285_v9 }
 0x287   : > { %5367 = vmatmul.mubr.msk.bf16.gmra.mrb[8].mxu0 %vm1077_vm4, %v1336_v38  ;;  %v1328_v41 = vadd.f32 %v6928_v23, %v1306_v60  ;;  %v1286_v42 = vmul.f32 %v5968_v39, %v6904_v28  ;;  %v5027_v28 = vld [vmem:[%s8503_s4] ss:$0 sm:$0xff] }
 0x288   : > { %v1329_v0 = vadd.f32 %v6928_v23, %v1307_v43 }
 0x289   : > { %v1337_v20 = vpack.c.bf16 %v1328_v41, %v1327_v40  ;;  %v1308_v44 = vmul.f32 %v6919_v10, %v1286_v42 }
 0x28b   : > { %5370 = vmatprep.mubr.msk.bf16.mxu0 %vm1077_vm4, %v1337_v20  ;;  %v1330_v45 = vadd.f32 %v6928_v23, %v1308_v44 }
 0x28d   : > { %v1338_v49 = vpack.c.bf16 %v1330_v45, %v1329_v0 }
 0x28f   : > { %5371 = vmatmul.mubr.msk.bf16.gmra.mrb[12].mxu0 %vm1077_vm4, %v1338_v49 }
 0x34a   : > { %v5360_v26 = vpop.f32.mrb[0].mxu0 }
 0x34b   : > { %v1420_v50 = vpop.f32.mrb[1].mxu0  ;;  %v1429_v52 = vadd.f32 %v5360_v26, %v5027_v28 }
 0x34c   : > { %v5361_v51 = vpop.f32.mrb[2].mxu0  ;;  %v1421_v54 = vadd.f32 %v5027_v28, %v1420_v50 }
 0x34d   : > { %v1432_v53 = vadd.f32 %v5361_v51, %v5027_v28  ;;  %v1423_v10 = vpop.f32.mrb[3].mxu0  ;;  %v1491_v51 = vlaneseq }
 0x34e   : > { %v1424_v27 = vadd.f32 %v5027_v28, %v1423_v10  ;;  %v6409_v10 = vmov -1e+30  }
 0x34f   : > { %v6988_v57 = vpack.c.bf16 %v1432_v53, %v1429_v52  ;;  %v1492_v52 = vand.u32 127, %v1491_v51 }
 0x350   : > { %v6990_v23 = vpack.c.bf16 %v1424_v27, %v1421_v54 }
 0x351   : > { %1509 = vrot.lane.b32.xlu1 %v6988_v57, %s6406_s19  ;;  %vm1493_vm8 = vcmp.lt.s32.totalorder %v1492_v52, 21 }
 0x352   : > { %1507 = vrot.lane.b32.xlu0 %v6990_v23, %s6406_s19  ;;  %v5364_v55 = vpop.f32.mrb[4].mxu0  ;;  %5390 = vmatprep.mubr.msk.bf16.mxu1 %vm1523_vm7, %v6990_v23  ;;  %v7068_v54 = vsel %vm1493_vm8, 0.0, %v6409_v10 }
 0x353   : > { %v1436_v61 = vpop.f32.mrb[5].mxu0  ;;  %v1445_v1 = vadd.f32 %v5364_v55, %v5027_v28 }
 0x354   : > { %v5365_v62 = vpop.f32.mrb[6].mxu0  ;;  %v1437_v36 = vadd.f32 %v5027_v28, %v1436_v61 }
 0x355   : > { %v1448_v2 = vadd.f32 %v5365_v62, %v5027_v28  ;;  %v1439_v5 = vpop.f32.mrb[7].mxu0 }
 0x356   : > { %v1440_v6 = vadd.f32 %v5027_v28, %v1439_v5 }
 0x357   : > { %v6998_v8 = vpack.c.bf16 %v1448_v2, %v1445_v1 }
 0x358   : > { %v7000_v59 = vpack.c.bf16 %v1440_v6, %v1437_v36 }
 0x35a   : > { %1511 = vrot.lane.b32.xlu1 %v7000_v59, %s6406_s19  ;;  %v5368_v37 = vpop.f32.mrb[8].mxu0 }
 0x35b   : > { %v1452_v12 = vpop.f32.mrb[9].mxu0  ;;  %v1461_v14 = vadd.f32 %v5368_v37, %v5027_v28 }
 0x35c   : > { %v5369_v13 = vpop.f32.mrb[10].mxu0  ;;  %v1453_v19 = vadd.f32 %v5027_v28, %v1452_v12 }
 0x35d   : > { %v1464_v15 = vadd.f32 %v5369_v13, %v5027_v28  ;;  %v1455_v16 = vpop.f32.mrb[11].mxu0 }
 0x35e   : > { %v1456_v63 = vadd.f32 %v5027_v28, %v1455_v16  ;;  %1513 = vrot.lane.b32.xlu1 %v6998_v8, %s6406_s19 }
 0x35f   : > { %v7006_v11 = vpack.c.bf16 %v1464_v15, %v1461_v14 }
 0x360   : > { %v7008_v46 = vpack.c.bf16 %v1456_v63, %v1453_v19 }
 0x362   : > { %1517 = vrot.lane.b32.xlu1 %v7006_v11, %s6406_s19  ;;  %1515 = vrot.lane.b32.xlu0 %v7008_v46, %s6406_s19  ;;  %v5372_v21 = vpop.f32.mrb[12].mxu0 }
 0x363   : > { %v1468_v48 = vpop.f32.mrb[13].mxu0  ;;  %v1477_v24 = vadd.f32 %v5372_v21, %v5027_v28 }
 0x364   : > { %v5373_v22 = vpop.f32.mrb[14].mxu0  ;;  %v1469_v4 = vadd.f32 %v5027_v28, %v1468_v48 }
 0x365   : > { %v1480_v25 = vadd.f32 %v5373_v22, %v5027_v28  ;;  %v1471_v3 = vpop.f32.mrb[15].mxu0 }
 0x366   : > { %v1472_v29 = vadd.f32 %v5027_v28, %v1471_v3 }
 0x367   : > { %v7014_v18 = vpack.c.bf16 %v1480_v25, %v1477_v24 }
 0x368   : > { %v7016_v58 = vpack.c.bf16 %v1472_v29, %v1469_v4 }
 0x369   : > { %1521 = vrot.lane.b32.xlu1 %v7014_v18, %s6406_s19 }
 0x36a   : > { %1519 = vrot.lane.b32.xlu0 %v7016_v58, %s6406_s19  ;;  %s8528_s19 = scalar_lea.vmem %s8417_s9, %s6610_s3 }
 0x36d   : > { %1855 = vrot.lane.b32.xlu1 %v6988_v57, %s6407_s22 }
 0x36e   : > { %1853 = vrot.lane.b32.xlu0 %v6990_v23, %s6407_s22 }
 0x371   : > { %1859 = vrot.lane.b32.xlu1 %v6998_v8, %s6407_s22 }
 0x372   : > { %1857 = vrot.lane.b32.xlu0 %v7000_v59, %s6407_s22 }
 0x375   : > { %1863 = vrot.lane.b32.xlu1 %v7006_v11, %s6407_s22 }
 0x376   : > { %1861 = vrot.lane.b32.xlu0 %v7008_v46, %s6407_s22 }
 0x379   : > { %1867 = vrot.lane.b32.xlu1 %v7014_v18, %s6407_s22 }
 0x37a   : > { %1998 = vrot.lane.b32.xlu0 %v6990_v23, %s6408_s27 }
 0x37d   : > { %2000 = vrot.lane.b32.xlu1 %v6988_v57, %s6408_s27 }
 0x37e   : > { %1865 = vrot.lane.b32.xlu0 %v7016_v58, %s6407_s22 }
 0x3c3   : > { %v1510_v56 = vpop.permute.xlu1 %1509 }
 0x3c4   : > { %v1508_v30 = vpop.permute.xlu0 %1507  ;;  %v1552_v33 = vsel %vm1523_vm7, %v1510_v56, 0 }
 0x3c5   : > { %5802 = vmatprep.subr.msk.bf16.mxu1 %vm1523_vm7, %v1508_v30  ;;  %v1549_v31 = vsel %vm1523_vm7, %v1508_v30, 0 }
 0x3c6   : > { %5375 = vmatpush3.bf16.xpose.msra.mxu1 %v1549_v31 }
 0x3c7   : > { %5803 = vmatprep.subr.msk.bf16.mxu1 %vm1523_vm7, %v1510_v56 }
 0x3cc   : > { %v1512_v32 = vpop.permute.xlu1 %1511 }
 0x3cd   : > { %v1555_v34 = vsel %vm1523_vm7, %v1512_v32, 0 }
 0x3ce   : > { %5377 = vmatpush3.bf16.xpose.msra.mxu1 %v1552_v33 }
 0x3cf   : > { %5804 = vmatprep.subr.msk.bf16.mxu1 %vm1523_vm7, %v1512_v32 }
 0x3d0   : > { %v1514_v7 = vpop.permute.xlu1 %1513 }
 0x3d1   : > { %v1558_v60 = vsel %vm1523_vm7, %v1514_v7, 0 }
 0x3d4   : > { %v1518_v35 = vpop.permute.xlu1 %1517  ;;  %v1516_v17 = vpop.permute.xlu0 %1515 }
 0x3d5   : > { %v1561_v42 = vsel %vm1523_vm7, %v1516_v17, 0  ;;  %v1564_v44 = vsel %vm1523_vm7, %v1518_v35, 0 }
 0x3d6   : > { %5379 = vmatpush3.bf16.xpose.msra.mxu1 %v1555_v34 }
 0x3d7   : > { %5805 = vmatprep.subr.msk.bf16.mxu1 %vm1523_vm7, %v1514_v7 }
 0x3db   : > { %v1522_v9 = vpop.permute.xlu1 %1521 }
 0x3dc   : > { %v1520_v38 = vpop.permute.xlu0 %1519  ;;  %v1570_v50 = vsel %vm1523_vm7, %v1522_v9, 0 }
 0x3dd   : > { %v1567_v49 = vsel %vm1523_vm7, %v1520_v38, 0 }
 0x3de   : > { %5381 = vmatpush3.bf16.xpose.msra.mxu1 %v1558_v60 }
 0x3df   : > { %5806 = vmatprep.subr.msk.bf16.mxu1 %vm1523_vm7, %v1516_v17  ;;  %v1856_v40 = vpop.permute.xlu1 %1855 }
 0x3e0   : > { %v1854_v39 = vpop.permute.xlu0 %1853 }
 0x3e1   : > { %5406 = vmatprep.subr.bf16.mxu0 %v1854_v39 }
 0x3e2   : > { %5407 = vmatpush3.bf16.msra.mxu0 %v1854_v39 }
 0x3e3   : > { %5408 = vmatprep.subr.bf16.mxu0 %v1856_v40  ;;  %v1860_v43 = vpop.permute.xlu1 %1859 }
 0x3e4   : > { %v1858_v41 = vpop.permute.xlu0 %1857 }
 0x3e6   : > { %5383 = vmatpush3.bf16.xpose.msra.mxu1 %v1561_v42  ;;  %5409 = vmatpush3.bf16.msra.mxu0 %v1856_v40 }
 0x3e7   : > { %5807 = vmatprep.subr.msk.bf16.mxu1 %vm1523_vm7, %v1518_v35  ;;  %5410 = vmatprep.subr.bf16.mxu0 %v1858_v41  ;;  %v1864_v45 = vpop.permute.xlu1 %1863 }
 0x3e8   : > { %v1862_v20 = vpop.permute.xlu0 %1861 }
 0x3ea   : > { %5411 = vmatpush3.bf16.msra.mxu0 %v1858_v41 }
 0x3eb   : > { %5412 = vmatprep.subr.bf16.mxu0 %v1860_v43  ;;  %v1868_v28 = vpop.permute.xlu1 %1867 }
 0x3ec   : > { %v7047_v0 = vpop.permute.xlu0 %1998 }
 0x3ee   : > { %5385 = vmatpush3.bf16.xpose.msra.mxu1 %v1564_v44  ;;  %5413 = vmatpush3.bf16.msra.mxu0 %v1860_v43 }
 0x3ef   : > { %5808 = vmatprep.subr.msk.bf16.mxu1 %vm1523_vm7, %v1520_v38  ;;  %5414 = vmatprep.subr.bf16.mxu0 %v1862_v20 }
 0x3f0   : > { %v1866_v26 = vpop.permute.xlu0 %1865 }
 0x3f2   : > { %5415 = vmatpush3.bf16.msra.mxu0 %v1862_v20 }
 0x3f3   : > { %5416 = vmatprep.subr.bf16.mxu0 %v1864_v45 }
 0x3f6   : > { %5387 = vmatpush3.bf16.xpose.msra.mxu1 %v1567_v49  ;;  %5417 = vmatpush3.bf16.msra.mxu0 %v1864_v45 }
 0x3f7   : > { %5809 = vmatprep.subr.msk.bf16.mxu1 %vm1523_vm7, %v1522_v9  ;;  %5418 = vmatprep.subr.bf16.mxu0 %v1866_v26 }
 0x3fa   : > { %5419 = vmatpush3.bf16.msra.mxu0 %v1866_v26 }
 0x3fb   : > { %5420 = vmatprep.subr.bf16.mxu0 %v1868_v28 }
 0x3fe   : > { %5389 = vmatpush3.bf16.xpose.msra.mxu1 %v1570_v50  ;;  %5421 = vmatpush3.bf16.msra.mxu0 %v1868_v28  ;;  %v7135_v28 = vpop.permute.xlu1 %2000 }
 0x3ff   : > { %5810 = vmatprep.subr.msk.bf16.mxu0 %vm1523_vm7, %v7047_v0 }
 0x405   : > { %5391 = vmatmul.mubr.msk.bf16.vlgmr.msra.gmra.mrb[0].mxu1 %vm1523_vm7, %v6988_v57 }
 0x406   : > { %5394 = vmatprep.mubr.msk.bf16.mxu1 %vm1523_vm7, %v7000_v59 }
 0x40d   : > { %5395 = vmatmul.mubr.msk.bf16.gmra.mrb[4].mxu1 %vm1523_vm7, %v6998_v8 }
 0x40e   : > { %5398 = vmatprep.mubr.msk.bf16.mxu1 %vm1523_vm7, %v7008_v46 }
 0x415   : > { %5399 = vmatmul.mubr.msk.bf16.gmra.mrb[8].mxu1 %vm1523_vm7, %v7006_v11 }
 0x416   : > { %5402 = vmatprep.mubr.msk.bf16.mxu1 %vm1523_vm7, %v7016_v58 }
 0x41d   : > { %5403 = vmatmul.mubr.msk.bf16.gmra.mrb[12].mxu1 %vm1523_vm7, %v7014_v18 }
 0x4d8   : > { %v5392_v53 = vpop.f32.mrb[0].mxu1 }
 0x4d9   : > { %v1671_v27 = vmul.f32 0.35355338, %v5392_v53  ;;  %v1606_v55 = vpop.f32.mrb[1].mxu1 }
 0x4da   : > { %v5393_v61 = vpop.f32.mrb[2].mxu1  ;;  %v1669_v62 = vmul.f32 0.35355338, %v1606_v55 }
 0x4db   : > { %v1609_v1 = vpop.f32.mrb[3].mxu1  ;;  %v7071_v2 = vadd.f32 %v1671_v27, %v7068_v54  ;;  %v1672_v6 = vmul.f32 0.35355338, %v5393_v61 }
 0x4dc   : > { %v1670_v5 = vmul.f32 0.35355338, %v1609_v1  ;;  %v7078_v37 = vadd.f32 %v1669_v62, %v7068_v54 }
 0x4dd   : > { %1705 = vmax.xlane.f32.xlu0 %v7071_v2  ;;  %v1688_v63 = vadd.f32 %v1672_v6, %v7068_v54 }
 0x4de   : > { %v7075_v36 = vadd.f32 %v1670_v5, %v7068_v54 }
 0x4e0   : > { %1703 = vmax.xlane.f32.xlu1 %v7075_v36  ;;  %v5396_v12 = vpop.f32.mrb[4].mxu1 }
 0x4e1   : > { %1701 = vmax.xlane.f32.xlu0 %v7078_v37  ;;  %v1622_v13 = vpop.f32.mrb[5].mxu1  ;;  %v1675_v15 = vmul.f32 0.35355338, %v5396_v12 }
 0x4e2   : > { %v5397_v14 = vpop.f32.mrb[6].mxu1  ;;  %v1673_v22 = vmul.f32 0.35355338, %v1622_v13 }
 0x4e3   : > { %v1676_v16 = vmul.f32 0.35355338, %v5397_v14  ;;  %v1625_v19 = vpop.f32.mrb[7].mxu1  ;;  %v7088_v24 = vadd.f32 %v1675_v15, %v7068_v54 }
 0x4e4   : > { %v1674_v21 = vmul.f32 0.35355338, %v1625_v19  ;;  %v7096_v32 = vadd.f32 %v1673_v22, %v7068_v54 }
 0x4e5   : > { %1707 = vmax.xlane.f32.xlu0 %v1688_v63  ;;  %v7084_v48 = vadd.f32 %v1676_v16, %v7068_v54 }
 0x4e6   : > { %v7092_v4 = vadd.f32 %v1674_v21, %v7068_v54 }
 0x4e7   : > { %1715 = vmax.xlane.f32.xlu1 %v7084_v48 }
 0x4e8   : > { %v5400_v25 = vpop.f32.mrb[8].mxu1 }
 0x4e9   : > { %1713 = vmax.xlane.f32.xlu0 %v7088_v24  ;;  %v1638_v3 = vpop.f32.mrb[9].mxu1  ;;  %v1679_v30 = vmul.f32 0.35355338, %v5400_v25 }
 0x4ea   : > { %v5401_v29 = vpop.f32.mrb[10].mxu1  ;;  %v1677_v34 = vmul.f32 0.35355338, %v1638_v3 }
 0x4eb   : > { %v1680_v31 = vmul.f32 0.35355338, %v5401_v29  ;;  %1711 = vmax.xlane.f32.xlu1 %v7092_v4  ;;  %v1641_v56 = vpop.f32.mrb[11].mxu1  ;;  %v7104_v35 = vadd.f32 %v1679_v30, %v7068_v54 }
 0x4ec   : > { %v1678_v33 = vmul.f32 0.35355338, %v1641_v56  ;;  %v7112_v41 = vadd.f32 %v1677_v34, %v7068_v54 }
 0x4ed   : > { %1709 = vmax.xlane.f32.xlu0 %v7096_v32  ;;  %v7100_v7 = vadd.f32 %v1680_v31, %v7068_v54 }
 0x4ee   : > { %v7108_v38 = vadd.f32 %v1678_v33, %v7068_v54 }
 0x4ef   : > { %1723 = vmax.xlane.f32.xlu1 %v7100_v7 }
 0x4f0   : > { %v5404_v17 = vpop.f32.mrb[12].mxu1 }
 0x4f1   : > { %1721 = vmax.xlane.f32.xlu0 %v7104_v35  ;;  %v1654_v9 = vpop.f32.mrb[13].mxu1  ;;  %v1683_v39 = vmul.f32 0.35355338, %v5404_v17 }
 0x4f2   : > { %v5405_v60 = vpop.f32.mrb[14].mxu1  ;;  %v1681_v42 = vmul.f32 0.35355338, %v1654_v9 }
 0x4f3   : > { %1719 = vmax.xlane.f32.xlu1 %v7108_v38  ;;  %v1657_v40 = vpop.f32.mrb[15].mxu1  ;;  %v7116_v43 = vadd.f32 %v1683_v39, %v7068_v54  ;;  %v1684_v44 = vmul.f32 0.35355338, %v5405_v60 }
 0x4f4   : > { %v7120_v20 = vadd.f32 %v1681_v42, %v7068_v54  ;;  %v1682_v45 = vmul.f32 0.35355338, %v1657_v40 }
 0x4f5   : > { %1717 = vmax.xlane.f32.xlu0 %v7112_v41  ;;  %v7128_v49 = vadd.f32 %v1684_v44, %v7068_v54 }
 0x4f6   : > { %v7132_v26 = vadd.f32 %v1682_v45, %v7068_v54 }
 0x4f9   : > { %1729 = vmax.xlane.f32.xlu0 %v7116_v43 }
 0x4fd   : > { %1725 = vmax.xlane.f32.xlu0 %v7120_v20 }
 0x504   : > { %2004 = vrot.lane.b32.xlu1 %v6998_v8, %s6408_s27 }
 0x513   : > { %2002 = vrot.lane.b32.xlu0 %v7000_v59, %s6408_s27 }
 0x528   : > { %1731 = vmax.xlane.f32.xlu1 %v7128_v49 }
 0x52c   : > { %1727 = vmax.xlane.f32.xlu1 %v7132_v26 }
 0x56a   : > { %v1706_v50 = vpop.xlane.xlu0 %1705 }
 0x56b   : > { %v1735_v51 = vsub.f32 %v7071_v2, %v1706_v50 }
 0x56d   : > { %v1753_v52 = vmul.f32 1.442695, %v1735_v51  ;;  %v1704_v53 = vpop.xlane.xlu1 %1703 }
 0x56e   : > { %v1734_v10 = vsub.f32 %v7075_v36, %v1704_v53  ;;  %v1702_v27 = vpop.xlane.xlu0 %1701 }
 0x56f   : > { %5969 = vpow2.f32 %v1753_v52  ;;  %v1733_v55 = vsub.f32 %v7078_v37, %v1702_v27 }
 0x570   : > { %v1751_v61 = vmul.f32 1.442695, %v1734_v10 }
 0x571   : > { %v1749_v62 = vmul.f32 1.442695, %v1733_v55 }
 0x572   : > { %5971 = vpow2.f32 %v1751_v61  ;;  %v1708_v1 = vpop.xlane.xlu0 %1707 }
 0x573   : > { %5973 = vpow2.f32 %v1749_v62  ;;  %v1736_v5 = vsub.f32 %v1688_v63, %v1708_v1 }
 0x574   : > { %v1716_v15 = vpop.xlane.xlu1 %1715 }
 0x575   : > { %v1755_v6 = vmul.f32 1.442695, %v1736_v5  ;;  %v1740_v31 = vsub.f32 %v7084_v48, %v1716_v15 }
 0x576   : > { %v1714_v37 = vpop.xlane.xlu0 %1713 }
 0x577   : > { %5975 = vpow2.f32 %v1755_v6  ;;  %v1739_v19 = vsub.f32 %v7088_v24, %v1714_v37  ;;  %v1763_v17 = vmul.f32 1.442695, %v1740_v31 }
 0x578   : > { %v1712_v63 = vpop.xlane.xlu1 %1711 }
 0x579   : > { %v7140_v12 = vpop.eup %5969  ;;  %v1761_v22 = vmul.f32 1.442695, %v1739_v19  ;;  %v1738_v3 = vsub.f32 %v7092_v4, %v1712_v63 }
 0x57a   : > { %1785 = vadd.xlane.f32.xlu1 %v7140_v12  ;;  %v1710_v14 = vpop.xlane.xlu0 %1709 }
 0x57b   : > { %v1737_v25 = vsub.f32 %v7096_v32, %v1710_v14  ;;  %5977 = vpow2.f32 %v1761_v22  ;;  %v1759_v33 = vmul.f32 1.442695, %v1738_v3 }
 0x57c   : > { %v7143_v2 = vpop.eup %5971  ;;  %v1724_v29 = vpop.xlane.xlu1 %1723 }
 0x57d   : > { %v7145_v13 = vpop.eup %5973  ;;  %1783 = vadd.xlane.f32.xlu0 %v7143_v2  ;;  %v1757_v56 = vmul.f32 1.442695, %v1737_v25  ;;  %v1744_v48 = vsub.f32 %v7100_v7, %v1724_v29 }
 0x57e   : > { %1781 = vadd.xlane.f32.xlu1 %v7145_v13  ;;  %v1722_v16 = vpop.xlane.xlu0 %1721 }
 0x57f   : > { %v1743_v34 = vsub.f32 %v7104_v35, %v1722_v16  ;;  %5979 = vpow2.f32 %v1757_v56  ;;  %v1771_v45 = vmul.f32 1.442695, %v1744_v48 }
 0x580   : > { %v1720_v9 = vpop.xlane.xlu1 %1719  ;;  %5981 = vpow2.f32 %v1759_v33 }
 0x581   : > { %v7149_v36 = vpop.eup %5975  ;;  %v1769_v60 = vmul.f32 1.442695, %v1743_v34  ;;  %5983 = vpow2.f32 %v1763_v17  ;;  %v2039_v17 = vsel %vm1523_vm7, %v7047_v0, 0 }
 0x582   : > { %1787 = vadd.xlane.f32.xlu1 %v7149_v36  ;;  %v1718_v21 = vpop.xlane.xlu0 %1717 }
 0x583   : > { %v1741_v32 = vsub.f32 %v7112_v41, %v1718_v21  ;;  %5985 = vpow2.f32 %v1769_v60  ;;  %v1742_v41 = vsub.f32 %v7108_v38, %v1720_v9 }
 0x584   : > { %v7167_v35 = vpop.permute.xlu1 %2004 }
 0x585   : > { %v1765_v42 = vmul.f32 1.442695, %v1741_v32  ;;  %v7165_v44 = vpop.eup %5977  ;;  %v1767_v52 = vmul.f32 1.442695, %v1742_v41 }
 0x586   : > { %v1730_v30 = vpop.xlane.xlu0 %1729 }
 0x587   : > { %v1747_v24 = vsub.f32 %v7116_v43, %v1730_v30 }
 0x589   : > { %v1777_v4 = vmul.f32 1.442695, %v1747_v24  ;;  %v7171_v50 = vpop.eup %5979 }
 0x58a   : > { %v1726_v39 = vpop.xlane.xlu0 %1725 }
 0x58b   : > { %v1745_v40 = vsub.f32 %v7120_v20, %v1726_v39  ;;  %5987 = vpow2.f32 %v1777_v4  ;;  %v7173_v20 = vpop.eup %5981 }
 0x58c   : > { %5989 = vpow2.f32 %v1765_v42  ;;  %v7178_v10 = vpop.eup %5983 }
 0x58d   : > { %v1773_v43 = vmul.f32 1.442695, %v1745_v40  ;;  %v7180_v38 = vpop.eup %5985 }
 0x58e   : > { %v2003_v14 = vpop.permute.xlu0 %2002 }
 0x58f   : > { %5991 = vpow2.f32 %v1773_v43 }
 0x590   : > { %5993 = vpow2.f32 %v1771_v45 }
 0x593   : > { %2006 = vrot.lane.b32.xlu0 %v7008_v46, %s6408_s27  ;;  %2008 = vrot.lane.b32.xlu1 %v7006_v11, %s6408_s27 }
 0x595   : > { %v7185_v61 = vpop.eup %5987 }
 0x596   : > { %v7187_v62 = vpop.eup %5989 }
 0x599   : > { %v7191_v1 = vpop.eup %5991 }
 0x59a   : > { %v7193_v5 = vpop.eup %5993 }
 0x5b2   : > { %1793 = vadd.xlane.f32.xlu0 %v7165_v44 }
 0x5b5   : > { %v1732_v51 = vpop.xlane.xlu1 %1731 }
 0x5b6   : > { %v1748_v7 = vsub.f32 %v7128_v49, %v1732_v51  ;;  %1789 = vadd.xlane.f32.xlu0 %v7171_v50 }
 0x5b7   : > { %1791 = vadd.xlane.f32.xlu1 %v7173_v20 }
 0x5b8   : > { %v1779_v53 = vmul.f32 1.442695, %v1748_v7 }
 0x5b9   : > { %v1728_v27 = vpop.xlane.xlu1 %1727 }
 0x5ba   : > { %5995 = vpow2.f32 %v1779_v53  ;;  %v1746_v55 = vsub.f32 %v7132_v26, %v1728_v27  ;;  %1795 = vadd.xlane.f32.xlu0 %v7178_v10 }
 0x5bb   : > { %1801 = vadd.xlane.f32.xlu1 %v7180_v38  ;;  %5997 = vpow2.f32 %v1767_v52 }
 0x5bc   : > { %v1775_v49 = vmul.f32 1.442695, %v1746_v55 }
 0x5be   : > { %1809 = vadd.xlane.f32.xlu0 %v7185_v61  ;;  %5999 = vpow2.f32 %v1775_v49 }
 0x5bf   : > { %1797 = vadd.xlane.f32.xlu1 %v7187_v62 }
 0x5c2   : > { %1805 = vadd.xlane.f32.xlu0 %v7191_v1 }
 0x5c3   : > { %1803 = vadd.xlane.f32.xlu1 %v7193_v5 }
 0x5c4   : > { %v7197_v26 = vpop.eup %5995 }
 0x5c5   : > { %v7199_v6 = vpop.eup %5997 }
 0x5c6   : > { %1811 = vadd.xlane.f32.xlu0 %v7197_v26 }
 0x5c7   : > { %1799 = vadd.xlane.f32.xlu1 %v7199_v6 }
 0x5c8   : > { %v7203_v37 = vpop.eup %5999 }
 0x5cb   : > { %1807 = vadd.xlane.f32.xlu1 %v7203_v37 }
 0x5dc   : > { %2012 = vrot.lane.b32.xlu1 %v7014_v18, %s6408_s27  ;;  %2010 = vrot.lane.b32.xlu0 %v7016_v58, %s6408_s27  ;;  %s8530_s27 = scalar_lea.vmem %s8418_s10, %s6610_s3 }
 0x5e0   : > { %1984 = vrot.lane.b32.xlu1 %v6988_v57, %s6410_s29  ;;  %1982 = vrot.lane.b32.xlu0 %v6990_v23, %s6410_s29 }
 0x5e4   : > { %1988 = vrot.lane.b32.xlu1 %v6998_v8, %s6410_s29  ;;  %1986 = vrot.lane.b32.xlu0 %v7000_v59, %s6410_s29 }
 0x5e8   : > { %1992 = vrot.lane.b32.xlu1 %v7006_v11, %s6410_s29  ;;  %1990 = vrot.lane.b32.xlu0 %v7008_v46, %s6410_s29 }
 0x5ec   : > { %1996 = vrot.lane.b32.xlu1 %v7014_v18, %s6410_s29  ;;  %1994 = vrot.lane.b32.xlu0 %v7016_v58, %s6410_s29 }
 0x5f0   : > { %2739 = vrot.lane.b32.xlu1 %v6988_v57, %s6411_s20  ;;  %2737 = vrot.lane.b32.xlu0 %v6990_v23, %s6411_s20 }
 0x5f4   : > { %2743 = vrot.lane.b32.xlu1 %v6998_v8, %s6411_s20  ;;  %2741 = vrot.lane.b32.xlu0 %v7000_v59, %s6411_s20 }
 0x5f8   : > { %2747 = vrot.lane.b32.xlu1 %v7006_v11, %s6411_s20  ;;  %2745 = vrot.lane.b32.xlu0 %v7008_v46, %s6411_s20 }
 0x5fc   : > { %2751 = vrot.lane.b32.xlu1 %v7014_v18, %s6411_s20  ;;  %2749 = vrot.lane.b32.xlu0 %v7016_v58, %s6411_s20 }
 0x600   : > { %2723 = vrot.lane.b32.xlu1 %v6988_v57, %s6412_s26  ;;  %2721 = vrot.lane.b32.xlu0 %v6990_v23, %s6412_s26 }
 0x604   : > { %2727 = vrot.lane.b32.xlu1 %v6998_v8, %s6412_s26  ;;  %2725 = vrot.lane.b32.xlu0 %v7000_v59, %s6412_s26 }
 0x607   : > { %v1786_v15 = vpop.xlane.xlu1 %1785 }
 0x608   : > { %2731 = vrot.lane.b32.xlu1 %v7006_v11, %s6412_s26  ;;  %2729 = vrot.lane.b32.xlu0 %v7008_v46, %s6412_s26 }
 0x60a   : > { %v1784_v16 = vpop.xlane.xlu0 %1783 }
 0x60b   : > { %6001 = vrcp.f32 %v1784_v16  ;;  %v1782_v19 = vpop.xlane.xlu1 %1781 }
 0x60c   : > { %6003 = vrcp.f32 %v1782_v19  ;;  %2735 = vrot.lane.b32.xlu1 %v7014_v18, %s6412_s26  ;;  %2733 = vrot.lane.b32.xlu0 %v7016_v58, %s6412_s26 }
 0x60d   : > { %6005 = vrcp.f32 %v1786_v15 }
 0x60e   : > { %v2007_v0 = vpop.permute.xlu0 %2006 }
 0x60f   : > { %v1788_v63 = vpop.xlane.xlu1 %1787 }
 0x610   : > { %6007 = vrcp.f32 %v1788_v63  ;;  %2343 = vrot.lane.b32.xlu1 %v6990_v23, %s6413_s25  ;;  %2347 = vrot.lane.b32.xlu0 %v7000_v59, %s6413_s25 }
 0x614   : > { %2345 = vrot.lane.b32.xlu1 %v6988_v57, %s6413_s25 }
 0x615   : > { %v6002_v21 = vpop.eup %6001 }
 0x616   : > { %v6004_v22 = vpop.eup %6003  ;;  %v1830_v25 = vmul.f32 %v6002_v21, %v7143_v2  ;;  %v2042_v2 = vsel %vm1523_vm7, %v7135_v28, 0 }
 0x617   : > { %v1829_v3 = vmul.f32 %v6004_v22, %v7145_v13  ;;  %v6006_v29 = vpop.eup %6005  ;;  %v2048_v13 = vsel %vm1523_vm7, %v7167_v35, 0 }
 0x618   : > { %2349 = vrot.lane.b32.xlu1 %v6998_v8, %s6413_s25  ;;  %v1831_v56 = vmul.f32 %v6006_v29, %v7140_v12  ;;  %v2045_v12 = vsel %vm1523_vm7, %v2003_v14, 0 }
 0x619   : > { %v1845_v30 = vpack.c.bf16 %v1830_v25, %v1829_v3 }
 0x61a   : > { %v6008_v31 = vpop.eup %6007 }
 0x61b   : > { %v1832_v33 = vmul.f32 %v6008_v31, %v7149_v36  ;;  %5422 = vmatprep.mubr.bf16.mxu0 %v1845_v30  ;;  %v2051_v36 = vsel %vm1523_vm7, %v2007_v0, 0 }
 0x61d   : > { %v1846_v34 = vpack.c.bf16 %v1832_v33, %v1831_v56 }
 0x61f   : > { %5423 = vmatmul.mubr.bf16.vlgmr.msra.gmra.mrb[16].mxu0 %v1846_v34 }
 0x620   : > { %5439 = vmatpush3.bf16.xpose.msra.mxu0 %v2039_v17 }
 0x621   : > { %5811 = vmatprep.subr.msk.bf16.mxu0 %vm1523_vm7, %v7135_v28  ;;  %v2009_v28 = vpop.permute.xlu1 %2008 }
 0x622   : > { %v2054_v32 = vsel %vm1523_vm7, %v2009_v28, 0 }
 0x628   : > { %5441 = vmatpush3.bf16.xpose.msra.mxu0 %v2042_v2 }
 0x629   : > { %5812 = vmatprep.subr.msk.bf16.mxu0 %vm1523_vm7, %v2003_v14 }
 0x630   : > { %5443 = vmatpush3.bf16.xpose.msra.mxu0 %v2045_v12 }
 0x631   : > { %5813 = vmatprep.subr.msk.bf16.mxu0 %vm1523_vm7, %v7167_v35 }
 0x638   : > { %5445 = vmatpush3.bf16.xpose.msra.mxu0 %v2048_v13 }
 0x639   : > { %5814 = vmatprep.subr.msk.bf16.mxu0 %vm1523_vm7, %v2007_v0 }
 0x63f   : > { %v1794_v9 = vpop.xlane.xlu0 %1793 }
 0x640   : > { %5447 = vmatpush3.bf16.xpose.msra.mxu0 %v2051_v36 }
 0x641   : > { %5815 = vmatprep.subr.msk.bf16.mxu0 %vm1523_vm7, %v2009_v28 }
 0x643   : > { %v1790_v24 = vpop.xlane.xlu0 %1789 }
 0x644   : > { %6009 = vrcp.f32 %v1790_v24  ;;  %v1792_v60 = vpop.xlane.xlu1 %1791 }
 0x645   : > { %6011 = vrcp.f32 %v1792_v60 }
 0x646   : > { %6013 = vrcp.f32 %v1794_v9 }
 0x647   : > { %v1796_v39 = vpop.xlane.xlu0 %1795 }
 0x648   : > { %5449 = vmatpush3.bf16.xpose.msra.mxu0 %v2054_v32  ;;  %6015 = vrcp.f32 %v1796_v39  ;;  %v1802_v4 = vpop.xlane.xlu1 %1801 }
 0x64b   : > { %v1810_v40 = vpop.xlane.xlu0 %1809 }
 0x64c   : > { %v1798_v48 = vpop.xlane.xlu1 %1797 }
 0x64e   : > { %v6010_v42 = vpop.eup %6009 }
 0x64f   : > { %v6012_v35 = vpop.eup %6011  ;;  %v1806_v43 = vpop.xlane.xlu0 %1805  ;;  %v1833_v45 = vmul.f32 %v6010_v42, %v7171_v50 }
 0x650   : > { %v6014_v41 = vpop.eup %6013  ;;  %v1804_v51 = vpop.xlane.xlu1 %1803  ;;  %v1834_v7 = vmul.f32 %v6012_v35, %v7173_v20 }
 0x651   : > { %6017 = vrcp.f32 %v1804_v51  ;;  %v1835_v55 = vmul.f32 %v6014_v41, %v7165_v44 }
 0x652   : > { %v6016_v52 = vpop.eup %6015  ;;  %v1847_v53 = vpack.c.bf16 %v1834_v7, %v1833_v45  ;;  %6019 = vrcp.f32 %v1798_v48 }
 0x653   : > { %v1812_v27 = vpop.xlane.xlu0 %1811  ;;  %v1836_v49 = vmul.f32 %v6016_v52, %v7178_v10  ;;  %6021 = vrcp.f32 %v1802_v4 }
 0x654   : > { %v1800_v14 = vpop.xlane.xlu1 %1799  ;;  %5426 = vmatprep.mubr.bf16.mxu0 %v1847_v53 }
 0x655   : > { %6023 = vrcp.f32 %v1800_v14  ;;  %v1848_v15 = vpack.c.bf16 %v1836_v49, %v1835_v55 }
 0x656   : > { %6025 = vrcp.f32 %v1806_v43 }
 0x657   : > { %5427 = vmatmul.mubr.bf16.gmra.mrb[20].mxu0 %v1848_v15  ;;  %v2011_v50 = vpop.permute.xlu0 %2010 }
 0x658   : > { %v1808_v16 = vpop.xlane.xlu1 %1807  ;;  %5816 = vmatprep.subr.msk.bf16.mxu0 %vm1523_vm7, %v2011_v50  ;;  %v2057_v20 = vsel %vm1523_vm7, %v2011_v50, 0 }
 0x659   : > { %6027 = vrcp.f32 %v1808_v16  ;;  %5451 = vmatpush3.bf16.xpose.msra.mxu0 %v2057_v20 }
 0x65a   : > { %6029 = vrcp.f32 %v1812_v27 }
 0x65b   : > { %v1983_v19 = vpop.permute.xlu0 %1982  ;;  %v6018_v44 = vpop.eup %6017  ;;  %6031 = vrcp.f32 %v1810_v40 }
 0x65c   : > { %v2013_v10 = vpop.permute.xlu1 %2012  ;;  %v6020_v63 = vpop.eup %6019  ;;  %v1840_v3 = vmul.f32 %v6018_v44, %v7193_v5 }
 0x65d   : > { %5817 = vmatprep.subr.msk.bf16.mxu0 %vm1523_vm7, %v2013_v10  ;;  %v6022_v21 = vpop.eup %6021  ;;  %v2060_v30 = vsel %vm1523_vm7, %v2013_v10, 0  ;;  %v1837_v31 = vmul.f32 %v6020_v63, %v7187_v62 }
 0x65e   : > { %v1839_v34 = vmul.f32 %v6022_v21, %v7180_v38 }
 0x65f   : > { %v6024_v22 = vpop.eup %6023  ;;  %v1987_v25 = vpop.permute.xlu0 %1986 }
 0x660   : > { %v1985_v29 = vpop.permute.xlu1 %1984  ;;  %v1838_v56 = vmul.f32 %v6024_v22, %v7199_v6  ;;  %v6026_v33 = vpop.eup %6025  ;;  %v1850_v13 = vpack.c.bf16 %v1840_v3, %v1839_v34 }
 0x661   : > { %5453 = vmatpush3.bf16.xpose.msra.mxu0 %v2060_v30  ;;  %v1841_v5 = vmul.f32 %v6026_v33, %v7191_v1 }
 0x662   : > { %v1849_v17 = vpack.c.bf16 %v1838_v56, %v1837_v31 }
 0x663   : > { %v6028_v2 = vpop.eup %6027  ;;  %v1991_v12 = vpop.permute.xlu0 %1990 }
 0x664   : > { %v6030_v0 = vpop.eup %6029  ;;  %v1989_v36 = vpop.permute.xlu1 %1988  ;;  %5430 = vmatprep.mubr.bf16.mxu0 %v1849_v17  ;;  %v1842_v9 = vmul.f32 %v6028_v2, %v7203_v37 }
 0x665   : > { %5431 = vmatmul.mubr.bf16.gmra.mrb[24].mxu0 %v1850_v13  ;;  %v6032_v28 = vpop.eup %6031  ;;  %v1844_v6 = vmul.f32 %v6030_v0, %v7197_v26 }
 0x666   : > { %v1851_v62 = vpack.c.bf16 %v1842_v9, %v1841_v5  ;;  %v1843_v38 = vmul.f32 %v6032_v28, %v7185_v61 }
 0x667   : > { %v1995_v24 = vpop.permute.xlu0 %1994 }
 0x668   : > { %v1993_v60 = vpop.permute.xlu1 %1992  ;;  %5434 = vmatprep.mubr.bf16.mxu0 %v1851_v62  ;;  %v1852_v39 = vpack.c.bf16 %v1844_v6, %v1843_v38 }
 0x66b   : > { %v2738_v32 = vpop.permute.xlu0 %2737 }
 0x66c   : > { %v1997_v4 = vpop.permute.xlu1 %1996  ;;  %5820 = vmatprep.subr.msk.bf16.mxu0 %vm1523_vm7, %v2738_v32  ;;  %v2778_v26 = vsel %vm1523_vm7, %v2738_v32, 0 }
 0x66d   : > { %5435 = vmatmul.mubr.bf16.gmra.mrb[28].mxu0 %v1852_v39 }
 0x66e   : > { %5454 = vmatprep.mubr.msk.bf16.mxu0 %vm1523_vm7, %v1983_v19 }
 0x66f   : > { %v2742_v1 = vpop.permute.xlu0 %2741 }
 0x670   : > { %v2740_v37 = vpop.permute.xlu1 %2739  ;;  %v2784_v52 = vsel %vm1523_vm7, %v2742_v1, 0 }
 0x671   : > { %v2781_v43 = vsel %vm1523_vm7, %v2740_v37, 0 }
 0x673   : > { %v2746_v40 = vpop.permute.xlu0 %2745 }
 0x674   : > { %v2744_v48 = vpop.permute.xlu1 %2743  ;;  %v2790_v16 = vsel %vm1523_vm7, %v2746_v40, 0 }
 0x675   : > { %5455 = vmatmul.mubr.msk.bf16.vlgmr.msra.gmra.mrb[32].mxu0 %vm1523_vm7, %v1985_v29  ;;  %v2787_v49 = vsel %vm1523_vm7, %v2744_v48, 0 }
 0x676   : > { %5539 = vmatpush3.bf16.xpose.msra.mxu0 %v2778_v26  ;;  %5458 = vmatprep.mubr.msk.bf16.mxu0 %vm1523_vm7, %v1987_v25 }
 0x677   : > { %5821 = vmatprep.subr.msk.bf16.mxu0 %vm1523_vm7, %v2740_v37  ;;  %v2750_v61 = vpop.permute.xlu0 %2749 }
 0x678   : > { %v2748_v42 = vpop.permute.xlu1 %2747  ;;  %v2796_v10 = vsel %vm1523_vm7, %v2750_v61, 0 }
 0x679   : > { %v2793_v44 = vsel %vm1523_vm7, %v2748_v42, 0 }
 0x67b   : > { %v2722_v45 = vpop.permute.xlu0 %2721 }
 0x67c   : > { %v2752_v35 = vpop.permute.xlu1 %2751 }
 0x67d   : > { %5459 = vmatmul.mubr.msk.bf16.gmra.mrb[36].mxu0 %vm1523_vm7, %v1989_v36  ;;  %v2799_v63 = vsel %vm1523_vm7, %v2752_v35, 0 }
 0x67e   : > { %5541 = vmatpush3.bf16.xpose.msra.mxu0 %v2781_v43  ;;  %5462 = vmatprep.mubr.msk.bf16.mxu0 %vm1523_vm7, %v1991_v12 }
 0x67f   : > { %5822 = vmatprep.subr.msk.bf16.mxu0 %vm1523_vm7, %v2742_v1  ;;  %v2726_v51 = vpop.permute.xlu0 %2725 }
 0x680   : > { %v2724_v41 = vpop.permute.xlu1 %2723 }
 0x683   : > { %v2730_v27 = vpop.permute.xlu0 %2729 }
 0x684   : > { %v2728_v7 = vpop.permute.xlu1 %2727 }
 0x685   : > { %5463 = vmatmul.mubr.msk.bf16.gmra.mrb[40].mxu0 %vm1523_vm7, %v1993_v60 }
 0x686   : > { %5543 = vmatpush3.bf16.xpose.msra.mxu0 %v2784_v52  ;;  %5466 = vmatprep.mubr.msk.bf16.mxu0 %vm1523_vm7, %v1995_v24 }
 0x687   : > { %5823 = vmatprep.subr.msk.bf16.mxu0 %vm1523_vm7, %v2744_v48  ;;  %v2734_v14 = vpop.permute.xlu0 %2733 }
 0x688   : > { %v2732_v53 = vpop.permute.xlu1 %2731 }
 0x68b   : > { %v2348_v20 = vpop.permute.xlu0 %2347 }
 0x68c   : > { %v2736_v55 = vpop.permute.xlu1 %2735 }
 0x68d   : > { %5467 = vmatmul.mubr.msk.bf16.gmra.mrb[44].mxu0 %vm1523_vm7, %v1997_v4 }
 0x68e   : > { %5545 = vmatpush3.bf16.xpose.msra.mxu0 %v2787_v49  ;;  %5554 = vmatprep.mubr.msk.bf16.mxu0 %vm1523_vm7, %v2722_v45 }
 0x68f   : > { %5824 = vmatprep.subr.msk.bf16.mxu0 %vm1523_vm7, %v2746_v40 }
 0x690   : > { %v2344_v15 = vpop.permute.xlu1 %2343 }
 0x691   : > { %5470 = vmatprep.subr.bf16.mxu1 %v2344_v15 }
 0x692   : > { %5471 = vmatpush3.bf16.msra.mxu1 %v2344_v15 }
 0x694   : > { %v2346_v50 = vpop.permute.xlu1 %2345 }
 0x695   : > { %5472 = vmatprep.subr.bf16.mxu1 %v2346_v50 }
 0x696   : > { %5547 = vmatpush3.bf16.xpose.msra.mxu0 %v2790_v16  ;;  %5473 = vmatpush3.bf16.msra.mxu1 %v2346_v50 }
 0x697   : > { %5825 = vmatprep.subr.msk.bf16.mxu0 %vm1523_vm7, %v2748_v42  ;;  %5474 = vmatprep.subr.bf16.mxu1 %v2348_v20 }
 0x698   : > { %v2350_v19 = vpop.permute.xlu1 %2349 }
 0x69a   : > { %5475 = vmatpush3.bf16.msra.mxu1 %v2348_v20 }
 0x69b   : > { %5476 = vmatprep.subr.bf16.mxu1 %v2350_v19 }
 0x69e   : > { %5549 = vmatpush3.bf16.xpose.msra.mxu0 %v2793_v44  ;;  %5477 = vmatpush3.bf16.msra.mxu1 %v2350_v19 }
 0x69f   : > { %5826 = vmatprep.subr.msk.bf16.mxu0 %vm1523_vm7, %v2750_v61 }
 0x6a6   : > { %5551 = vmatpush3.bf16.xpose.msra.mxu0 %v2796_v10 }
 0x6a7   : > { %5827 = vmatprep.subr.msk.bf16.mxu0 %vm1523_vm7, %v2752_v35 }
 0x6ae   : > { %5553 = vmatpush3.bf16.xpose.msra.mxu0 %v2799_v63 }
 0x6b5   : > { %5555 = vmatmul.mubr.msk.bf16.vlgmr.msra.gmra.mrb[48].mxu0 %vm1523_vm7, %v2724_v41 }
 0x6b6   : > { %5558 = vmatprep.mubr.msk.bf16.mxu0 %vm1523_vm7, %v2726_v51 }
 0x6bd   : > { %5559 = vmatmul.mubr.msk.bf16.gmra.mrb[52].mxu0 %vm1523_vm7, %v2728_v7 }
 0x6be   : > { %5562 = vmatprep.mubr.msk.bf16.mxu0 %vm1523_vm7, %v2730_v27 }
 0x6c5   : > { %5563 = vmatmul.mubr.msk.bf16.gmra.mrb[56].mxu0 %vm1523_vm7, %v2732_v53 }
 0x6c6   : > { %5566 = vmatprep.mubr.msk.bf16.mxu0 %vm1523_vm7, %v2734_v14 }
 0x6cd   : > { %5567 = vmatmul.mubr.msk.bf16.gmra.mrb[60].mxu0 %vm1523_vm7, %v2736_v55 }
 0x6f2   : > { %v7310_v21 = vpop.f32.mrb[16].mxu0 }
 0x6f3   : > { %v7312_v22 = vpop.f32.mrb[17].mxu0 }
 0x6f4   : > { %v7314_v25 = vpop.f32.mrb[18].mxu0 }
 0x6f5   : > { %v7318_v29 = vpop.f32.mrb[19].mxu0 }
 0x72a   : > { %v7322_v31 = vpop.f32.mrb[20].mxu0 }
 0x72b   : > { %v7324_v56 = vpop.f32.mrb[21].mxu0 }
 0x72c   : > { %v7326_v33 = vpop.f32.mrb[22].mxu0 }
 0x72d   : > { %v7330_v17 = vpop.f32.mrb[23].mxu0 }
 0x738   : > { %v7334_v12 = vpop.f32.mrb[24].mxu0 }
 0x739   : > { %8504 = vst [vmem:[#allocation20_spill] sm:$0xff] %v7334_v12  ;;  %v7336_v13 = vpop.f32.mrb[25].mxu0 }
 0x73a   : > { %8505 = vst [vmem:[#allocation21_spill] sm:$0xff] %v7336_v13  ;;  %v7338_v0 = vpop.f32.mrb[26].mxu0 }
 0x73b   : > { %8506 = vst [vmem:[#allocation22_spill] sm:$0xff] %v7338_v0  ;;  %v7342_v5 = vpop.f32.mrb[27].mxu0 }
 0x73c   : > { %8507 = vst [vmem:[#allocation23_spill] sm:$0xff] %v7342_v5 }
 0x740   : > { %v7346_v28 = vpop.f32.mrb[28].mxu0 }
 0x741   : > { %8508 = vst [vmem:[#allocation24_spill] sm:$0xff] %v7346_v28  ;;  %v7348_v62 = vpop.f32.mrb[29].mxu0 }
 0x742   : > { %8509 = vst [vmem:[#allocation25_spill] sm:$0xff] %v7348_v62  ;;  %v7350_v24 = vpop.f32.mrb[30].mxu0 }
 0x743   : > { %8510 = vst [vmem:[#allocation26_spill] sm:$0xff] %v7350_v24  ;;  %v7354_v60 = vpop.f32.mrb[31].mxu0 }
 0x744   : > { %8511 = vst [vmem:[#allocation27_spill] sm:$0xff] %v7354_v60 }
 0x748   : > { %v5456_v32 = vpop.f32.mrb[32].mxu0 }
 0x749   : > { %v2161_v39 = vmul.f32 0.35355338, %v5456_v32  ;;  %v2096_v4 = vpop.f32.mrb[33].mxu0 }
 0x74a   : > { %v5457_v1 = vpop.f32.mrb[34].mxu0  ;;  %v2159_v40 = vmul.f32 0.35355338, %v2096_v4 }
 0x74b   : > { %v7359_v37 = vadd.f32 %v2161_v39, %v7068_v54  ;;  %v2099_v48 = vpop.f32.mrb[35].mxu0  ;;  %v2162_v35 = vmul.f32 0.35355338, %v5457_v1 }
 0x74c   : > { %v2160_v26 = vmul.f32 0.35355338, %v2099_v48  ;;  %v7366_v42 = vadd.f32 %v2159_v40, %v7068_v54 }
 0x74d   : > { %2195 = vmax.xlane.f32.xlu0 %v7359_v37  ;;  %v7371_v7 = vadd.f32 %v2162_v35, %v7068_v54 }
 0x74e   : > { %v7363_v61 = vadd.f32 %v2160_v26, %v7068_v54 }
 0x750   : > { %2193 = vmax.xlane.f32.xlu1 %v7363_v61  ;;  %v5460_v43 = vpop.f32.mrb[36].mxu0 }
 0x751   : > { %2191 = vmax.xlane.f32.xlu0 %v7366_v42  ;;  %v2112_v45 = vpop.f32.mrb[37].mxu0  ;;  %v2165_v52 = vmul.f32 0.35355338, %v5460_v43 }
 0x752   : > { %v2163_v41 = vmul.f32 0.35355338, %v2112_v45  ;;  %v5461_v51 = vpop.f32.mrb[38].mxu0 }
 0x753   : > { %v2115_v53 = vpop.f32.mrb[39].mxu0  ;;  %v2166_v55 = vmul.f32 0.35355338, %v5461_v51  ;;  %v7379_v49 = vadd.f32 %v2165_v52, %v7068_v54 }
 0x754   : > { %v7374_v27 = vadd.f32 %v2163_v41, %v7068_v54  ;;  %v2164_v14 = vmul.f32 0.35355338, %v2115_v53 }
 0x755   : > { %2197 = vmax.xlane.f32.xlu0 %v7371_v7  ;;  %v7382_v15 = vadd.f32 %v2166_v55, %v7068_v54 }
 0x756   : > { %2199 = vmax.xlane.f32.xlu1 %v7374_v27  ;;  %v7387_v44 = vadd.f32 %v2164_v14, %v7068_v54 }
 0x758   : > { %v5464_v50 = vpop.f32.mrb[40].mxu0 }
 0x759   : > { %2203 = vmax.xlane.f32.xlu0 %v7379_v49  ;;  %v2128_v16 = vpop.f32.mrb[41].mxu0  ;;  %v2169_v10 = vmul.f32 0.35355338, %v5464_v50 }
 0x75a   : > { %v2167_v20 = vmul.f32 0.35355338, %v2128_v16  ;;  %2205 = vmax.xlane.f32.xlu1 %v7382_v15  ;;  %v5465_v19 = vpop.f32.mrb[42].mxu0 }
 0x75b   : > { %v2131_v63 = vpop.f32.mrb[43].mxu0  ;;  %v2170_v39 = vmul.f32 0.35355338, %v5465_v19  ;;  %v7395_v4 = vadd.f32 %v2169_v10, %v7068_v54 }
 0x75c   : > { %v7390_v32 = vadd.f32 %v2167_v20, %v7068_v54  ;;  %v2168_v1 = vmul.f32 0.35355338, %v2131_v63 }
 0x75d   : > { %2201 = vmax.xlane.f32.xlu0 %v7387_v44  ;;  %v7398_v40 = vadd.f32 %v2170_v39, %v7068_v54 }
 0x75e   : > { %2207 = vmax.xlane.f32.xlu1 %v7390_v32  ;;  %v7403_v45 = vadd.f32 %v2168_v1, %v7068_v54 }
 0x760   : > { %v5468_v48 = vpop.f32.mrb[44].mxu0 }
 0x761   : > { %2211 = vmax.xlane.f32.xlu0 %v7395_v4  ;;  %v2144_v26 = vpop.f32.mrb[45].mxu0  ;;  %v2173_v41 = vmul.f32 0.35355338, %v5468_v48 }
 0x762   : > { %v2171_v35 = vmul.f32 0.35355338, %v2144_v26  ;;  %2213 = vmax.xlane.f32.xlu1 %v7398_v40  ;;  %v5469_v43 = vpop.f32.mrb[46].mxu0 }
 0x763   : > { %v2147_v51 = vpop.f32.mrb[47].mxu0  ;;  %v2174_v53 = vmul.f32 0.35355338, %v5469_v43  ;;  %v7411_v55 = vadd.f32 %v2173_v41, %v7068_v54 }
 0x764   : > { %v7406_v52 = vadd.f32 %v2171_v35, %v7068_v54  ;;  %v2172_v14 = vmul.f32 0.35355338, %v2147_v51 }
 0x765   : > { %2209 = vmax.xlane.f32.xlu0 %v7403_v45  ;;  %v7414_v50 = vadd.f32 %v2174_v53, %v7068_v54 }
 0x766   : > { %2215 = vmax.xlane.f32.xlu1 %v7406_v52  ;;  %v7419_v16 = vadd.f32 %v2172_v14, %v7068_v54 }
 0x769   : > { %2219 = vmax.xlane.f32.xlu0 %v7411_v55 }
 0x76a   : > { %2221 = vmax.xlane.f32.xlu1 %v7414_v50 }
 0x76d   : > { %2217 = vmax.xlane.f32.xlu0 %v7419_v16 }
 0x77b   : > { %2353 = vrot.lane.b32.xlu1 %v7006_v11, %s6413_s25 }
 0x783   : > { %2351 = vrot.lane.b32.xlu0 %v7008_v46, %s6413_s25 }
 0x788   : > { %v7426_v20 = vpop.f32.mrb[48].mxu0 }
 0x789   : > { %v7428_v19 = vpop.f32.mrb[49].mxu0 }
 0x78a   : > { %v7430_v10 = vpop.f32.mrb[50].mxu0 }
 0x78b   : > { %v7432_v63 = vpop.f32.mrb[51].mxu0 }
 0x790   : > { %v7434_v39 = vpop.f32.mrb[52].mxu0 }
 0x791   : > { %v7436_v1 = vpop.f32.mrb[53].mxu0 }
 0x792   : > { %v7438_v48 = vpop.f32.mrb[54].mxu0 }
 0x793   : > { %v7440_v26 = vpop.f32.mrb[55].mxu0 }
 0x798   : > { %v7442_v35 = vpop.f32.mrb[56].mxu0 }
 0x799   : > { %v7444_v43 = vpop.f32.mrb[57].mxu0 }
 0x79a   : > { %v7446_v41 = vpop.f32.mrb[58].mxu0 }
 0x79b   : > { %v7448_v51 = vpop.f32.mrb[59].mxu0 }
 0x7a0   : > { %v7450_v53 = vpop.f32.mrb[60].mxu0 }
 0x7a1   : > { %v7452_v14 = vpop.f32.mrb[61].mxu0 }
 0x7a2   : > { %v7454_v6 = vpop.f32.mrb[62].mxu0 }
 0x7a3   : > { %v7456_v38 = vpop.f32.mrb[63].mxu0 }
 0x7da   : > { %v2196_v36 = vpop.xlane.xlu0 %2195 }
 0x7db   : > { %v2225_v9 = vsub.f32 %v7359_v37, %v2196_v36 }
 0x7dd   : > { %v2243_v34 = vmul.f32 1.442695, %v2225_v9  ;;  %v2194_v3 = vpop.xlane.xlu1 %2193 }
 0x7de   : > { %v2192_v2 = vpop.xlane.xlu0 %2191  ;;  %v2224_v28 = vsub.f32 %v7363_v61, %v2194_v3 }
 0x7df   : > { %6033 = vpow2.f32 %v2243_v34  ;;  %v2223_v30 = vsub.f32 %v7366_v42, %v2192_v2 }
 0x7e0   : > { %v2241_v0 = vmul.f32 1.442695, %v2224_v28 }
 0x7e1   : > { %v2239_v47 = vmul.f32 1.442695, %v2223_v30 }
 0x7e2   : > { %v2198_v24 = vpop.xlane.xlu0 %2197 }
 0x7e3   : > { %6035 = vpow2.f32 %v2239_v47  ;;  %v2226_v62 = vsub.f32 %v7371_v7, %v2198_v24  ;;  %v2200_v60 = vpop.xlane.xlu1 %2199 }
 0x7e4   : > { %v2227_v13 = vsub.f32 %v7374_v27, %v2200_v60 }
 0x7e5   : > { %v2245_v12 = vmul.f32 1.442695, %v2226_v62 }
 0x7e6   : > { %v2204_v5 = vpop.xlane.xlu0 %2203  ;;  %v2247_v3 = vmul.f32 1.442695, %v2227_v13 }
 0x7e7   : > { %6037 = vpow2.f32 %v2245_v12  ;;  %v2229_v36 = vsub.f32 %v7379_v49, %v2204_v5  ;;  %v2206_v34 = vpop.xlane.xlu1 %2205 }
 0x7e8   : > { %v2230_v9 = vsub.f32 %v7382_v15, %v2206_v34  ;;  %6039 = vpow2.f32 %v2241_v0 }
 0x7e9   : > { %v7465_v2 = vpop.eup %6033  ;;  %v2251_v30 = vmul.f32 1.442695, %v2229_v36 }
 0x7ea   : > { %2275 = vadd.xlane.f32.xlu0 %v7465_v2  ;;  %v2202_v47 = vpop.xlane.xlu0 %2201  ;;  %v2253_v62 = vmul.f32 1.442695, %v2230_v9 }
 0x7eb   : > { %6041 = vpow2.f32 %v2251_v30  ;;  %v2228_v28 = vsub.f32 %v7387_v44, %v2202_v47  ;;  %v2208_v24 = vpop.xlane.xlu1 %2207 }
 0x7ec   : > { %6043 = vpow2.f32 %v2247_v3  ;;  %v2231_v5 = vsub.f32 %v7390_v32, %v2208_v24 }
 0x7ed   : > { %v7469_v60 = vpop.eup %6035  ;;  %v2249_v12 = vmul.f32 1.442695, %v2228_v28  ;;  %6045 = vpow2.f32 %v2253_v62 }
 0x7ee   : > { %2271 = vadd.xlane.f32.xlu1 %v7469_v60  ;;  %v2212_v37 = vpop.xlane.xlu0 %2211  ;;  %v2255_v27 = vmul.f32 1.442695, %v2231_v5 }
 0x7ef   : > { %v2233_v13 = vsub.f32 %v7395_v4, %v2212_v37  ;;  %v2214_v0 = vpop.xlane.xlu1 %2213  ;;  %6047 = vpow2.f32 %v2249_v12 }
 0x7f0   : > { %v2234_v61 = vsub.f32 %v7398_v40, %v2214_v0 }
 0x7f1   : > { %v7475_v42 = vpop.eup %6037  ;;  %v2259_v7 = vmul.f32 1.442695, %v2233_v13 }
 0x7f2   : > { %2277 = vadd.xlane.f32.xlu0 %v7475_v42  ;;  %v2210_v49 = vpop.xlane.xlu0 %2209  ;;  %v2261_v15 = vmul.f32 1.442695, %v2234_v61  ;;  %v7479_v32 = vpop.eup %6039 }
 0x7f3   : > { %6049 = vpow2.f32 %v2259_v7  ;;  %v2232_v44 = vsub.f32 %v7403_v45, %v2210_v49  ;;  %v2216_v36 = vpop.xlane.xlu1 %2215 }
 0x7f4   : > { %6051 = vpow2.f32 %v2255_v27  ;;  %v2235_v9 = vsub.f32 %v7406_v52, %v2216_v36 }
 0x7f5   : > { %v7481_v34 = vpop.eup %6041  ;;  %v2257_v4 = vmul.f32 1.442695, %v2232_v44  ;;  %6053 = vpow2.f32 %v2261_v15 }
 0x7f6   : > { %2273 = vadd.xlane.f32.xlu0 %v7479_v32  ;;  %2283 = vadd.xlane.f32.xlu1 %v7481_v34  ;;  %v2220_v40 = vpop.xlane.xlu0 %2219  ;;  %v7487_v3 = vpop.eup %6043  ;;  %v2263_v24 = vmul.f32 1.442695, %v2235_v9  ;;  %v2905_v9 = vmul.f32 0.35355338, %v7438_v48 }
 0x7f7   : > { %v2237_v30 = vsub.f32 %v7411_v55, %v2220_v40  ;;  %v7489_v45 = vpop.eup %6045  ;;  %6055 = vpow2.f32 %v2257_v4  ;;  %v2222_v62 = vpop.xlane.xlu1 %2221  ;;  %v2903_v40 = vmul.f32 0.35355338, %v7440_v26  ;;  %v2909_v26 = vmul.f32 0.35355338, %v7446_v41 }
 0x7f8   : > { %v2238_v49 = vsub.f32 %v7414_v50, %v2222_v62  ;;  %v2899_v50 = vmul.f32 0.35355338, %v7432_v63  ;;  %v7552_v63 = vadd.f32 %v2905_v9, %v7068_v54 }
 0x7f9   : > { %v2267_v47 = vmul.f32 1.442695, %v2237_v30  ;;  %v7493_v12 = vpop.eup %6047  ;;  %v7547_v30 = vadd.f32 %v2903_v40, %v7068_v54  ;;  %v7564_v62 = vadd.f32 %v2909_v26, %v7068_v54 }
 0x7fa   : > { %2285 = vadd.xlane.f32.xlu0 %v7489_v45  ;;  %2279 = vadd.xlane.f32.xlu1 %v7487_v3  ;;  %v2218_v28 = vpop.xlane.xlu0 %2217  ;;  %v2269_v44 = vmul.f32 1.442695, %v2238_v49  ;;  %v7540_v4 = vadd.f32 %v2899_v50, %v7068_v54  ;;  %v2900_v50 = vmul.f32 0.35355338, %v7426_v20  ;;  %v2901_v20 = vmul.f32 0.35355338, %v7430_v10 }
 0x7fb   : > { %6057 = vpow2.f32 %v2267_v47  ;;  %v2354_v37 = vpop.permute.xlu1 %2353  ;;  %v2236_v27 = vsub.f32 %v7419_v16, %v2218_v28  ;;  %v2907_v47 = vmul.f32 0.35355338, %v7448_v51  ;;  %v2911_v28 = vmul.f32 0.35355338, %v7456_v38 }
 0x7fc   : > { %6059 = vpow2.f32 %v2263_v24  ;;  %v2913_v51 = vmul.f32 0.35355338, %v7454_v6 }
 0x7fd   : > { %v7495_v5 = vpop.eup %6049  ;;  %v2265_v15 = vmul.f32 1.442695, %v2236_v27  ;;  %v7559_v48 = vadd.f32 %v2907_v47, %v7068_v54  ;;  %v7570_v24 = vadd.f32 %v2911_v28, %v7068_v54  ;;  %v7586_v28 = vadd.f32 %v2900_v50, %v7068_v54 }
 0x7fe   : > { %2281 = vadd.xlane.f32.xlu0 %v7493_v12  ;;  %2291 = vadd.xlane.f32.xlu1 %v7495_v5  ;;  %v2352_v52 = vpop.permute.xlu0 %2351  ;;  %v7499_v55 = vpop.eup %6051  ;;  %v7574_v41 = vadd.f32 %v2913_v51, %v7068_v54  ;;  %v7595_v50 = vadd.f32 %v2901_v20, %v7068_v54 }
 0x7ff   : > { %5478 = vmatprep.subr.bf16.mxu1 %v2352_v52  ;;  %v7501_v13 = vpop.eup %6053  ;;  %6061 = vpow2.f32 %v2265_v15  ;;  %v2898_v15 = vmul.f32 0.35355338, %v7428_v19 }
 0x800   : > { %5479 = vmatpush3.bf16.msra.mxu1 %v2352_v52  ;;  %6063 = vpow2.f32 %v2269_v44 }
 0x801   : > { %5480 = vmatprep.subr.bf16.mxu1 %v2354_v37  ;;  %v7505_v0 = vpop.eup %6055  ;;  %v7580_v40 = vadd.f32 %v2898_v15, %v7068_v54 }
 0x802   : > { %2293 = vadd.xlane.f32.xlu0 %v7501_v13  ;;  %2287 = vadd.xlane.f32.xlu1 %v7499_v55 }
 0x804   : > { %5481 = vmatpush3.bf16.msra.mxu1 %v2354_v37 }
 0x805   : > { %v7507_v61 = vpop.eup %6057 }
 0x806   : > { %2289 = vadd.xlane.f32.xlu0 %v7505_v0  ;;  %2299 = vadd.xlane.f32.xlu1 %v7507_v61  ;;  %v7511_v7 = vpop.eup %6059 }
 0x809   : > { %v7527_v36 = vpop.eup %6061 }
 0x80a   : > { %2295 = vadd.xlane.f32.xlu1 %v7511_v7  ;;  %v7531_v16 = vpop.eup %6063 }
 0x81b   : > { %2357 = vrot.lane.b32.xlu1 %v7014_v18, %s6413_s25 }
 0x81c   : > { %2355 = vrot.lane.b32.xlu0 %v7016_v58, %s6413_s25  ;;  %s8531_s25 = scalar_lea.vmem %s8421_s13, %s6610_s3  ;;  %s8532_s3 = sld [smem:[#allocation8_spill]] }
 0x81f   : > { %3369 = vrot.lane.b32.xlu1 %v6988_v57, %s6414_s16 }
 0x822   : > { %p5129_p1 = scmp.ne.s32.totalorder %s8532_s3, 1 }
 0x823   : > { %3371 = vrot.lane.b32.xlu1 %v7000_v59, %s6414_s16  ;;  %vm4713_vm11 = vcmask (!%p5129_p1), 253952   ;;  %vm6419_vm12 = vmmov (!%p5129_p1), 0   ;;  %s8535_s22 = sld [smem:[#allocation37_spill]] (!%p5129_p1)  ;;  %s8536_s20 = sld [smem:[#allocation38_spill]] (!%p5129_p1) }
 0x827   : > { %3373 = vrot.lane.b32.xlu1 %v6998_v8, %s6414_s16 }
 0x82b   : > { %3377 = vrot.lane.b32.xlu1 %v7006_v11, %s6414_s16 }
 0x82f   : > { %3381 = vrot.lane.b32.xlu1 %v7014_v18, %s6414_s16 }
 0x833   : > { %3353 = vrot.lane.b32.xlu1 %v6988_v57, %s6415_s30 }
 0x837   : > { %3357 = vrot.lane.b32.xlu1 %v6998_v8, %s6415_s30 }
 0x83b   : > { %3361 = vrot.lane.b32.xlu1 %v7006_v11, %s6415_s30  ;;  %2297 = vadd.xlane.f32.xlu0 %v7527_v36 }
 0x83f   : > { %3365 = vrot.lane.b32.xlu1 %v7014_v18, %s6415_s30  ;;  %2301 = vadd.xlane.f32.xlu0 %v7531_v16 }
 0x855   : > { %3367 = vrot.lane.b32.xlu0 %v6990_v23, %s6414_s16 }
 0x859   : > { %3375 = vrot.lane.b32.xlu0 %v7008_v46, %s6414_s16 }
 0x85d   : > { %3379 = vrot.lane.b32.xlu0 %v7016_v58, %s6414_s16 }
 0x861   : > { %3351 = vrot.lane.b32.xlu0 %v6990_v23, %s6415_s30 }
 0x863   : > { %2932 = vmax.xlane.f32.xlu1 %v7540_v4 }
 0x865   : > { %3355 = vrot.lane.b32.xlu0 %v7000_v59, %s6415_s30 }
 0x867   : > { %2940 = vmax.xlane.f32.xlu1 %v7547_v30 }
 0x869   : > { %3359 = vrot.lane.b32.xlu0 %v7008_v46, %s6415_s30 }
 0x86b   : > { %2944 = vmax.xlane.f32.xlu1 %v7552_v63 }
 0x86d   : > { %3363 = vrot.lane.b32.xlu0 %v7016_v58, %s6415_s30 }
 0x86f   : > { %2948 = vmax.xlane.f32.xlu1 %v7559_v48 }
 0x873   : > { %2952 = vmax.xlane.f32.xlu1 %v7564_v62 }
 0x877   : > { %2956 = vmax.xlane.f32.xlu1 %v7570_v24  ;;  %v2276_v52 = vpop.xlane.xlu0 %2275 }
 0x87b   : > { %2960 = vmax.xlane.f32.xlu1 %v7574_v41  ;;  %v2272_v37 = vpop.xlane.xlu1 %2271 }
 0x87c   : > { %6065 = vrcp.f32 %v2272_v37 }
 0x87f   : > { %v2278_v27 = vpop.xlane.xlu0 %2277 }
 0x883   : > { %v2284_v49 = vpop.xlane.xlu1 %2283  ;;  %v2274_v38 = vpop.xlane.xlu0 %2273 }
 0x884   : > { %6067 = vrcp.f32 %v2274_v38 }
 0x885   : > { %6069 = vrcp.f32 %v2278_v27 }
 0x886   : > { %v6066_v26 = vpop.eup %6065 }
 0x887   : > { %v2280_v6 = vpop.xlane.xlu1 %2279  ;;  %v2286_v44 = vpop.xlane.xlu0 %2285  ;;  %v2319_v38 = vmul.f32 %v6066_v26, %v7469_v60 }
 0x88b   : > { %v2292_v9 = vpop.xlane.xlu1 %2291  ;;  %v2282_v47 = vpop.xlane.xlu0 %2281 }
 0x88c   : > { %3084 = vrot.lane.b32.xlu1 %v6988_v57, %s6416_s1  ;;  %2930 = vmax.xlane.f32.xlu0 %v7580_v40  ;;  %6071 = vrcp.f32 %v2282_v47  ;;  %v2902_v47 = vmul.f32 0.35355338, %v7436_v1 }
 0x88d   : > { %6073 = vrcp.f32 %v2276_v52 }
 0x88e   : > { %v6068_v19 = vpop.eup %6067  ;;  %6075 = vrcp.f32 %v2280_v6  ;;  %v7605_v6 = vadd.f32 %v2902_v47, %v7068_v54 }
 0x88f   : > { %v2288_v51 = vpop.xlane.xlu1 %2287  ;;  %v2294_v37 = vpop.xlane.xlu0 %2293  ;;  %v2320_v27 = vmul.f32 %v6068_v19, %v7479_v32  ;;  %6077 = vrcp.f32 %v2286_v44  ;;  %v2904_v32 = vmul.f32 0.35355338, %v7434_v39  ;;  %v2906_v39 = vmul.f32 0.35355338, %v7444_v43 }
 0x890   : > { %3090 = vrot.lane.b32.xlu1 %v7008_v46, %s6416_s1  ;;  %2934 = vmax.xlane.f32.xlu0 %v7586_v28  ;;  %v6070_v60 = vpop.eup %6069 }
 0x891   : > { %v2335_v15 = vpack.c.bf16 %v2320_v27, %v2319_v38  ;;  %v2322_v38 = vmul.f32 %v6070_v60, %v7475_v42  ;;  %v7610_v27 = vadd.f32 %v2904_v32, %v7068_v54  ;;  %v2908_v42 = vmul.f32 0.35355338, %v7442_v35 }
 0x892   : > { %v7619_v60 = vadd.f32 %v2906_v39, %v7068_v54  ;;  %v2912_v39 = vmul.f32 0.35355338, %v7450_v53 }
 0x893   : > { %v7598_v10 = vpop.xlane.xlu1 %2299  ;;  %v2290_v52 = vpop.xlane.xlu0 %2289  ;;  %5486 = vmatprep.mubr.bf16.mxu1 %v2335_v15 }
 0x894   : > { %3092 = vrot.lane.b32.xlu1 %v7006_v11, %s6416_s1  ;;  %2936 = vmax.xlane.f32.xlu0 %v7595_v50  ;;  %6079 = vrcp.f32 %v2290_v52 }
 0x895   : > { %6081 = vrcp.f32 %v2284_v49 }
 0x896   : > { %v6072_v19 = vpop.eup %6071  ;;  %6083 = vrcp.f32 %v2288_v51 }
 0x897   : > { %v2296_v26 = vpop.xlane.xlu1 %2295  ;;  %v2356_v1 = vpop.permute.xlu0 %2355  ;;  %v2324_v49 = vmul.f32 %v6072_v19, %v7493_v12  ;;  %6085 = vrcp.f32 %v2294_v37  ;;  %v2910_v19 = vmul.f32 0.35355338, %v7452_v14 }
 0x898   : > { %5482 = vmatprep.subr.bf16.mxu1 %v2356_v1  ;;  %v6074_v20 = vpop.eup %6073  ;;  %2938 = vmax.xlane.f32.xlu0 %v7605_v6  ;;  %6087 = vrcp.f32 %v2292_v9 }
 0x899   : > { %5483 = vmatpush3.bf16.msra.mxu1 %v2356_v1  ;;  %v6076_v44 = vpop.eup %6075  ;;  %v2321_v47 = vmul.f32 %v6074_v20, %v7465_v2  ;;  %6089 = vrcp.f32 %v2296_v26 }
 0x89a   : > { %v2323_v51 = vmul.f32 %v6076_v44, %v7487_v3  ;;  %v6078_v1 = vpop.eup %6077  ;;  %v7624_v3 = vadd.f32 %v2908_v42, %v7068_v54 }
 0x89b   : > { %v2358_v15 = vpop.permute.xlu1 %2357  ;;  %v2336_v52 = vpack.c.bf16 %v2322_v38, %v2321_v47  ;;  %v2326_v37 = vmul.f32 %v6078_v1, %v7489_v45 }
 0x89c   : > { %5484 = vmatprep.subr.bf16.mxu1 %v2358_v15  ;;  %2942 = vmax.xlane.f32.xlu0 %v7610_v27  ;;  %v2337_v43 = vpack.c.bf16 %v2324_v49, %v2323_v51 }
 0x89d   : > { %5485 = vmatpush3.bf16.msra.mxu1 %v2358_v15  ;;  %v7633_v15 = vadd.f32 %v2910_v19, %v7068_v54 }
 0x89e   : > { %v6080_v32 = vpop.eup %6079 }
 0x89f   : > { %v6082_v12 = vpop.eup %6081  ;;  %v2328_v35 = vmul.f32 %v6080_v32, %v7505_v0 }
 0x8a0   : > { %5487 = vmatmul.mubr.bf16.vlgmr.msra.gmra.mrb[16].mxu1 %v2336_v52  ;;  %2946 = vmax.xlane.f32.xlu0 %v7619_v60  ;;  %v6084_v2 = vpop.eup %6083  ;;  %v2325_v20 = vmul.f32 %v6082_v12, %v7481_v34  ;;  %v7638_v34 = vadd.f32 %v2912_v39, %v7068_v54  ;;  %v3370_v52 = vpop.permute.xlu1 %3369  ;;  %v1496_v39 = vld [vmem:[%s6644_s2 + $0x4] sm:$0xf] }
 0x8a1   : > { %5490 = vmatprep.mubr.bf16.mxu1 %v2337_v43  ;;  %v2327_v9 = vmul.f32 %v6084_v2, %v7499_v55  ;;  %v6086_v38 = vpop.eup %6085  ;;  %5818 = vmatprep.subr.msk.bf16.mxu1 %vm2496_vm9, %v1496_v39 }
 0x8a2   : > { %v2338_v44 = vpack.c.bf16 %v2326_v37, %v2325_v20  ;;  %v6088_v49 = vpop.eup %6087  ;;  %v2330_v14 = vmul.f32 %v6086_v38, %v7501_v13 }
 0x8a3   : > { %v2339_v45 = vpack.c.bf16 %v2328_v35, %v2327_v9  ;;  %v2329_v55 = vmul.f32 %v6088_v49, %v7495_v5  ;;  %v6090_v47 = vpop.eup %6089  ;;  %v3411_v35 = vsel %vm1523_vm7, %v3370_v52, 0 }
 0x8a4   : > { %2950 = vmax.xlane.f32.xlu0 %v7624_v3  ;;  %v2331_v42 = vmul.f32 %v6090_v47, %v7511_v7  ;;  %v3372_v20 = vpop.permute.xlu1 %3371 }
 0x8a5   : > { %v2340_v0 = vpack.c.bf16 %v2330_v14, %v2329_v55  ;;  %v7670_v14 = vld [vmem:[%s6644_s2] sm:$0xf] }
 0x8a8   : > { %5491 = vmatmul.mubr.bf16.gmra.mrb[20].mxu1 %v2338_v44  ;;  %2954 = vmax.xlane.f32.xlu0 %v7633_v15  ;;  %v3374_v44 = vpop.permute.xlu1 %3373 }
 0x8a9   : > { %5494 = vmatprep.mubr.bf16.mxu1 %v2339_v45  ;;  %v2498_v45 = vsel %vm2496_vm9, %v1496_v39, 0 }
 0x8aa   : > { %5503 = vmatpush3.bf16.msra.mxu1 %v2498_v45 }
 0x8ab   : > { %5819 = vmatprep.subr.msk.bf16.mxu1 %vm2496_vm9, %v7670_v14 }
 0x8ac   : > { %2958 = vmax.xlane.f32.xlu0 %v7638_v34  ;;  %v3378_v38 = vpop.permute.xlu1 %3377 }
 0x8ad   : > { %v3423_v49 = vsel %vm1523_vm7, %v3378_v38, 0 }
 0x8b0   : > { %5495 = vmatmul.mubr.bf16.gmra.mrb[24].mxu1 %v2340_v0  ;;  %v3382_v55 = vpop.permute.xlu1 %3381 }
 0x8c2   : > { %3082 = vrot.lane.b32.xlu0 %v6990_v23, %s6416_s1 }
 0x8c6   : > { %3086 = vrot.lane.b32.xlu0 %v7000_v59, %s6416_s1 }
 0x8c8   : > { %v2298_v53 = vpop.xlane.xlu0 %2297 }
 0x8c9   : > { %6091 = vrcp.f32 %v2298_v53  ;;  %v3354_v53 = vpop.permute.xlu1 %3353 }
 0x8ca   : > { %6093 = vrcp.f32 %v7598_v10  ;;  %3088 = vrot.lane.b32.xlu0 %v6998_v8, %s6416_s1 }
 0x8cc   : > { %v2302_v13 = vpop.xlane.xlu0 %2301 }
 0x8cd   : > { %6095 = vrcp.f32 %v2302_v13  ;;  %v3358_v47 = vpop.permute.xlu1 %3357 }
 0x8d0   : > { %v3368_v5 = vpop.permute.xlu0 %3367 }
 0x8d1   : > { %5829 = vmatprep.subr.msk.bf16.mxu0 %vm1523_vm7, %v3368_v5  ;;  %v3408_v51 = vsel %vm1523_vm7, %v3368_v5, 0  ;;  %v3429_v5 = vsel %vm1523_vm7, %v3382_v55, 0 }
 0x8d2   : > { %5621 = vmatpush3.bf16.xpose.msra.mxu0 %v3408_v51 }
 0x8d3   : > { %v6092_v26 = vpop.eup %6091  ;;  %5830 = vmatprep.subr.msk.bf16.mxu0 %vm1523_vm7, %v3370_v52  ;;  %v3362_v52 = vpop.permute.xlu1 %3361 }
 0x8d4   : > { %v3376_v1 = vpop.permute.xlu0 %3375  ;;  %v2332_v10 = vmul.f32 %v6092_v26, %v7527_v36  ;;  %v6094_v43 = vpop.eup %6093  ;;  %v3414_v36 = vsel %vm1523_vm7, %v3372_v20, 0 }
 0x8d5   : > { %v2333_v37 = vmul.f32 %v6094_v43, %v7507_v61  ;;  %v3417_v61 = vsel %vm1523_vm7, %v3374_v44, 0 }
 0x8d6   : > { %v2341_v32 = vpack.c.bf16 %v2332_v10, %v2331_v42 }
 0x8d7   : > { %v6096_v12 = vpop.eup %6095 }
 0x8d8   : > { %5498 = vmatprep.mubr.bf16.mxu1 %v2341_v32  ;;  %v3380_v2 = vpop.permute.xlu0 %3379  ;;  %v2334_v19 = vmul.f32 %v6096_v12, %v7531_v16  ;;  %v3420_v16 = vsel %vm1523_vm7, %v3376_v1, 0 }
 0x8d9   : > { %v3426_v0 = vsel %vm1523_vm7, %v3380_v2, 0 }
 0x8da   : > { %5623 = vmatpush3.bf16.xpose.msra.mxu0 %v3411_v35  ;;  %v2342_v9 = vpack.c.bf16 %v2334_v19, %v2333_v37 }
 0x8db   : > { %5831 = vmatprep.subr.msk.bf16.mxu0 %vm1523_vm7, %v3372_v20 }
 0x8dc   : > { %5499 = vmatmul.mubr.bf16.gmra.mrb[28].mxu1 %v2342_v9  ;;  %v3352_v7 = vpop.permute.xlu0 %3351 }
 0x8dd   : > { %5636 = vmatprep.mubr.msk.bf16.mxu0 %vm1523_vm7, %v3352_v7 }
 0x8e0   : > { %v3356_v13 = vpop.permute.xlu0 %3355 }
 0x8e2   : > { %5625 = vmatpush3.bf16.xpose.msra.mxu0 %v3414_v36 }
 0x8e3   : > { %5832 = vmatprep.subr.msk.bf16.mxu0 %vm1523_vm7, %v3374_v44 }
 0x8e4   : > { %v3360_v51 = vpop.permute.xlu0 %3359 }
 0x8e8   : > { %v3364_v26 = vpop.permute.xlu0 %3363 }
 0x8ea   : > { %5627 = vmatpush3.bf16.xpose.msra.mxu0 %v3417_v61 }
 0x8eb   : > { %5833 = vmatprep.subr.msk.bf16.mxu0 %vm1523_vm7, %v3376_v1  ;;  %v3366_v1 = vpop.permute.xlu1 %3365 }
 0x8f0   : > { %v2933_v10 = vpop.xlane.xlu1 %2932 }
 0x8f1   : > { %v2963_v9 = vsub.f32 %v7540_v4, %v2933_v10 }
 0x8f2   : > { %5629 = vmatpush3.bf16.xpose.msra.mxu0 %v3420_v16 }
 0x8f3   : > { %5834 = vmatprep.subr.msk.bf16.mxu0 %vm1523_vm7, %v3378_v38 }
 0x8f4   : > { %v2941_v37 = vpop.xlane.xlu1 %2940 }
 0x8f8   : > { %v2945_v44 = vpop.xlane.xlu1 %2944 }
 0x8fa   : > { %5631 = vmatpush3.bf16.xpose.msra.mxu0 %v3423_v49 }
 0x8fb   : > { %5835 = vmatprep.subr.msk.bf16.mxu0 %vm1523_vm7, %v3380_v2 }
 0x902   : > { %5633 = vmatpush3.bf16.xpose.msra.mxu0 %v3426_v0 }
 0x903   : > { %5836 = vmatprep.subr.msk.bf16.mxu0 %vm1523_vm7, %v3382_v55  ;;  %v2969_v55 = vsub.f32 %v7552_v63, %v2945_v44 }
 0x90a   : > { %5635 = vmatpush3.bf16.xpose.msra.mxu0 %v3429_v5 }
 0x911   : > { %5637 = vmatmul.mubr.msk.bf16.vlgmr.msra.gmra.mrb[64].mxu0 %vm1523_vm7, %v3354_v53 }
 0x912   : > { %5640 = vmatprep.mubr.msk.bf16.mxu0 %vm1523_vm7, %v3356_v13  ;;  %v2992_v13 = vmul.f32 1.442695, %v2969_v55 }
 0x919   : > { %5641 = vmatmul.mubr.msk.bf16.gmra.mrb[68].mxu0 %vm1523_vm7, %v3358_v47  ;;  %v2931_v42 = vpop.xlane.xlu0 %2930 }
 0x91a   : > { %5644 = vmatprep.mubr.msk.bf16.mxu0 %vm1523_vm7, %v3360_v51  ;;  %v2962_v32 = vsub.f32 %v7580_v40, %v2931_v42  ;;  %v2980_v40 = vmul.f32 1.442695, %v2963_v9 }
 0x91c   : > { %v2978_v19 = vmul.f32 1.442695, %v2962_v32 }
 0x91d   : > { %v2935_v43 = vpop.xlane.xlu0 %2934 }
 0x91e   : > { %v2964_v12 = vsub.f32 %v7586_v28, %v2935_v43  ;;  %v2967_v28 = vsub.f32 %v7547_v30, %v2941_v37 }
 0x920   : > { %v2982_v2 = vmul.f32 1.442695, %v2964_v12  ;;  %v2988_v4 = vmul.f32 1.442695, %v2967_v28 }
 0x921   : > { %5645 = vmatmul.mubr.msk.bf16.gmra.mrb[72].mxu0 %vm1523_vm7, %v3362_v52  ;;  %v2937_v35 = vpop.xlane.xlu0 %2936 }
 0x922   : > { %6097 = vpow2.f32 %v2982_v2  ;;  %5648 = vmatprep.mubr.msk.bf16.mxu0 %vm1523_vm7, %v3364_v26  ;;  %v2965_v20 = vsub.f32 %v7595_v50, %v2937_v35  ;;  %v2949_v50 = vpop.xlane.xlu1 %2948 }
 0x923   : > { %6099 = vpow2.f32 %v2978_v19  ;;  %v2971_v42 = vsub.f32 %v7559_v48, %v2949_v50 }
 0x924   : > { %v2984_v7 = vmul.f32 1.442695, %v2965_v20 }
 0x925   : > { %v2939_v36 = vpop.xlane.xlu0 %2938  ;;  %v2996_v37 = vmul.f32 1.442695, %v2971_v42 }
 0x926   : > { %6101 = vpow2.f32 %v2984_v7  ;;  %v2966_v16 = vsub.f32 %v7605_v6, %v2939_v36  ;;  %v2953_v5 = vpop.xlane.xlu1 %2952 }
 0x927   : > { %6103 = vpow2.f32 %v2980_v40  ;;  %v2973_v63 = vsub.f32 %v7564_v62, %v2953_v5 }
 0x928   : > { %v2986_v0 = vmul.f32 1.442695, %v2966_v16 }
 0x929   : > { %5649 = vmatmul.mubr.msk.bf16.gmra.mrb[76].mxu0 %vm1523_vm7, %v3366_v1  ;;  %v2943_v61 = vpop.xlane.xlu0 %2942  ;;  %v3000_v10 = vmul.f32 1.442695, %v2973_v63 }
 0x92a   : > { %v2968_v38 = vsub.f32 %v7610_v27, %v2943_v61  ;;  %v2957_v36 = vpop.xlane.xlu1 %2956 }
 0x92b   : > { %v2975_v44 = vsub.f32 %v7570_v24, %v2957_v36 }
 0x92c   : > { %v7692_v39 = vpop.eup %6097  ;;  %v2990_v45 = vmul.f32 1.442695, %v2968_v38 }
 0x92d   : > { %3014 = vadd.xlane.f32.xlu1 %v7692_v39  ;;  %v2947_v49 = vpop.xlane.xlu0 %2946  ;;  %v7697_v53 = vpop.eup %6099  ;;  %v3004_v61 = vmul.f32 1.442695, %v2975_v44 }
 0x92e   : > { %6105 = vpow2.f32 %v2990_v45  ;;  %v2970_v30 = vsub.f32 %v7619_v60, %v2947_v49  ;;  %v2961_v40 = vpop.xlane.xlu1 %2960 }
 0x92f   : > { %6107 = vpow2.f32 %v2988_v4  ;;  %v2977_v16 = vsub.f32 %v7574_v41, %v2961_v40 }
 0x930   : > { %v2994_v6 = vmul.f32 1.442695, %v2970_v30  ;;  %6109 = vpow2.f32 %v2986_v0  ;;  %v7701_v51 = vpop.eup %6101  ;;  %v2622_v0 = vsel %vm2496_vm9, %v7670_v14, 0 }
 0x931   : > { %3010 = vadd.xlane.f32.xlu1 %v7697_v53  ;;  %v2951_v27 = vpop.xlane.xlu0 %2950  ;;  %v7705_v26 = vpop.eup %6103  ;;  %v3008_v55 = vmul.f32 1.442695, %v2977_v16 }
 0x932   : > { %v2972_v47 = vsub.f32 %v7624_v3, %v2951_v27  ;;  %6111 = vpow2.f32 %v2994_v6 }
 0x933   : > { %6113 = vpow2.f32 %v2992_v13 }
 0x934   : > { %v2998_v52 = vmul.f32 1.442695, %v2972_v47 }
 0x935   : > { %3016 = vadd.xlane.f32.xlu1 %v7701_v51  ;;  %v2955_v60 = vpop.xlane.xlu0 %2954 }
 0x936   : > { %6115 = vpow2.f32 %v2998_v52  ;;  %v2974_v43 = vsub.f32 %v7633_v15, %v2955_v60 }
 0x937   : > { %6117 = vpow2.f32 %v3000_v10 }
 0x938   : > { %v7707_v1 = vpop.eup %6105  ;;  %v3002_v48 = vmul.f32 1.442695, %v2974_v43  ;;  %v3085_v43 = vpop.permute.xlu1 %3084 }
 0x939   : > { %3012 = vadd.xlane.f32.xlu1 %v7705_v26  ;;  %3022 = vadd.xlane.f32.xlu0 %v7707_v1  ;;  %v2959_v3 = vpop.xlane.xlu0 %2958  ;;  %v7714_v32 = vpop.eup %6107 }
 0x93a   : > { %v2976_v62 = vsub.f32 %v7638_v34, %v2959_v3  ;;  %v7716_v12 = vpop.eup %6109 }
 0x93c   : > { %v3006_v2 = vmul.f32 1.442695, %v2976_v62  ;;  %v7720_v19 = vpop.eup %6111 }
 0x93d   : > { %3020 = vadd.xlane.f32.xlu1 %v7714_v32  ;;  %3018 = vadd.xlane.f32.xlu0 %v7716_v12  ;;  %v7722_v35 = vpop.eup %6113  ;;  %v3083_v24 = vpop.permute.xlu0 %3082 }
 0x93e   : > { %6119 = vpow2.f32 %v3006_v2  ;;  %v3091_v2 = vpop.permute.xlu1 %3090 }
 0x93f   : > { %6121 = vpow2.f32 %v2996_v37 }
 0x940   : > { %6123 = vpow2.f32 %v3002_v48  ;;  %v7726_v15 = vpop.eup %6115 }
 0x941   : > { %3026 = vadd.xlane.f32.xlu1 %v7720_v19  ;;  %3024 = vadd.xlane.f32.xlu0 %v7722_v35  ;;  %v7729_v34 = vpop.eup %6117  ;;  %6125 = vpow2.f32 %v3004_v61  ;;  %v8512_v61 = vpack.c.bf16 %v7318_v29, %v7312_v22  ;;  %v8515_v22 = vpack.c.bf16 %v7326_v33, %v7322_v31  ;;  %v8516_v29 = vld [vmem:[#allocation23_spill] sm:$0xff] }
 0x942   : > { %6127 = vpow2.f32 %v3008_v55 }
 0x945   : > { %3030 = vadd.xlane.f32.xlu0 %v7726_v15 }
 0x948   : > { %v7731_v20 = vpop.eup %6119 }
 0x949   : > { %3032 = vadd.xlane.f32.xlu0 %v7729_v34  ;;  %3038 = vadd.xlane.f32.xlu1 %v7731_v20  ;;  %v7735_v9 = vpop.eup %6121 }
 0x94a   : > { %v7737_v7 = vpop.eup %6123 }
 0x94b   : > { %v7752_v47 = vpop.eup %6125 }
 0x94c   : > { %v7756_v52 = vpop.eup %6127 }
 0x94d   : > { %3028 = vadd.xlane.f32.xlu0 %v7735_v9  ;;  %3034 = vadd.xlane.f32.xlu1 %v7737_v7 }
 0x95e   : > { %3096 = vrot.lane.b32.xlu1 %v7014_v18, %s6416_s1 }
 0x963   : > { %3094 = vrot.lane.b32.xlu0 %v7016_v58, %s6416_s1  ;;  %s8533_s1 = sld [smem:[#allocation39_spill]] (!%p5129_p1) }
 0x973   : > { %v5488_v28 = vpop.f32.mrb[16].mxu1 }
 0x974   : > { %v2401_v38 = vpop.f32.mrb[17].mxu1 }
 0x975   : > { %v5489_v50 = vpop.f32.mrb[18].mxu1 }
 0x976   : > { %v2465_v45 = vpack.c.bf16 %v5489_v50, %v5488_v28  ;;  %v2404_v4 = vpop.f32.mrb[19].mxu1  ;;  %v3093_v28 = vpop.permute.xlu1 %3092  ;;  %v8513_v50 = vpack.c.bf16 %v7314_v25, %v7310_v21 }
 0x977   : > { %v2464_v49 = vpack.c.bf16 %v2404_v4, %v2401_v38  ;;  %v3087_v38 = vpop.permute.xlu0 %3086  ;;  %v8514_v4 = vpack.c.bf16 %v7330_v17, %v7324_v56 }
 0x979   : > { %5504 = vmatprep.mubr.msk.bf16.mxu1 %vm1523_vm7, %v2464_v49 }
 0x97a   : > { %5505 = vmatmul.mubr.msk.bf16.vlgmr.msra.gmra.mrb[32].mxu1 %vm1523_vm7, %v2465_v45 }
 0x97b   : > { %5521 = vmatpush3.bf16.msra.mxu1 %v2622_v0  ;;  %v5492_v30 = vpop.f32.mrb[20].mxu1  ;;  %v3089_v55 = vpop.permute.xlu0 %3088  ;;  %v8517_v0 = vld [vmem:[#allocation21_spill] sm:$0xff] }
 0x97c   : > { %5570 = vmatprep.subr.bf16.mxu1 %v3083_v24  ;;  %v2417_v41 = vpop.f32.mrb[21].mxu1  ;;  %v8518_v56 = vpack.c.bf16 %v8516_v29, %v8517_v0 }
 0x97d   : > { %v5493_v6 = vpop.f32.mrb[22].mxu1 }
 0x97e   : > { %v2467_v27 = vpack.c.bf16 %v5493_v6, %v5492_v30  ;;  %v2420_v13 = vpop.f32.mrb[23].mxu1  ;;  %v8519_v30 = vld [vmem:[#allocation22_spill] sm:$0xff] }
 0x97f   : > { %v2466_v5 = vpack.c.bf16 %v2420_v13, %v2417_v41  ;;  %v8520_v41 = vld [vmem:[#allocation20_spill] sm:$0xff]  ;;  %v8523_v13 = vld [vmem:[#allocation25_spill] sm:$0xff] }
 0x980   : > { %v8521_v6 = vpack.c.bf16 %v8519_v30, %v8520_v41 }
 0x981   : > { %5508 = vmatprep.mubr.msk.bf16.mxu1 %vm1523_vm7, %v2466_v5 }
 0x982   : > { %5509 = vmatmul.mubr.msk.bf16.gmra.mrb[36].mxu1 %vm1523_vm7, %v2467_v27  ;;  %3036 = vadd.xlane.f32.xlu0 %v7752_v47  ;;  %v8522_v27 = vld [vmem:[#allocation27_spill] sm:$0xff] }
 0x983   : > { %v5496_v14 = vpop.f32.mrb[24].mxu1  ;;  %v8524_v5 = vpack.c.bf16 %v8522_v27, %v8523_v13 }
 0x984   : > { %v2433_v63 = vpop.f32.mrb[25].mxu1 }
 0x985   : > { %v5497_v60 = vpop.f32.mrb[26].mxu1 }
 0x986   : > { %v2469_v42 = vpack.c.bf16 %v5497_v60, %v5496_v14  ;;  %v2436_v10 = vpop.f32.mrb[27].mxu1  ;;  %3040 = vadd.xlane.f32.xlu0 %v7756_v52 }
 0x987   : > { %v2468_v3 = vpack.c.bf16 %v2436_v10, %v2433_v63 }
 0x989   : > { %5512 = vmatprep.mubr.msk.bf16.mxu1 %vm1523_vm7, %v2468_v3 }
 0x98a   : > { %5513 = vmatmul.mubr.msk.bf16.gmra.mrb[40].mxu1 %vm1523_vm7, %v2469_v42 }
 0x9af   : > { %v5500_v62 = vpop.f32.mrb[28].mxu1 }
 0x9b0   : > { %v2449_v37 = vpop.f32.mrb[29].mxu1 }
 0x9b1   : > { %v5501_v48 = vpop.f32.mrb[30].mxu1 }
 0x9b2   : > { %v2471_v36 = vpack.c.bf16 %v5501_v48, %v5500_v62  ;;  %v2452_v44 = vpop.f32.mrb[31].mxu1  ;;  %v8526_v62 = vld [vmem:[#allocation24_spill] sm:$0xff] }
 0x9b3   : > { %v2470_v40 = vpack.c.bf16 %v2452_v44, %v2449_v37 }
 0x9b5   : > { %5516 = vmatprep.mubr.msk.bf16.mxu1 %vm1523_vm7, %v2470_v40 }
 0x9b6   : > { %5517 = vmatmul.mubr.msk.bf16.gmra.mrb[44].mxu1 %vm1523_vm7, %v2471_v36 }
 0x9b7   : > { %5522 = vmatprep.mubr.msk.bf16.mxu1 %vm1523_vm7, %v8512_v61 }
 0x9ba   : > { %v3015_v16 = vpop.xlane.xlu1 %3014 }
 0x9be   : > { %5523 = vmatmul.mubr.msk.bf16.vlgmr.msra.gmra.mrb[32].mxu1 %vm1523_vm7, %v8513_v50  ;;  %v3011_v45 = vpop.xlane.xlu1 %3010 }
 0x9bf   : > { %5571 = vmatpush3.bf16.msra.mxu1 %v3083_v24  ;;  %5526 = vmatprep.mubr.msk.bf16.mxu1 %vm1523_vm7, %v8514_v4  ;;  %6129 = vrcp.f32 %v3011_v45 }
 0x9c0   : > { %5572 = vmatprep.subr.bf16.mxu1 %v3085_v43 }
 0x9c2   : > { %v3017_v49 = vpop.xlane.xlu1 %3016 }
 0x9c3   : > { %5573 = vmatpush3.bf16.msra.mxu1 %v3085_v43  ;;  %v8525_v43 = vld [vmem:[#allocation26_spill] sm:$0xff] }
 0x9c4   : > { %5574 = vmatprep.subr.bf16.mxu1 %v3087_v38 }
 0x9c6   : > { %5527 = vmatmul.mubr.msk.bf16.gmra.mrb[36].mxu1 %vm1523_vm7, %v8515_v22  ;;  %v3013_v21 = vpop.xlane.xlu1 %3012  ;;  %v3023_v25 = vpop.xlane.xlu0 %3022 }
 0x9c7   : > { %6131 = vrcp.f32 %v3013_v21  ;;  %5575 = vmatpush3.bf16.msra.mxu1 %v3087_v38  ;;  %5530 = vmatprep.mubr.msk.bf16.mxu1 %vm1523_vm7, %v8518_v56 }
 0x9c8   : > { %5576 = vmatprep.subr.bf16.mxu1 %v3089_v55  ;;  %6133 = vrcp.f32 %v3017_v49 }
 0x9c9   : > { %v6130_v31 = vpop.eup %6129 }
 0x9ca   : > { %v3019_v17 = vpop.xlane.xlu0 %3018  ;;  %v3021_v24 = vpop.xlane.xlu1 %3020  ;;  %v3058_v63 = vmul.f32 %v6130_v31, %v7697_v53 }
 0x9cb   : > { %5577 = vmatpush3.bf16.msra.mxu1 %v3089_v55  ;;  %6135 = vrcp.f32 %v3021_v24 }
 0x9cc   : > { %5578 = vmatprep.subr.bf16.mxu1 %v3091_v2  ;;  %6137 = vrcp.f32 %v3019_v17 }
 0x9cd   : > { %6139 = vrcp.f32 %v3015_v16 }
 0x9ce   : > { %5531 = vmatmul.mubr.msk.bf16.gmra.mrb[40].mxu1 %vm1523_vm7, %v8521_v6  ;;  %v3025_v33 = vpop.xlane.xlu0 %3024  ;;  %v3027_v42 = vpop.xlane.xlu1 %3026 }
 0x9cf   : > { %5579 = vmatpush3.bf16.msra.mxu1 %v3091_v2  ;;  %5534 = vmatprep.mubr.msk.bf16.mxu1 %vm1523_vm7, %v8524_v5  ;;  %v8527_v2 = vpack.c.bf16 %v8525_v43, %v8526_v62  ;;  %6141 = vrcp.f32 %v3025_v33 }
 0x9d0   : > { %5580 = vmatprep.subr.bf16.mxu1 %v3093_v28 }
 0x9d1   : > { %v6132_v14 = vpop.eup %6131 }
 0x9d2   : > { %v3059_v60 = vmul.f32 %v6132_v14, %v7705_v26  ;;  %v3031_v10 = vpop.xlane.xlu0 %3030  ;;  %v6134_v36 = vpop.eup %6133 }
 0x9d3   : > { %5581 = vmatpush3.bf16.msra.mxu1 %v3093_v28  ;;  %v3061_v16 = vmul.f32 %v6134_v36, %v7701_v51 }
 0x9d4   : > { %v3074_v3 = vpack.c.bf16 %v3059_v60, %v3058_v63 }
 0x9d5   : > { %v6136_v44 = vpop.eup %6135 }
 0x9d6   : > { %5535 = vmatmul.mubr.msk.bf16.gmra.mrb[44].mxu1 %vm1523_vm7, %v8527_v2  ;;  %v7797_v37 = vpop.xlane.xlu1 %3038  ;;  %v3033_v48 = vpop.xlane.xlu0 %3032  ;;  %v3063_v45 = vmul.f32 %v6136_v44, %v7714_v32 }
 0x9d7   : > { %5586 = vmatprep.mubr.bf16.mxu1 %v3074_v3  ;;  %v6138_v28 = vpop.eup %6137 }
 0x9d8   : > { %v6140_v61 = vpop.eup %6139  ;;  %v3062_v50 = vmul.f32 %v6138_v28, %v7716_v12 }
 0x9d9   : > { %v3060_v4 = vmul.f32 %v6140_v61, %v7692_v39  ;;  %v6142_v29 = vpop.eup %6141 }
 0x9da   : > { %v7799_v53 = vpop.xlane.xlu1 %3034  ;;  %v3029_v26 = vpop.xlane.xlu0 %3028  ;;  %v3076_v56 = vpack.c.bf16 %v3063_v45, %v3062_v50  ;;  %v3065_v24 = vmul.f32 %v6142_v29, %v7722_v35 }
 0x9db   : > { %6143 = vrcp.f32 %v3029_v26 }
 0x9dc   : > { %6145 = vrcp.f32 %v3023_v25  ;;  %v3075_v25 = vpack.c.bf16 %v3061_v16, %v3060_v4 }
 0x9dd   : > { %6147 = vrcp.f32 %v3027_v42 }
 0x9de   : > { %v3095_v40 = vpop.permute.xlu0 %3094  ;;  %v3097_v38 = vpop.permute.xlu1 %3096  ;;  %6149 = vrcp.f32 %v3033_v48 }
 0x9df   : > { %5582 = vmatprep.subr.bf16.mxu1 %v3095_v40  ;;  %6151 = vrcp.f32 %v3031_v10 }
 0x9e0   : > { %5583 = vmatpush3.bf16.msra.mxu1 %v3095_v40  ;;  %6153 = vrcp.f32 %v7799_v53 }
 0x9e1   : > { %5584 = vmatprep.subr.bf16.mxu1 %v3097_v38 }
 0x9e4   : > { %v5638_v49 = vpop.f32.mrb[64].mxu0  ;;  %5585 = vmatpush3.bf16.msra.mxu1 %v3097_v38 }
 0x9e5   : > { %v3465_v55 = vpop.f32.mrb[65].mxu0  ;;  %v6144_v17 = vpop.eup %6143  ;;  %v3530_v41 = vmul.f32 0.35355338, %v5638_v49 }
 0x9e6   : > { %v3528_v22 = vmul.f32 0.35355338, %v3465_v55  ;;  %v5639_v21 = vpop.f32.mrb[66].mxu0  ;;  %v6146_v32 = vpop.eup %6145  ;;  %v3067_v30 = vmul.f32 %v6144_v17, %v7735_v9 }
 0x9e7   : > { %v3468_v0 = vpop.f32.mrb[67].mxu0  ;;  %5587 = vmatmul.mubr.bf16.vlgmr.msra.gmra.mrb[48].mxu1 %v3075_v25  ;;  %v6148_v39 = vpop.eup %6147  ;;  %v3064_v33 = vmul.f32 %v6146_v32, %v7707_v1  ;;  %v7818_v9 = vadd.f32 %v3530_v41, %v7068_v54  ;;  %v3531_v10 = vmul.f32 0.35355338, %v5639_v21 }
 0x9e8   : > { %v7806_v51 = vadd.f32 %v3528_v22, %v7068_v54  ;;  %v3529_v12 = vmul.f32 0.35355338, %v3468_v0  ;;  %5590 = vmatprep.mubr.bf16.mxu1 %v3076_v56  ;;  %v3066_v13 = vmul.f32 %v6148_v39, %v7720_v19  ;;  %v6150_v60 = vpop.eup %6149 }
 0x9e9   : > { %v3077_v63 = vpack.c.bf16 %v3065_v24, %v3064_v33  ;;  %v6152_v1 = vpop.eup %6151  ;;  %v3069_v19 = vmul.f32 %v6150_v60, %v7729_v34  ;;  %v7827_v43 = vadd.f32 %v3531_v10, %v7068_v54  ;;  %v1497_v24 = vld [vmem:[%s6644_s2 + $0x8] sm:$0xf] }
 0x9ea   : > { %3560 = vmax.xlane.f32.xlu0 %v7806_v51  ;;  %v7812_v6 = vadd.f32 %v3529_v12, %v7068_v54  ;;  %v3078_v35 = vpack.c.bf16 %v3067_v30, %v3066_v13  ;;  %v3068_v48 = vmul.f32 %v6152_v1, %v7726_v15  ;;  %5828 = vmatprep.subr.msk.bf16.mxu1 %vm2496_vm9, %v1497_v24  ;;  %v3236_v30 = vsel %vm2496_vm9, %v1497_v24, 0 }
 0x9eb   : > { %5603 = vmatpush3.bf16.msra.mxu1 %v3236_v30 }
 0x9ec   : > { %v5642_v31 = vpop.f32.mrb[68].mxu0  ;;  %v3079_v44 = vpack.c.bf16 %v3069_v19, %v3068_v48 }
 0x9ed   : > { %v3481_v27 = vpop.f32.mrb[69].mxu0  ;;  %v3534_v28 = vmul.f32 0.35355338, %v5642_v31 }
 0x9ee   : > { %v3532_v5 = vmul.f32 0.35355338, %v3481_v27  ;;  %v5643_v14 = vpop.f32.mrb[70].mxu0  ;;  %3562 = vmax.xlane.f32.xlu0 %v7812_v6 }
 0x9ef   : > { %v3484_v42 = vpop.f32.mrb[71].mxu0  ;;  %5591 = vmatmul.mubr.bf16.gmra.mrb[52].mxu1 %v3077_v63  ;;  %v7836_v34 = vadd.f32 %v3534_v28, %v7068_v54  ;;  %v3535_v38 = vmul.f32 0.35355338, %v5643_v14 }
 0x9f0   : > { %v7821_v3 = vadd.f32 %v3532_v5, %v7068_v54  ;;  %5594 = vmatprep.mubr.bf16.mxu1 %v3078_v35  ;;  %v3533_v62 = vmul.f32 0.35355338, %v3484_v42 }
 0x9f1   : > { %v7843_v55 = vadd.f32 %v3535_v38, %v7068_v54 }
 0x9f2   : > { %3564 = vmax.xlane.f32.xlu0 %v7818_v9  ;;  %3568 = vmax.xlane.f32.xlu1 %v7821_v3  ;;  %v7832_v61 = vadd.f32 %v3533_v62, %v7068_v54 }
 0x9f4   : > { %v5646_v2 = vpop.f32.mrb[72].mxu0 }
 0x9f5   : > { %v3497_v26 = vpop.f32.mrb[73].mxu0  ;;  %v3538_v29 = vmul.f32 0.35355338, %v5646_v2 }
 0x9f6   : > { %v5647_v36 = vpop.f32.mrb[74].mxu0  ;;  %3566 = vmax.xlane.f32.xlu0 %v7827_v43  ;;  %v3536_v22 = vmul.f32 0.35355338, %v3497_v26 }
 0x9f7   : > { %v3500_v40 = vpop.f32.mrb[75].mxu0  ;;  %5595 = vmatmul.mubr.bf16.gmra.mrb[56].mxu1 %v3079_v44  ;;  %v7856_v56 = vadd.f32 %v3538_v29, %v7068_v54  ;;  %v3539_v17 = vmul.f32 0.35355338, %v5647_v36 }
 0x9f8   : > { %v7848_v21 = vadd.f32 %v3536_v22, %v7068_v54  ;;  %v3537_v25 = vmul.f32 0.35355338, %v3500_v40 }
 0x9f9   : > { %v7861_v12 = vadd.f32 %v3539_v17, %v7068_v54 }
 0x9fa   : > { %3570 = vmax.xlane.f32.xlu0 %v7832_v61  ;;  %v7852_v0 = vadd.f32 %v3537_v25, %v7068_v54 }
 0x9fc   : > { %v5650_v16 = vpop.f32.mrb[76].mxu0 }
 0x9fd   : > { %v3542_v50 = vmul.f32 0.35355338, %v5650_v16  ;;  %v3513_v15 = vpop.f32.mrb[77].mxu0 }
 0x9fe   : > { %v5651_v45 = vpop.f32.mrb[78].mxu0  ;;  %3572 = vmax.xlane.f32.xlu0 %v7836_v34  ;;  %v3540_v32 = vmul.f32 0.35355338, %v3513_v15 }
 0x9ff   : > { %v7840_v4 = vadd.f32 %v3542_v50, %v7068_v54  ;;  %v3516_v49 = vpop.f32.mrb[79].mxu0 }
 0xa00   : > { %v7871_v53 = vadd.f32 %v3540_v32, %v7068_v54  ;;  %v3541_v41 = vmul.f32 0.35355338, %v3516_v49 }
 0xa01   : > { %3588 = vmax.xlane.f32.xlu1 %v7840_v4 }
 0xa02   : > { %3574 = vmax.xlane.f32.xlu0 %v7843_v55  ;;  %v7877_v33 = vadd.f32 %v3541_v41, %v7068_v54 }
 0xa06   : > { %3576 = vmax.xlane.f32.xlu0 %v7848_v21 }
 0xa0a   : > { %3578 = vmax.xlane.f32.xlu0 %v7852_v0 }
 0xa0e   : > { %3580 = vmax.xlane.f32.xlu0 %v7856_v56 }
 0xa0f   : > { %v3037_v39 = vpop.xlane.xlu0 %3036 }
 0xa10   : > { %6155 = vrcp.f32 %v3037_v39 }
 0xa11   : > { %6157 = vrcp.f32 %v7797_v37  ;;  %v6154_v37 = vpop.eup %6153 }
 0xa12   : > { %3582 = vmax.xlane.f32.xlu0 %v7861_v12  ;;  %3712 = vrot.lane.b32.xlu1 %v6990_v23, %s6417_s21  ;;  %v3543_v23 = vmul.f32 0.35355338, %v5651_v45  ;;  %v3070_v5 = vmul.f32 %v6154_v37, %v7737_v7 }
 0xa13   : > { %v3041_v31 = vpop.xlane.xlu0 %3040 }
 0xa14   : > { %6159 = vrcp.f32 %v3041_v31  ;;  %v7883_v13 = vadd.f32 %v3543_v23, %v7068_v54 }
 0xa16   : > { %3584 = vmax.xlane.f32.xlu0 %v7871_v53  ;;  %3714 = vrot.lane.b32.xlu1 %v6988_v57, %s6417_s21 }
 0xa1a   : > { %3586 = vmax.xlane.f32.xlu0 %v7877_v33  ;;  %3718 = vrot.lane.b32.xlu1 %v6998_v8, %s6417_s21  ;;  %v6156_v27 = vpop.eup %6155 }
 0xa1b   : > { %v3071_v14 = vmul.f32 %v6156_v27, %v7752_v47  ;;  %v6158_v63 = vpop.eup %6157 }
 0xa1c   : > { %v3072_v42 = vmul.f32 %v6158_v63, %v7731_v20 }
 0xa1d   : > { %v3080_v57 = vpack.c.bf16 %v3071_v14, %v3070_v5 }
 0xa1e   : > { %3590 = vmax.xlane.f32.xlu0 %v7883_v13  ;;  %3724 = vrot.lane.b32.xlu1 %v7016_v58, %s6417_s21  ;;  %v6160_v60 = vpop.eup %6159 }
 0xa1f   : > { %5598 = vmatprep.mubr.bf16.mxu1 %v3080_v57  ;;  %v3073_v8 = vmul.f32 %v6160_v60, %v7756_v52 }
 0xa21   : > { %v3081_v35 = vpack.c.bf16 %v3073_v8, %v3072_v42 }
 0xa23   : > { %5599 = vmatmul.mubr.bf16.gmra.mrb[60].mxu1 %v3081_v35 }
 0xa34   : > { %3716 = vrot.lane.b32.xlu0 %v7000_v59, %s6417_s21 }
 0xa38   : > { %3720 = vrot.lane.b32.xlu0 %v7008_v46, %s6417_s21 }
 0xa3c   : > { %3722 = vrot.lane.b32.xlu0 %v7006_v11, %s6417_s21 }
 0xa77   : > { %v3561_v54 = vpop.xlane.xlu0 %3560 }
 0xa78   : > { %v3592_v20 = vsub.f32 %v7806_v51, %v3561_v54 }
 0xa7a   : > { %v3608_v1 = vmul.f32 1.442695, %v3592_v20 }
 0xa7b   : > { %v3563_v58 = vpop.xlane.xlu0 %3562 }
 0xa7c   : > { %v3593_v46 = vsub.f32 %v7812_v6, %v3563_v58 }
 0xa7f   : > { %v3565_v7 = vpop.xlane.xlu0 %3564  ;;  %v3569_v62 = vpop.xlane.xlu1 %3568 }
 0xa80   : > { %v3594_v47 = vsub.f32 %v7818_v9, %v3565_v7  ;;  %v3596_v48 = vsub.f32 %v7821_v3, %v3569_v62  ;;  %v3610_v9 = vmul.f32 1.442695, %v3593_v46 }
 0xa82   : > { %v3612_v10 = vmul.f32 1.442695, %v3594_v47  ;;  %v3616_v28 = vmul.f32 1.442695, %v3596_v48 }
 0xa83   : > { %v3567_v52 = vpop.xlane.xlu0 %3566 }
 0xa84   : > { %6161 = vpow2.f32 %v3612_v10  ;;  %v3595_v19 = vsub.f32 %v7827_v43, %v3567_v52 }
 0xa85   : > { %6163 = vpow2.f32 %v3608_v1 }
 0xa86   : > { %v3614_v2 = vmul.f32 1.442695, %v3595_v19 }
 0xa87   : > { %v3571_v59 = vpop.xlane.xlu0 %3570 }
 0xa88   : > { %6165 = vpow2.f32 %v3614_v2  ;;  %v3597_v51 = vsub.f32 %v7832_v61, %v3571_v59 }
 0xa8a   : > { %v3618_v38 = vmul.f32 1.442695, %v3597_v51 }
 0xa8b   : > { %v3573_v11 = vpop.xlane.xlu0 %3572 }
 0xa8c   : > { %v3598_v26 = vsub.f32 %v7836_v34, %v3573_v11 }
 0xa8e   : > { %v3620_v36 = vmul.f32 1.442695, %v3598_v26  ;;  %v3589_v44 = vpop.xlane.xlu1 %3588  ;;  %v7905_v40 = vpop.eup %6161 }
 0xa8f   : > { %v3575_v43 = vpop.xlane.xlu0 %3574  ;;  %3644 = vadd.xlane.f32.xlu0 %v7905_v40  ;;  %v7911_v34 = vpop.eup %6163  ;;  %v3606_v15 = vsub.f32 %v7840_v4, %v3589_v44 }
 0xa90   : > { %6167 = vpow2.f32 %v3620_v36  ;;  %v3599_v6 = vsub.f32 %v7843_v55, %v3575_v43 }
 0xa91   : > { %6169 = vpow2.f32 %v3610_v9  ;;  %v3636_v29 = vmul.f32 1.442695, %v3606_v15 }
 0xa92   : > { %v7909_v3 = vpop.permute.xlu1 %3712  ;;  %6171 = vpow2.f32 %v3616_v28  ;;  %v3622_v16 = vmul.f32 1.442695, %v3599_v6  ;;  %v7915_v50 = vpop.eup %6165 }
 0xa93   : > { %5652 = vmatprep.subr.bf16.mxu1 %v7909_v3  ;;  %v3577_v61 = vpop.xlane.xlu0 %3576  ;;  %3640 = vadd.xlane.f32.xlu0 %v7911_v34  ;;  %6173 = vpow2.f32 %v3618_v38 }
 0xa94   : > { %6175 = vpow2.f32 %v3622_v16  ;;  %v3600_v32 = vsub.f32 %v7848_v21, %v3577_v61 }
 0xa96   : > { %v3624_v41 = vmul.f32 1.442695, %v3600_v32  ;;  %v3715_v19 = vpop.permute.xlu1 %3714 }
 0xa97   : > { %v3579_v45 = vpop.xlane.xlu0 %3578  ;;  %3646 = vadd.xlane.f32.xlu0 %v7915_v50 }
 0xa98   : > { %v3601_v49 = vsub.f32 %v7852_v0, %v3579_v45 }
 0xa9a   : > { %v7920_v55 = vpop.eup %6167  ;;  %v3626_v22 = vmul.f32 1.442695, %v3601_v49  ;;  %v3719_v9 = vpop.permute.xlu1 %3718 }
 0xa9b   : > { %v7922_v25 = vpop.eup %6169  ;;  %3652 = vadd.xlane.f32.xlu1 %v7920_v55  ;;  %v3581_v17 = vpop.xlane.xlu0 %3580 }
 0xa9c   : > { %6177 = vpow2.f32 %v3626_v22  ;;  %3642 = vadd.xlane.f32.xlu0 %v7922_v25  ;;  %v3602_v4 = vsub.f32 %v7856_v56, %v3581_v17  ;;  %v7928_v39 = vpop.eup %6171 }
 0xa9d   : > { %v7930_v0 = vpop.eup %6173  ;;  %6179 = vpow2.f32 %v3636_v29 }
 0xa9e   : > { %v3628_v24 = vmul.f32 1.442695, %v3602_v4  ;;  %v7935_v31 = vpop.eup %6175  ;;  %v3725_v61 = vpop.permute.xlu1 %3724 }
 0xa9f   : > { %3648 = vadd.xlane.f32.xlu1 %v7928_v39  ;;  %v3583_v30 = vpop.xlane.xlu0 %3582 }
 0xaa0   : > { %6181 = vpow2.f32 %v3628_v24  ;;  %3650 = vadd.xlane.f32.xlu0 %v7930_v0  ;;  %v3603_v21 = vsub.f32 %v7861_v12, %v3583_v30 }
 0xaa1   : > { %6183 = vpow2.f32 %v3624_v41 }
 0xaa2   : > { %v3630_v23 = vmul.f32 1.442695, %v3603_v21 }
 0xaa3   : > { %3654 = vadd.xlane.f32.xlu1 %v7935_v31  ;;  %v3585_v56 = vpop.xlane.xlu0 %3584 }
 0xaa4   : > { %v3604_v37 = vsub.f32 %v7871_v53, %v3585_v56  ;;  %6185 = vpow2.f32 %v3630_v23 }
 0xaa6   : > { %v7939_v27 = vpop.eup %6177  ;;  %v3632_v5 = vmul.f32 1.442695, %v3604_v37 }
 0xaa7   : > { %3658 = vadd.xlane.f32.xlu0 %v7939_v27  ;;  %v3587_v14 = vpop.xlane.xlu0 %3586  ;;  %v7943_v57 = vpop.eup %6179 }
 0xaa8   : > { %v3605_v63 = vsub.f32 %v7877_v33, %v3587_v14  ;;  %6187 = vpow2.f32 %v3632_v5 }
 0xaaa   : > { %v7945_v12 = vpop.eup %6181  ;;  %v3634_v60 = vmul.f32 1.442695, %v3605_v63 }
 0xaab   : > { %3668 = vadd.xlane.f32.xlu0 %v7943_v57  ;;  %3660 = vadd.xlane.f32.xlu1 %v7945_v12  ;;  %v3591_v53 = vpop.xlane.xlu0 %3590  ;;  %v7950_v8 = vpop.eup %6183 }
 0xaac   : > { %6189 = vpow2.f32 %v3634_v60  ;;  %v3607_v42 = vsub.f32 %v7883_v13, %v3591_v53 }
 0xaae   : > { %v3638_v35 = vmul.f32 1.442695, %v3607_v42  ;;  %v7953_v33 = vpop.eup %6185 }
 0xaaf   : > { %3656 = vadd.xlane.f32.xlu1 %v7950_v8  ;;  %v3717_v48 = vpop.permute.xlu0 %3716 }
 0xab0   : > { %6191 = vpow2.f32 %v3638_v35 }
 0xab2   : > { %v7956_v54 = vpop.eup %6187 }
 0xab3   : > { %3662 = vadd.xlane.f32.xlu1 %v7953_v33  ;;  %v3721_v44 = vpop.permute.xlu0 %3720 }
 0xab6   : > { %v7958_v58 = vpop.eup %6189 }
 0xab7   : > { %3664 = vadd.xlane.f32.xlu1 %v7956_v54  ;;  %3666 = vadd.xlane.f32.xlu0 %v7958_v58 }
 0xaba   : > { %v7962_v7 = vpop.eup %6191  ;;  %v5588_v13 = vpop.f32.mrb[48].mxu1 }
 0xabb   : > { %3670 = vadd.xlane.f32.xlu1 %v7962_v7  ;;  %v3140_v47 = vpop.f32.mrb[49].mxu1 }
 0xabc   : > { %v5589_v20 = vpop.f32.mrb[50].mxu1 }
 0xabd   : > { %v3204_v10 = vpack.c.bf16 %v5589_v20, %v5588_v13  ;;  %v3143_v52 = vpop.f32.mrb[51].mxu1 }
 0xabe   : > { %v3203_v1 = vpack.c.bf16 %v3143_v52, %v3140_v47 }
 0xac0   : > { %5604 = vmatprep.mubr.msk.bf16.mxu1 %vm1523_vm7, %v3203_v1 }
 0xac1   : > { %5605 = vmatmul.mubr.msk.bf16.vlgmr.msra.gmra.mrb[32].mxu1 %vm1523_vm7, %v3204_v10 }
 0xac2   : > { %5653 = vmatpush3.bf16.msra.mxu1 %v7909_v3  ;;  %v5592_v59 = vpop.f32.mrb[52].mxu1  ;;  %v3723_v3 = vpop.permute.xlu0 %3722 }
 0xac3   : > { %5654 = vmatprep.subr.bf16.mxu1 %v3715_v19  ;;  %v3156_v46 = vpop.f32.mrb[53].mxu1 }
 0xac4   : > { %v5593_v62 = vpop.f32.mrb[54].mxu1 }
 0xac5   : > { %v3206_v2 = vpack.c.bf16 %v5593_v62, %v5592_v59  ;;  %v3159_v11 = vpop.f32.mrb[55].mxu1 }
 0xac6   : > { %v3205_v26 = vpack.c.bf16 %v3159_v11, %v3156_v46  ;;  %5655 = vmatpush3.bf16.msra.mxu1 %v3715_v19  ;;  %v1498_v46 = vld [vmem:[%s6644_s2 + $0xc] sm:$0xf] }
 0xac7   : > { %5656 = vmatprep.subr.bf16.mxu1 %v3717_v48  ;;  %v3866_v11 = vsel %vm2496_vm9, %v1498_v46, 0 }
 0xac8   : > { %5608 = vmatprep.mubr.msk.bf16.mxu1 %vm1523_vm7, %v3205_v26 }
 0xac9   : > { %5609 = vmatmul.mubr.msk.bf16.gmra.mrb[36].mxu1 %vm1523_vm7, %v3206_v2 }
 0xaca   : > { %5657 = vmatpush3.bf16.msra.mxu1 %v3717_v48  ;;  %v5596_v51 = vpop.f32.mrb[56].mxu1 }
 0xacb   : > { %5658 = vmatprep.subr.bf16.mxu1 %v3719_v9  ;;  %v3172_v36 = vpop.f32.mrb[57].mxu1 }
 0xacc   : > { %v5597_v43 = vpop.f32.mrb[58].mxu1 }
 0xacd   : > { %3726 = vrot.lane.b32.xlu0 %v7014_v18, %s6417_s21  ;;  %v3208_v28 = vpack.c.bf16 %v5597_v43, %v5596_v51  ;;  %v3175_v6 = vpop.f32.mrb[59].mxu1  ;;  %s8534_s21 = smov (!%p5129_p1), %s8533_s1 }
 0xace   : > { %v3207_v38 = vpack.c.bf16 %v3175_v6, %v3172_v36  ;;  %5659 = vmatpush3.bf16.msra.mxu1 %v3719_v9 }
 0xacf   : > { %5660 = vmatprep.subr.bf16.mxu1 %v3721_v44 }
 0xad0   : > { %5612 = vmatprep.mubr.msk.bf16.mxu1 %vm1523_vm7, %v3207_v38 }
 0xad1   : > { %5613 = vmatmul.mubr.msk.bf16.gmra.mrb[40].mxu1 %vm1523_vm7, %v3208_v28 }
 0xad2   : > { %5661 = vmatpush3.bf16.msra.mxu1 %v3721_v44 }
 0xad3   : > { %5662 = vmatprep.subr.bf16.mxu1 %v3723_v3 }
 0xad6   : > { %5663 = vmatpush3.bf16.msra.mxu1 %v3723_v3 }
 0xad7   : > { %5664 = vmatprep.subr.bf16.mxu1 %v3725_v61 }
 0xada   : > { %5665 = vmatpush3.bf16.msra.mxu1 %v3725_v61 }
 0xaf6   : > { %v5600_v16 = vpop.f32.mrb[60].mxu1 }
 0xaf7   : > { %v3188_v15 = vpop.f32.mrb[61].mxu1 }
 0xaf8   : > { %v5601_v45 = vpop.f32.mrb[62].mxu1 }
 0xaf9   : > { %v3210_v18 = vpack.c.bf16 %v5601_v45, %v5600_v16  ;;  %v3191_v49 = vpop.f32.mrb[63].mxu1 }
 0xafa   : > { %v3209_v22 = vpack.c.bf16 %v3191_v49, %v3188_v15 }
 0xafc   : > { %5616 = vmatprep.mubr.msk.bf16.mxu1 %vm1523_vm7, %v3209_v22 }
 0xafd   : > { %5617 = vmatmul.mubr.msk.bf16.gmra.mrb[44].mxu1 %vm1523_vm7, %v3210_v18 }
 0xb1c   : > { %v3645_v29 = vpop.xlane.xlu0 %3644 }
 0xb20   : > { %v3641_v17 = vpop.xlane.xlu0 %3640 }
 0xb21   : > { %6193 = vrcp.f32 %v3641_v17 }
 0xb24   : > { %v3647_v32 = vpop.xlane.xlu0 %3646 }
 0xb28   : > { %v3653_v4 = vpop.xlane.xlu1 %3652 }
 0xb29   : > { %v3643_v24 = vpop.xlane.xlu0 %3642 }
 0xb2a   : > { %6195 = vrcp.f32 %v3643_v24 }
 0xb2b   : > { %v6194_v41 = vpop.eup %6193  ;;  %6197 = vrcp.f32 %v3647_v32 }
 0xb2c   : > { %v3649_v30 = vpop.xlane.xlu1 %3648  ;;  %v3688_v23 = vmul.f32 %v6194_v41, %v7911_v34 }
 0xb2d   : > { %v3651_v5 = vpop.xlane.xlu0 %3650  ;;  %6199 = vrcp.f32 %v3649_v30 }
 0xb2e   : > { %6201 = vrcp.f32 %v3651_v5 }
 0xb2f   : > { %6203 = vrcp.f32 %v3645_v29 }
 0xb30   : > { %v3655_v56 = vpop.xlane.xlu1 %3654 }
 0xb31   : > { %6205 = vrcp.f32 %v3655_v56 }
 0xb34   : > { %v6196_v21 = vpop.eup %6195  ;;  %v3659_v60 = vpop.xlane.xlu0 %3658 }
 0xb35   : > { %v3689_v37 = vmul.f32 %v6196_v21, %v7922_v25  ;;  %v6198_v13 = vpop.eup %6197 }
 0xb36   : > { %v3691_v10 = vmul.f32 %v6198_v13, %v7915_v50 }
 0xb37   : > { %v3704_v14 = vpack.c.bf16 %v3689_v37, %v3688_v23  ;;  %v6200_v47 = vpop.eup %6199 }
 0xb38   : > { %v3661_v63 = vpop.xlane.xlu1 %3660  ;;  %v3669_v42 = vpop.xlane.xlu0 %3668  ;;  %v3692_v19 = vmul.f32 %v6200_v47, %v7928_v39  ;;  %v8008_v47 = vld [vmem:[%s8528_s19] ss:$0 sm:$0xff] }
 0xb39   : > { %5668 = vmatprep.mubr.bf16.mxu1 %v3704_v14  ;;  %v6202_v25 = vpop.eup %6201 }
 0xb3a   : > { %v6204_v20 = vpop.eup %6203  ;;  %v3693_v59 = vmul.f32 %v6202_v25, %v7930_v0 }
 0xb3b   : > { %v3690_v62 = vmul.f32 %v6204_v20, %v7905_v40  ;;  %v6206_v50 = vpop.eup %6205 }
 0xb3c   : > { %v3657_v53 = vpop.xlane.xlu1 %3656  ;;  %v3706_v48 = vpack.c.bf16 %v3693_v59, %v3692_v19  ;;  %v3695_v9 = vmul.f32 %v6206_v50, %v7935_v31 }
 0xb3d   : > { %6207 = vrcp.f32 %v3657_v53  ;;  %v3705_v2 = vpack.c.bf16 %v3691_v10, %v3690_v62 }
 0xb3e   : > { %6209 = vrcp.f32 %v3653_v4 }
 0xb3f   : > { %6211 = vrcp.f32 %v3659_v60 }
 0xb40   : > { %v3663_v35 = vpop.xlane.xlu1 %3662 }
 0xb41   : > { %6213 = vrcp.f32 %v3663_v35 }
 0xb44   : > { %v3667_v34 = vpop.xlane.xlu0 %3666  ;;  %v3665_v52 = vpop.xlane.xlu1 %3664 }
 0xb45   : > { %6215 = vrcp.f32 %v3665_v52 }
 0xb46   : > { %6217 = vrcp.f32 %v3667_v34 }
 0xb47   : > { %6219 = vrcp.f32 %v3661_v63  ;;  %v6208_v26 = vpop.eup %6207 }
 0xb48   : > { %v3727_v1 = vpop.permute.xlu0 %3726  ;;  %v6210_v39 = vpop.eup %6209  ;;  %v3696_v51 = vmul.f32 %v6208_v26, %v7950_v8 }
 0xb49   : > { %5666 = vmatprep.subr.bf16.mxu1 %v3727_v1  ;;  %v6212_v0 = vpop.eup %6211  ;;  %v3671_v40 = vpop.xlane.xlu1 %3670  ;;  %v3694_v36 = vmul.f32 %v6210_v39, %v7920_v55 }
 0xb4a   : > { %5667 = vmatpush3.bf16.msra.mxu1 %v3727_v1  ;;  %6221 = vrcp.f32 %v3671_v40  ;;  %v3697_v44 = vmul.f32 %v6212_v0, %v7939_v27  ;;  %v8529_v1 = vld [vmem:[#allocation19_spill] sm:$0xff] }
 0xb4b   : > { %5837 = vmatprep.subr.msk.bf16.mxu1 %vm2496_vm9, %v1498_v46  ;;  %v6214_v43 = vpop.eup %6213  ;;  %v3707_v28 = vpack.c.bf16 %v3695_v9, %v3694_v36  ;;  %6223 = vrcp.f32 %v3669_v42  ;;  %v6289_v46 = vld [vmem:[#allocation2] sm:$0xff]  ;;  %v6291_v36 = vld [vmem:[#allocation2 + $0x30] sm:$0xff] }
 0xb4c   : > { %v3708_v38 = vpack.c.bf16 %v3697_v44, %v3696_v51  ;;  %v3699_v16 = vmul.f32 %v6214_v43, %v7953_v33 }
 0xb4d   : > { %5669 = vmatmul.mubr.bf16.vlgmr.msra.gmra.mrb[64].mxu1 %v3705_v2 }
 0xb4e   : > { %5672 = vmatprep.mubr.bf16.mxu1 %v3706_v48  ;;  %5685 = vmatpush3.bf16.msra.mxu1 %v3866_v11  ;;  %v6290_v48 = vld [vmem:[#allocation2 + $0x18] sm:$0xff] }
 0xb4f   : > { %v6216_v6 = vpop.eup %6215 }
 0xb50   : > { %v6218_v3 = vpop.eup %6217  ;;  %v3700_v31 = vmul.f32 %v6216_v6, %v7956_v54 }
 0xb51   : > { %v6220_v61 = vpop.eup %6219  ;;  %v3701_v8 = vmul.f32 %v6218_v3, %v7958_v58 }
 0xb52   : > { %v3698_v55 = vmul.f32 %v6220_v61, %v7945_v12 }
 0xb53   : > { %v3710_v27 = vpack.c.bf16 %v3701_v8, %v3700_v31  ;;  %v6293_v31 = vld [vmem:[#allocation2 + $0x20] sm:$0xff] }
 0xb54   : > { %v3709_v15 = vpack.c.bf16 %v3699_v16, %v3698_v55  ;;  %v6222_v45 = vpop.eup %6221 }
 0xb55   : > { %5673 = vmatmul.mubr.bf16.gmra.mrb[68].mxu1 %v3707_v28  ;;  %v6224_v18 = vpop.eup %6223  ;;  %v3703_v49 = vmul.f32 %v6222_v45, %v7962_v7  ;;  %v6292_v28 = vld [vmem:[#allocation2 + $0x8] sm:$0xff] }
 0xb56   : > { %5676 = vmatprep.mubr.bf16.mxu1 %v3708_v38  ;;  %v3702_v22 = vmul.f32 %v6224_v18, %v7943_v57 }
 0xb58   : > { %v3711_v29 = vpack.c.bf16 %v3703_v49, %v3702_v22  ;;  %v6294_v49 = vld [vmem:[#allocation2 + $0x38] sm:$0xff] }
 0xb5d   : > { %5677 = vmatmul.mubr.bf16.gmra.mrb[72].mxu1 %v3709_v15 }
 0xb5e   : > { %5680 = vmatprep.mubr.bf16.mxu1 %v3710_v27 }
 0xb65   : > { %5681 = vmatmul.mubr.bf16.gmra.mrb[76].mxu1 %v3711_v29 }
 0xc20   : > { %v5670_v17 = vpop.f32.mrb[64].mxu1 }
 0xc21   : > { %v3770_v33 = vpop.f32.mrb[65].mxu1 }
 0xc22   : > { %v5671_v32 = vpop.f32.mrb[66].mxu1 }
 0xc23   : > { %v3834_v54 = vpack.c.bf16 %v5671_v32, %v5670_v17  ;;  %v3773_v4 = vpop.f32.mrb[67].mxu1  ;;  %v6295_v32 = vld [vmem:[#allocation2 + $0x28] sm:$0xff] }
 0xc24   : > { %v3833_v58 = vpack.c.bf16 %v3773_v4, %v3770_v33 }
 0xc26   : > { %5686 = vmatprep.mubr.msk.bf16.mxu1 %vm1523_vm7, %v3833_v58 }
 0xc27   : > { %5687 = vmatmul.mubr.msk.bf16.vlgmr.msra.gmra.mrb[32].mxu1 %vm1523_vm7, %v3834_v54 }
 0xc28   : > { %v5674_v12 = vpop.f32.mrb[68].mxu1 }
 0xc29   : > { %v3786_v24 = vpop.f32.mrb[69].mxu1 }
 0xc2a   : > { %v5675_v30 = vpop.f32.mrb[70].mxu1 }
 0xc2b   : > { %v3836_v41 = vpack.c.bf16 %v5675_v30, %v5674_v12  ;;  %v3789_v21 = vpop.f32.mrb[71].mxu1 }
 0xc2c   : > { %v3835_v7 = vpack.c.bf16 %v3789_v21, %v3786_v24 }
 0xc2e   : > { %5690 = vmatprep.mubr.msk.bf16.mxu1 %vm1523_vm7, %v3835_v7 }
 0xc2f   : > { %5691 = vmatmul.mubr.msk.bf16.gmra.mrb[36].mxu1 %vm1523_vm7, %v3836_v41  ;;  %v6296_v41 = vld [vmem:[#allocation2 + $0x70] sm:$0xff] }
 0xc30   : > { %v5678_v57 = vpop.f32.mrb[72].mxu1 }
 0xc31   : > { %v3802_v56 = vpop.f32.mrb[73].mxu1 }
 0xc32   : > { %v5679_v23 = vpop.f32.mrb[74].mxu1 }
 0xc33   : > { %v3838_v37 = vpack.c.bf16 %v5679_v23, %v5678_v57  ;;  %v3805_v5 = vpop.f32.mrb[75].mxu1  ;;  %v6297_v57 = vld [vmem:[#allocation2 + $0x50] sm:$0xff] }
 0xc34   : > { %v3837_v14 = vpack.c.bf16 %v3805_v5, %v3802_v56 }
 0xc36   : > { %5694 = vmatprep.mubr.msk.bf16.mxu1 %vm1523_vm7, %v3837_v14  ;;  %v6298_v14 = vld [vmem:[#allocation2 + $0x40] sm:$0xff] }
 0xc37   : > { %5695 = vmatmul.mubr.msk.bf16.gmra.mrb[40].mxu1 %vm1523_vm7, %v3838_v37 }
 0xc38   : > { %v5682_v63 = vpop.f32.mrb[76].mxu1 }
 0xc39   : > { %v3818_v60 = vpop.f32.mrb[77].mxu1 }
 0xc3a   : > { %v5683_v53 = vpop.f32.mrb[78].mxu1 }
 0xc3b   : > { %v3840_v42 = vpack.c.bf16 %v5683_v53, %v5682_v63  ;;  %v3821_v35 = vpop.f32.mrb[79].mxu1 }
 0xc3c   : > { %v3839_v13 = vpack.c.bf16 %v3821_v35, %v3818_v60 }
 0xc3e   : > { %5698 = vmatprep.mubr.msk.bf16.mxu1 %vm1523_vm7, %v3839_v13 }
 0xc3f   : > { %5699 = vmatmul.mubr.msk.bf16.gmra.mrb[44].mxu1 %vm1523_vm7, %v3840_v42  ;;  %v6299_v42 = vld [vmem:[#allocation2 + $0x58] sm:$0xff] }
 0xcfa   : > { %v5688_v34 = vpop.f32.mrb[32].mxu1 }
 0xcfb   : > { %v3990_v25 = vadd.f32 %v5688_v34, %v8008_v47  ;;  %v3902_v20 = vpop.f32.mrb[33].mxu1 }
 0xcfc   : > { %v3988_v10 = vadd.f32 %v8008_v47, %v3902_v20  ;;  %v5689_v52 = vpop.f32.mrb[34].mxu1 }
 0xcfd   : > { %v8013_v19 = vadd.f32 %v3990_v25, %v8529_v1  ;;  %v3905_v59 = vpop.f32.mrb[35].mxu1  ;;  %v3991_v2 = vadd.f32 %v5689_v52, %v8008_v47  ;;  %v6300_v25 = vld [vmem:[#allocation2 + $0x48] sm:$0xff]  ;;  %v6301_v1 = vld [vmem:[#allocation2 + $0x60] sm:$0xff] }
 0xcfe   : > { %v8015_v62 = vadd.f32 %v6289_v46, %v3988_v10  ;;  %v3989_v39 = vadd.f32 %v8008_v47, %v3905_v59 }
 0xcff   : > { %v4028_v11 = vsel %vm1077_vm4, %v8013_v19, 0.0  ;;  %v8020_v26 = vadd.f32 %v6290_v48, %v3991_v2 }
 0xd00   : > { %4029 = vadd.xlane.f32.xlu1 %v4028_v11  ;;  %v4022_v9 = vsel %vm1077_vm4, %v8015_v62, 0.0  ;;  %v8028_v6 = vadd.f32 %v6292_v28, %v3989_v39 }
 0xd01   : > { %v4031_v3 = vsel %vm1077_vm4, %v8020_v26, 0.0 }
 0xd02   : > { %v5692_v50 = vpop.f32.mrb[36].mxu1  ;;  %v4025_v45 = vsel %vm1077_vm4, %v8028_v6, 0.0 }
 0xd03   : > { %v3994_v0 = vadd.f32 %v5692_v50, %v8008_v47  ;;  %v3918_v40 = vpop.f32.mrb[37].mxu1  ;;  %v6302_v50 = vld [vmem:[#allocation2 + $0x68] sm:$0xff] }
 0xd04   : > { %4023 = vadd.xlane.f32.xlu1 %v4022_v9  ;;  %v5693_v51 = vpop.f32.mrb[38].mxu1  ;;  %v3992_v38 = vadd.f32 %v8008_v47, %v3918_v40 }
 0xd05   : > { %v8026_v44 = vadd.f32 %v6291_v36, %v3994_v0  ;;  %v3921_v43 = vpop.f32.mrb[39].mxu1  ;;  %v3995_v55 = vadd.f32 %v5693_v51, %v8008_v47  ;;  %v6303_v0 = vld [vmem:[#allocation2 + $0x78] sm:$0xff] }
 0xd06   : > { %v8035_v8 = vadd.f32 %v6293_v31, %v3992_v38  ;;  %v3993_v29 = vadd.f32 %v8008_v47, %v3921_v43 }
 0xd07   : > { %v4040_v61 = vsel %vm1077_vm4, %v8026_v44, 0.0  ;;  %v8040_v22 = vadd.f32 %v6294_v49, %v3995_v55 }
 0xd08   : > { %4032 = vadd.xlane.f32.xlu1 %v4031_v3  ;;  %4041 = vadd.xlane.f32.xlu0 %v4040_v61  ;;  %v4034_v17 = vsel %vm1077_vm4, %v8035_v8, 0.0  ;;  %v8045_v54 = vadd.f32 %v6295_v32, %v3993_v29 }
 0xd09   : > { %v4043_v24 = vsel %vm1077_vm4, %v8040_v22, 0.0 }
 0xd0a   : > { %v5696_v16 = vpop.f32.mrb[40].mxu1  ;;  %v4037_v37 = vsel %vm1077_vm4, %v8045_v54, 0.0 }
 0xd0b   : > { %v3934_v15 = vpop.f32.mrb[41].mxu1  ;;  %v3998_v4 = vadd.f32 %v5696_v16, %v8008_v47 }
 0xd0c   : > { %4026 = vadd.xlane.f32.xlu1 %v4025_v45  ;;  %v5697_v27 = vpop.f32.mrb[42].mxu1  ;;  %v3996_v23 = vadd.f32 %v8008_v47, %v3934_v15 }
 0xd0d   : > { %v3937_v18 = vpop.f32.mrb[43].mxu1  ;;  %v8053_v56 = vadd.f32 %v6297_v57, %v3998_v4  ;;  %v3999_v60 = vadd.f32 %v5697_v27, %v8008_v47 }
 0xd0e   : > { %v8060_v63 = vadd.f32 %v6298_v14, %v3996_v23  ;;  %v3997_v13 = vadd.f32 %v8008_v47, %v3937_v18 }
 0xd0f   : > { %v4052_v53 = vsel %vm1077_vm4, %v8053_v56, 0.0  ;;  %v8065_v35 = vadd.f32 %v6299_v42, %v3999_v60 }
 0xd10   : > { %4035 = vadd.xlane.f32.xlu1 %v4034_v17  ;;  %v4046_v34 = vsel %vm1077_vm4, %v8060_v63, 0.0  ;;  %v8070_v20 = vadd.f32 %v6300_v25, %v3997_v13 }
 0xd11   : > { %v4055_v52 = vsel %vm1077_vm4, %v8065_v35, 0.0 }
 0xd12   : > { %v5700_v33 = vpop.f32.mrb[44].mxu1  ;;  %v4049_v2 = vsel %vm1077_vm4, %v8070_v20, 0.0 }
 0xd13   : > { %v4002_v58 = vadd.f32 %v5700_v33, %v8008_v47  ;;  %v3950_v12 = vpop.f32.mrb[45].mxu1 }
 0xd14   : > { %4044 = vadd.xlane.f32.xlu1 %v4043_v24  ;;  %v5701_v30 = vpop.f32.mrb[46].mxu1  ;;  %v4000_v10 = vadd.f32 %v8008_v47, %v3950_v12 }
 0xd15   : > { %v8051_v21 = vadd.f32 %v6296_v41, %v4002_v58  ;;  %v3953_v7 = vpop.f32.mrb[47].mxu1  ;;  %v4003_v11 = vadd.f32 %v5701_v30, %v8008_v47 }
 0xd16   : > { %v8075_v59 = vadd.f32 %v6301_v1, %v4000_v10  ;;  %v4001_v46 = vadd.f32 %v8008_v47, %v3953_v7 }
 0xd17   : > { %v4064_v5 = vsel %vm1077_vm4, %v8051_v21, 0.0  ;;  %v8085_v40 = vadd.f32 %v6303_v0, %v4003_v11 }
 0xd18   : > { %4038 = vadd.xlane.f32.xlu1 %v4037_v37  ;;  %4065 = vadd.xlane.f32.xlu0 %v4064_v5  ;;  %v8081_v48 = vadd.f32 %v6302_v50, %v4001_v46  ;;  %v4058_v39 = vsel %vm1077_vm4, %v8075_v59, 0.0 }
 0xd19   : > { %v4067_v51 = vsel %vm1077_vm4, %v8085_v40, 0.0 }
 0xd1a   : > { %v4061_v9 = vsel %vm1077_vm4, %v8081_v48, 0.0 }
 0xd1c   : > { %4053 = vadd.xlane.f32.xlu1 %v4052_v53 }
 0xd20   : > { %4047 = vadd.xlane.f32.xlu1 %v4046_v34 }
 0xd24   : > { %4056 = vadd.xlane.f32.xlu1 %v4055_v52 }
 0xd28   : > { %4050 = vadd.xlane.f32.xlu1 %v4049_v2 }
 0xd2c   : > { %4059 = vadd.xlane.f32.xlu1 %v4058_v39 }
 0xd30   : > { %4062 = vadd.xlane.f32.xlu1 %v4061_v9 }
 0xd34   : > { %4068 = vadd.xlane.f32.xlu1 %v4067_v51 }
 0xd8d   : > { %v4030_v36 = vpop.xlane.xlu1 %4029 }
 0xd8e   : > { %v4072_v47 = vmul.f32 0.03125, %v4030_v36 }
 0xd90   : > { %v8092_v38 = vsub.f32 %v8013_v19, %v4072_v47 }
 0xd91   : > { %v4024_v43 = vpop.xlane.xlu1 %4023 }
 0xd92   : > { %v4070_v28 = vmul.f32 0.03125, %v4024_v43  ;;  %v4104_v15 = vmul.f32 %v8092_v38, %v8092_v38 }
 0xd94   : > { %v8095_v3 = vsub.f32 %v8015_v62, %v4070_v28  ;;  %v4124_v33 = vsel %vm1077_vm4, %v4104_v15, 0.0 }
 0xd95   : > { %v4033_v61 = vpop.xlane.xlu1 %4032  ;;  %v4042_v45 = vpop.xlane.xlu0 %4041 }
 0xd96   : > { %v4102_v16 = vmul.f32 %v8095_v3, %v8095_v3  ;;  %v4073_v31 = vmul.f32 0.03125, %v4033_v61  ;;  %v4076_v29 = vmul.f32 0.03125, %v4042_v45 }
 0xd98   : > { %v4118_v55 = vsel %vm1077_vm4, %v4102_v16, 0.0  ;;  %v8103_v49 = vsub.f32 %v8020_v26, %v4073_v31  ;;  %v8112_v12 = vsub.f32 %v8026_v44, %v4076_v29 }
 0xd99   : > { %v4027_v27 = vpop.xlane.xlu1 %4026  ;;  %4119 = vadd.xlane.f32.xlu0 %v4118_v55 }
 0xd9a   : > { %v4071_v18 = vmul.f32 0.03125, %v4027_v27  ;;  %v4105_v41 = vmul.f32 %v8103_v49, %v8103_v49  ;;  %v4108_v14 = vmul.f32 %v8112_v12, %v8112_v12 }
 0xd9c   : > { %v8106_v17 = vsub.f32 %v8028_v6, %v4071_v18  ;;  %v4127_v5 = vsel %vm1077_vm4, %v4105_v41, 0.0  ;;  %v4136_v34 = vsel %vm1077_vm4, %v4108_v14, 0.0 }
 0xd9d   : > { %v4036_v32 = vpop.xlane.xlu1 %4035  ;;  %4125 = vadd.xlane.f32.xlu0 %v4124_v33 }
 0xd9e   : > { %v4074_v4 = vmul.f32 0.03125, %v4036_v32  ;;  %v4103_v58 = vmul.f32 %v8106_v17, %v8106_v17 }
 0xda0   : > { %v8115_v24 = vsub.f32 %v8035_v8, %v4074_v4  ;;  %v4121_v30 = vsel %vm1077_vm4, %v4103_v58, 0.0 }
 0xda1   : > { %v4045_v7 = vpop.xlane.xlu1 %4044  ;;  %4122 = vadd.xlane.f32.xlu1 %v4121_v30 }
 0xda2   : > { %v4106_v57 = vmul.f32 %v8115_v24, %v8115_v24  ;;  %v4077_v23 = vmul.f32 0.03125, %v4045_v7 }
 0xda4   : > { %v4130_v37 = vsel %vm1077_vm4, %v4106_v57, 0.0  ;;  %v8127_v42 = vsub.f32 %v8040_v22, %v4077_v23 }
 0xda5   : > { %v4039_v60 = vpop.xlane.xlu1 %4038  ;;  %4131 = vadd.xlane.f32.xlu0 %v4130_v37  ;;  %4128 = vadd.xlane.f32.xlu1 %v4127_v5  ;;  %v4066_v28 = vpop.xlane.xlu0 %4065 }
 0xda6   : > { %v4075_v53 = vmul.f32 0.03125, %v4039_v60  ;;  %v4109_v46 = vmul.f32 %v8127_v42, %v8127_v42  ;;  %v4084_v31 = vmul.f32 0.03125, %v4066_v28 }
 0xda8   : > { %v8130_v13 = vsub.f32 %v8045_v54, %v4075_v53  ;;  %v4139_v0 = vsel %vm1077_vm4, %v4109_v46, 0.0  ;;  %v8160_v33 = vsub.f32 %v8051_v21, %v4084_v31  ;;  %v5932_v46 = vld [vmem:[%s6661_s24 + $0x8] sm:$0xff]  }
 0xda9   : > { %v4054_v25 = vpop.xlane.xlu1 %4053  ;;  %4137 = vadd.xlane.f32.xlu0 %v4136_v34  ;;  %v5931_v34 = vld [vmem:[%s6661_s24] sm:$0xff]  }
 0xdaa   : > { %v4107_v10 = vmul.f32 %v8130_v13, %v8130_v13  ;;  %v4080_v52 = vmul.f32 0.03125, %v4054_v25  ;;  %v4116_v5 = vmul.f32 %v8160_v33, %v8160_v33  ;;  %5702 = vmatprep.subr.bf16.mxu0 %v5931_v34 }
 0xdab   : > { %5703 = vmatpush3.bf16.msra.mxu0 %v5931_v34 }
 0xdac   : > { %v4133_v1 = vsel %vm1077_vm4, %v4107_v10, 0.0  ;;  %v8139_v50 = vsub.f32 %v8053_v56, %v4080_v52  ;;  %v4160_v10 = vsel %vm1077_vm4, %v4116_v5, 0.0  ;;  %5704 = vmatprep.subr.bf16.mxu0 %v5932_v46 }
 0xdad   : > { %v4048_v2 = vpop.xlane.xlu1 %4047  ;;  %4134 = vadd.xlane.f32.xlu1 %v4133_v1 }
 0xdae   : > { %v4078_v11 = vmul.f32 0.03125, %v4048_v2  ;;  %v4112_v43 = vmul.f32 %v8139_v50, %v8139_v50 }
 0xdaf   : > { %5705 = vmatpush3.bf16.msra.mxu0 %v5932_v46 }
 0xdb0   : > { %v8142_v39 = vsub.f32 %v8060_v63, %v4078_v11  ;;  %v4148_v45 = vsel %vm1077_vm4, %v4112_v43, 0.0 }
 0xdb1   : > { %v4057_v9 = vpop.xlane.xlu1 %4056  ;;  %4140 = vadd.xlane.f32.xlu1 %v4139_v0 }
 0xdb2   : > { %v4110_v51 = vmul.f32 %v8142_v39, %v8142_v39  ;;  %v4081_v36 = vmul.f32 0.03125, %v4057_v9 }
 0xdb4   : > { %v4142_v47 = vsel %vm1077_vm4, %v4110_v51, 0.0  ;;  %v8151_v55 = vsub.f32 %v8065_v35, %v4081_v36 }
 0xdb5   : > { %v4051_v61 = vpop.xlane.xlu1 %4050  ;;  %4143 = vadd.xlane.f32.xlu0 %v4142_v47 }
 0xdb6   : > { %v4079_v16 = vmul.f32 0.03125, %v4051_v61  ;;  %v4113_v58 = vmul.f32 %v8151_v55, %v8151_v55 }
 0xdb8   : > { %v8154_v15 = vsub.f32 %v8070_v20, %v4079_v16  ;;  %v4151_v37 = vsel %vm1077_vm4, %v4113_v58, 0.0 }
 0xdb9   : > { %4149 = vadd.xlane.f32.xlu0 %v4148_v45  ;;  %v4060_v27 = vpop.xlane.xlu1 %4059 }
 0xdba   : > { %v4082_v18 = vmul.f32 0.03125, %v4060_v27  ;;  %v4111_v29 = vmul.f32 %v8154_v15, %v8154_v15 }
 0xdbc   : > { %v8163_v32 = vsub.f32 %v8075_v59, %v4082_v18  ;;  %v4145_v4 = vsel %vm1077_vm4, %v4111_v29, 0.0 }
 0xdbd   : > { %4146 = vadd.xlane.f32.xlu1 %v4145_v4  ;;  %v4063_v30 = vpop.xlane.xlu1 %4062 }
 0xdbe   : > { %v4083_v41 = vmul.f32 0.03125, %v4063_v30  ;;  %v4114_v7 = vmul.f32 %v8163_v32, %v8163_v32 }
 0xdc0   : > { %v8171_v57 = vsub.f32 %v8081_v48, %v4083_v41  ;;  %v4154_v23 = vsel %vm1077_vm4, %v4114_v7, 0.0 }
 0xdc1   : > { %4155 = vadd.xlane.f32.xlu0 %v4154_v23  ;;  %4152 = vadd.xlane.f32.xlu1 %v4151_v37  ;;  %v4069_v14 = vpop.xlane.xlu1 %4068  ;;  %v8195_v37 = vld [vmem:[%s8530_s27] ss:$0 sm:$0xff] }
 0xdc2   : > { %v4085_v60 = vmul.f32 0.03125, %v4069_v14  ;;  %v4115_v53 = vmul.f32 %v8171_v57, %v8171_v57 }
 0xdc4   : > { %v8181_v25 = vsub.f32 %v8085_v40, %v4085_v60  ;;  %v4157_v52 = vsel %vm1077_vm4, %v4115_v53, 0.0 }
 0xdc5   : > { %4161 = vadd.xlane.f32.xlu0 %v4160_v10  ;;  %4158 = vadd.xlane.f32.xlu1 %v4157_v52 }
 0xdc6   : > { %v4117_v1 = vmul.f32 %v8181_v25, %v8181_v25 }
 0xdc8   : > { %v4163_v2 = vsel %vm1077_vm4, %v4117_v1, 0.0 }
 0xdc9   : > { %4164 = vadd.xlane.f32.xlu1 %v4163_v2 }
 0xe26   : > { %v4120_v11 = vpop.xlane.xlu0 %4119 }
 0xe27   : > { %v4166_v0 = vmul.f32 0.03125, %v4120_v11 }
 0xe29   : > { %v4182_v9 = vadd.f32 1e-06, %v4166_v0 }
 0xe2a   : > { %v4126_v51 = vpop.xlane.xlu0 %4125 }
 0xe2b   : > { %v4168_v36 = vmul.f32 0.03125, %v4126_v51  ;;  %6225 = vrsqrt.f32 %v4182_v9 }
 0xe2d   : > { %v4184_v47 = vadd.f32 1e-06, %v4168_v36 }
 0xe2e   : > { %v4123_v43 = vpop.xlane.xlu1 %4122 }
 0xe2f   : > { %v4167_v28 = vmul.f32 0.03125, %v4123_v43  ;;  %6227 = vrsqrt.f32 %v4184_v47 }
 0xe31   : > { %v4183_v61 = vadd.f32 1e-06, %v4167_v28 }
 0xe32   : > { %v4132_v16 = vpop.xlane.xlu0 %4131  ;;  %v4129_v31 = vpop.xlane.xlu1 %4128 }
 0xe33   : > { %6229 = vrsqrt.f32 %v4183_v61  ;;  %v4170_v45 = vmul.f32 0.03125, %v4132_v16  ;;  %v4169_v27 = vmul.f32 0.03125, %v4129_v31 }
 0xe35   : > { %v4186_v18 = vadd.f32 1e-06, %v4170_v45  ;;  %v4185_v29 = vadd.f32 1e-06, %v4169_v27  ;;  %v6226_v58 = vpop.eup %6225 }
 0xe36   : > { %v4138_v4 = vpop.xlane.xlu0 %4137  ;;  %v4214_v7 = vmul.f32 %v6226_v58, %v8095_v3  ;;  %v8204_v3 = vld [vmem:[%s885_s23] ss:$0 sm:$0xff] }
 0xe37   : > { %6231 = vrsqrt.f32 %v4186_v18  ;;  %v4172_v30 = vmul.f32 0.03125, %v4138_v4 }
 0xe38   : > { %6233 = vrsqrt.f32 %v4185_v29  ;;  %v4236_v52 = vmul.f32 %v8195_v37, %v4214_v7 }
 0xe39   : > { %v4188_v41 = vadd.f32 1e-06, %v4172_v30  ;;  %v6228_v14 = vpop.eup %6227 }
 0xe3a   : > { %v4135_v23 = vpop.xlane.xlu1 %4134  ;;  %v4216_v1 = vmul.f32 %v6228_v14, %v8092_v38 }
 0xe3b   : > { %v4171_v5 = vmul.f32 0.03125, %v4135_v23  ;;  %6235 = vrsqrt.f32 %v4188_v41 }
 0xe3c   : > { %v4238_v47 = vmul.f32 %v8195_v37, %v4216_v1 }
 0xe3d   : > { %v6230_v60 = vpop.eup %6229  ;;  %v4187_v53 = vadd.f32 1e-06, %v4171_v5 }
 0xe3e   : > { %v4215_v34 = vmul.f32 %v6230_v60, %v8106_v17  ;;  %v4141_v10 = vpop.xlane.xlu1 %4140  ;;  %v4258_v17 = vadd.f32 %v8204_v3, %v4236_v52  ;;  %v4260_v18 = vadd.f32 %v8204_v3, %v4238_v47 }
 0xe3f   : > { %6237 = vrsqrt.f32 %v4187_v53  ;;  %v4173_v46 = vmul.f32 0.03125, %v4141_v10 }
 0xe40   : > { %v4237_v2 = vmul.f32 %v8195_v37, %v4215_v34 }
 0xe41   : > { %v6232_v11 = vpop.eup %6231  ;;  %v4189_v0 = vadd.f32 1e-06, %v4173_v46 }
 0xe42   : > { %v6234_v9 = vpop.eup %6233  ;;  %v4144_v51 = vpop.xlane.xlu0 %4143  ;;  %v4259_v36 = vadd.f32 %v8204_v3, %v4237_v2  ;;  %v4218_v38 = vmul.f32 %v6232_v11, %v8115_v24 }
 0xe43   : > { %v4217_v43 = vmul.f32 %v6234_v9, %v8103_v49  ;;  %6239 = vrsqrt.f32 %v4189_v0  ;;  %v4174_v28 = vmul.f32 0.03125, %v4144_v51 }
 0xe44   : > { %v4274_v61 = vpack.c.bf16 %v4259_v36, %v4258_v17  ;;  %v4240_v30 = vmul.f32 %v8195_v37, %v4218_v38 }
 0xe45   : > { %v4239_v16 = vmul.f32 %v8195_v37, %v4217_v43  ;;  %v4190_v31 = vadd.f32 1e-06, %v4174_v28  ;;  %v6236_v27 = vpop.eup %6235 }
 0xe46   : > { %v4150_v45 = vpop.xlane.xlu0 %4149  ;;  %5706 = vmatprep.mubr.msk.bf16.mxu0 %vm1077_vm4, %v4274_v61  ;;  %v4220_v41 = vmul.f32 %v6236_v27, %v8112_v12  ;;  %v4262_v34 = vadd.f32 %v8204_v3, %v4240_v30 }
 0xe47   : > { %v4261_v29 = vadd.f32 %v8204_v3, %v4239_v16  ;;  %v4176_v4 = vmul.f32 0.03125, %v4150_v45  ;;  %6241 = vrsqrt.f32 %v4190_v31 }
 0xe49   : > { %v6238_v58 = vpop.eup %6237  ;;  %v4275_v49 = vpack.c.bf16 %v4261_v29, %v4260_v18  ;;  %v4192_v7 = vadd.f32 1e-06, %v4176_v4 }
 0xe4a   : > { %v4219_v24 = vmul.f32 %v6238_v58, %v8130_v13  ;;  %v4147_v23 = vpop.xlane.xlu1 %4146  ;;  %v4242_v13 = vmul.f32 %v8195_v37, %v4220_v41 }
 0xe4b   : > { %5707 = vmatmul.mubr.msk.bf16.vlgmr.msra.gmra.mrb[80].mxu0 %vm1077_vm4, %v4275_v49  ;;  %v4175_v5 = vmul.f32 0.03125, %v4147_v23  ;;  %6243 = vrsqrt.f32 %v4192_v7 }
 0xe4c   : > { %v4241_v14 = vmul.f32 %v8195_v37, %v4219_v24 }
 0xe4d   : > { %v6240_v60 = vpop.eup %6239  ;;  %v4191_v53 = vadd.f32 1e-06, %v4175_v5 }
 0xe4e   : > { %v4221_v10 = vmul.f32 %v6240_v60, %v8127_v42  ;;  %v4156_v52 = vpop.xlane.xlu0 %4155  ;;  %v4153_v1 = vpop.xlane.xlu1 %4152  ;;  %v4263_v12 = vadd.f32 %v8204_v3, %v4241_v14  ;;  %v4264_v42 = vadd.f32 %v8204_v3, %v4242_v13 }
 0xe4f   : > { %6245 = vrsqrt.f32 %v4191_v53  ;;  %v4178_v46 = vmul.f32 0.03125, %v4156_v52  ;;  %v4177_v2 = vmul.f32 0.03125, %v4153_v1 }
 0xe50   : > { %v4276_v11 = vpack.c.bf16 %v4263_v12, %v4262_v34  ;;  %v4243_v0 = vmul.f32 %v8195_v37, %v4221_v10 }
 0xe51   : > { %v4194_v9 = vadd.f32 1e-06, %v4178_v46  ;;  %v4193_v51 = vadd.f32 1e-06, %v4177_v2  ;;  %v6242_v43 = vpop.eup %6241 }
 0xe52   : > { %v4162_v17 = vpop.xlane.xlu0 %4161  ;;  %5710 = vmatprep.mubr.msk.bf16.mxu0 %vm1077_vm4, %v4276_v11  ;;  %v4159_v36 = vpop.xlane.xlu1 %4158  ;;  %v4265_v47 = vadd.f32 %v8204_v3, %v4243_v0  ;;  %v4222_v45 = vmul.f32 %v6242_v43, %v8142_v39  ;;  %v5935_v43 = vld [vmem:[%s6675_s0 + $0x10] sm:$0xff]  }
 0xe53   : > { %6247 = vrsqrt.f32 %v4194_v9  ;;  %v4180_v28 = vmul.f32 0.03125, %v4162_v17  ;;  %v4179_v61 = vmul.f32 0.03125, %v4159_v36 }
 0xe54   : > { %6249 = vrsqrt.f32 %v4193_v51  ;;  %v4277_v38 = vpack.c.bf16 %v4265_v47, %v4264_v42  ;;  %v4244_v30 = vmul.f32 %v8195_v37, %v4222_v45  ;;  %v5933_v42 = vld [vmem:[%s6675_s0] sm:$0xff]   ;;  %v5934_v47 = vld [vmem:[%s6675_s0 + $0x8] sm:$0xff]  }
 0xe55   : > { %v4196_v16 = vadd.f32 1e-06, %v4180_v28  ;;  %v4195_v31 = vadd.f32 1e-06, %v4179_v61  ;;  %v6244_v29 = vpop.eup %6243  ;;  %5722 = vmatprep.subr.bf16.mxu0 %v5933_v42 }
 0xe56   : > { %5711 = vmatmul.mubr.msk.bf16.gmra.mrb[84].mxu0 %vm1077_vm4, %v4277_v38  ;;  %v4165_v27 = vpop.xlane.xlu1 %4164  ;;  %v4224_v41 = vmul.f32 %v6244_v29, %v8139_v50  ;;  %v4266_v23 = vadd.f32 %v8204_v3, %v4244_v30 }
 0xe57   : > { %6251 = vrsqrt.f32 %v4196_v16  ;;  %v4181_v18 = vmul.f32 0.03125, %v4165_v27  ;;  %5723 = vmatpush3.bf16.msra.mxu0 %v5933_v42 }
 0xe58   : > { %6253 = vrsqrt.f32 %v4195_v31  ;;  %v4246_v53 = vmul.f32 %v8195_v37, %v4224_v41  ;;  %5724 = vmatprep.subr.bf16.mxu0 %v5934_v47 }
 0xe59   : > { %v6246_v4 = vpop.eup %6245  ;;  %v4197_v58 = vadd.f32 1e-06, %v4181_v18 }
 0xe5a   : > { %v4223_v49 = vmul.f32 %v6246_v4, %v8154_v15  ;;  %v4268_v12 = vadd.f32 %v8204_v3, %v4246_v53 }
 0xe5b   : > { %6255 = vrsqrt.f32 %v4197_v58  ;;  %5725 = vmatpush3.bf16.msra.mxu0 %v5934_v47 }
 0xe5c   : > { %v4245_v24 = vmul.f32 %v8195_v37, %v4223_v49  ;;  %5726 = vmatprep.subr.bf16.mxu0 %v5935_v43 }
 0xe5d   : > { %v6248_v7 = vpop.eup %6247 }
 0xe5e   : > { %v6250_v39 = vpop.eup %6249  ;;  %v4267_v5 = vadd.f32 %v8204_v3, %v4245_v24  ;;  %v4226_v14 = vmul.f32 %v6248_v7, %v8163_v32 }
 0xe5f   : > { %v4225_v60 = vmul.f32 %v6250_v39, %v8151_v55  ;;  %5727 = vmatpush3.bf16.msra.mxu0 %v5935_v43 }
 0xe60   : > { %v4278_v15 = vpack.c.bf16 %v4267_v5, %v4266_v23  ;;  %v4248_v32 = vmul.f32 %v8195_v37, %v4226_v14 }
 0xe61   : > { %v6252_v34 = vpop.eup %6251  ;;  %v4247_v10 = vmul.f32 %v8195_v37, %v4225_v60 }
 0xe62   : > { %v6254_v50 = vpop.eup %6253  ;;  %v4228_v52 = vmul.f32 %v6252_v34, %v8160_v33  ;;  %5714 = vmatprep.mubr.msk.bf16.mxu0 %vm1077_vm4, %v4278_v15 }
 0xe63   : > { %v4227_v1 = vmul.f32 %v6254_v50, %v8171_v57  ;;  %v4269_v13 = vadd.f32 %v8204_v3, %v4247_v10  ;;  %v4270_v57 = vadd.f32 %v8204_v3, %v4248_v32 }
 0xe64   : > { %v4250_v33 = vmul.f32 %v8195_v37, %v4228_v52 }
 0xe65   : > { %v6256_v55 = vpop.eup %6255  ;;  %v4279_v46 = vpack.c.bf16 %v4269_v13, %v4268_v12  ;;  %v4249_v2 = vmul.f32 %v8195_v37, %v4227_v1 }
 0xe66   : > { %v4229_v11 = vmul.f32 %v6256_v55, %v8181_v25  ;;  %v4272_v17 = vadd.f32 %v8204_v3, %v4250_v33 }
 0xe67   : > { %5715 = vmatmul.mubr.msk.bf16.gmra.mrb[88].mxu0 %vm1077_vm4, %v4279_v46  ;;  %v4271_v0 = vadd.f32 %v8204_v3, %v4249_v2 }
 0xe68   : > { %v4251_v9 = vmul.f32 %v8195_v37, %v4229_v11  ;;  %v5936_v37 = vld [vmem:[%s6675_s0 + $0x18] sm:$0xff]  }
 0xe69   : > { %v4280_v51 = vpack.c.bf16 %v4271_v0, %v4270_v57  ;;  %5728 = vmatprep.subr.bf16.mxu0 %v5936_v37 }
 0xe6a   : > { %v4273_v36 = vadd.f32 %v8204_v3, %v4251_v9  ;;  %5729 = vmatpush3.bf16.msra.mxu0 %v5936_v37  ;;  %v8268_v3 = vld [vmem:[%s8531_s25] ss:$0 sm:$0xff]  ;;  %s8537_s25 = sld [smem:[#allocation40_spill]] (!%p5129_p1) }
 0xe6b   : > { %5718 = vmatprep.mubr.msk.bf16.mxu0 %vm1077_vm4, %v4280_v51 }
 0xe6c   : > { %v4281_v25 = vpack.c.bf16 %v4273_v36, %v4272_v17 }
 0xe6f   : > { %5719 = vmatmul.mubr.msk.bf16.gmra.mrb[92].mxu0 %vm1077_vm4, %v4281_v25 }
 0xf1e   : > { %v5708_v28 = vpop.f32.mrb[80].mxu0 }
 0xf1f   : > { %v4372_v61 = vadd.f32 %v5708_v28, %v8268_v3  ;;  %v4363_v38 = vpop.f32.mrb[81].mxu0 }
 0xf20   : > { %v4364_v16 = vadd.f32 %v8268_v3, %v4363_v38  ;;  %v5709_v31 = vpop.f32.mrb[82].mxu0 }
 0xf21   : > { %v4444_v45 = vmul.f32 0.70710677, %v4372_v61  ;;  %v4375_v27 = vadd.f32 %v5709_v31, %v8268_v3  ;;  %v4366_v18 = vpop.f32.mrb[83].mxu0  ;;  %v4428_v32 = vmul.f32 0.5, %v4372_v61 }
 0xf22   : > { %v4442_v29 = vmul.f32 0.70710677, %v4364_v16  ;;  %v4367_v4 = vadd.f32 %v8268_v3, %v4366_v18  ;;  %v4426_v2 = vmul.f32 0.5, %v4364_v16 }
 0xf23   : > { %6257 = verf.f32 %v4444_v45  ;;  %v4445_v58 = vmul.f32 0.70710677, %v4375_v27  ;;  %v4429_v55 = vmul.f32 0.5, %v4375_v27 }
 0xf24   : > { %6259 = verf.f32 %v4442_v29  ;;  %v4443_v49 = vmul.f32 0.70710677, %v4367_v4  ;;  %v4427_v11 = vmul.f32 0.5, %v4367_v4 }
 0xf25   : > { %6261 = verf.f32 %v4445_v58 }
 0xf26   : > { %6263 = verf.f32 %v4443_v49 }
 0xf29   : > { %v5712_v30 = vpop.f32.mrb[84].mxu0 }
 0xf2a   : > { %v4388_v41 = vadd.f32 %v5712_v30, %v8268_v3  ;;  %v4379_v24 = vpop.f32.mrb[85].mxu0 }
 0xf2b   : > { %v4380_v7 = vadd.f32 %v8268_v3, %v4379_v24  ;;  %v5713_v39 = vpop.f32.mrb[86].mxu0 }
 0xf2c   : > { %v4448_v23 = vmul.f32 0.70710677, %v4388_v41  ;;  %v4391_v5 = vadd.f32 %v5713_v39, %v8268_v3  ;;  %v4382_v14 = vpop.f32.mrb[87].mxu0  ;;  %v4432_v38 = vmul.f32 0.5, %v4388_v41 }
 0xf2d   : > { %v6258_v60 = vpop.eup %6257  ;;  %v4446_v53 = vmul.f32 0.70710677, %v4380_v7  ;;  %v4383_v15 = vadd.f32 %v8268_v3, %v4382_v14  ;;  %v4430_v18 = vmul.f32 0.5, %v4380_v7 }
 0xf2e   : > { %v6260_v34 = vpop.eup %6259  ;;  %v4476_v10 = vadd.f32 1.0, %v6258_v60  ;;  %6265 = verf.f32 %v4448_v23  ;;  %v4449_v50 = vmul.f32 0.70710677, %v4391_v5  ;;  %v4433_v16 = vmul.f32 0.5, %v4391_v5 }
 0xf2f   : > { %v6262_v52 = vpop.eup %6261  ;;  %v4474_v1 = vadd.f32 1.0, %v6260_v34  ;;  %6267 = verf.f32 %v4446_v53  ;;  %v4447_v12 = vmul.f32 0.70710677, %v4383_v15  ;;  %v4431_v29 = vmul.f32 0.5, %v4383_v15 }
 0xf30   : > { %v6264_v13 = vpop.eup %6263  ;;  %v4477_v46 = vadd.f32 1.0, %v6262_v52  ;;  %6269 = verf.f32 %v4449_v50  ;;  %v4492_v57 = vmul.f32 %v4476_v10, %v4428_v32 }
 0xf31   : > { %v4475_v33 = vadd.f32 1.0, %v6264_v13  ;;  %6271 = verf.f32 %v4447_v12  ;;  %v4490_v9 = vmul.f32 %v4474_v1, %v4426_v2 }
 0xf32   : > { %v4493_v0 = vmul.f32 %v4477_v46, %v4429_v55 }
 0xf33   : > { %v4491_v51 = vmul.f32 %v4475_v33, %v4427_v11 }
 0xf34   : > { %v4507_v17 = vpack.c.bf16 %v4493_v0, %v4492_v57 }
 0xf35   : > { %v4506_v36 = vpack.c.bf16 %v4491_v51, %v4490_v9 }
 0xf37   : > { %5730 = vmatprep.mubr.msk.bf16.mxu0 %vm4553_vm10, %v4506_v36 }
 0xf38   : > { %v6266_v25 = vpop.eup %6265  ;;  %5731 = vmatmul.mubr.msk.bf16.vlgmr.msra.gmra.mrb[96].mxu0 %vm4553_vm10, %v4507_v17 }
 0xf39   : > { %v6268_v42 = vpop.eup %6267  ;;  %v4480_v47 = vadd.f32 1.0, %v6266_v25 }
 0xf3a   : > { %v6270_v43 = vpop.eup %6269  ;;  %v4478_v37 = vadd.f32 1.0, %v6268_v42  ;;  %v5716_v28 = vpop.f32.mrb[88].mxu0 }
 0xf3b   : > { %v6272_v61 = vpop.eup %6271  ;;  %v4481_v31 = vadd.f32 1.0, %v6270_v43  ;;  %v4404_v45 = vadd.f32 %v5716_v28, %v8268_v3  ;;  %v4395_v27 = vpop.f32.mrb[89].mxu0  ;;  %v4496_v30 = vmul.f32 %v4480_v47, %v4432_v38 }
 0xf3c   : > { %v4479_v4 = vadd.f32 1.0, %v6272_v61  ;;  %v4396_v58 = vadd.f32 %v8268_v3, %v4395_v27  ;;  %v5717_v49 = vpop.f32.mrb[90].mxu0  ;;  %v4494_v60 = vmul.f32 %v4478_v37, %v4430_v18 }
 0xf3d   : > { %v4497_v24 = vmul.f32 %v4481_v31, %v4433_v16  ;;  %v4452_v39 = vmul.f32 0.70710677, %v4404_v45  ;;  %v4407_v23 = vadd.f32 %v5717_v49, %v8268_v3  ;;  %v4398_v14 = vpop.f32.mrb[91].mxu0  ;;  %v4436_v42 = vmul.f32 0.5, %v4404_v45 }
 0xf3e   : > { %v4495_v53 = vmul.f32 %v4479_v4, %v4431_v29  ;;  %v4450_v41 = vmul.f32 0.70710677, %v4396_v58  ;;  %v4399_v5 = vadd.f32 %v8268_v3, %v4398_v14  ;;  %v4434_v37 = vmul.f32 0.5, %v4396_v58 }
 0xf3f   : > { %v4509_v34 = vpack.c.bf16 %v4497_v24, %v4496_v30  ;;  %6273 = verf.f32 %v4452_v39  ;;  %v4453_v10 = vmul.f32 0.70710677, %v4407_v23  ;;  %v4437_v47 = vmul.f32 0.5, %v4407_v23 }
 0xf40   : > { %v4508_v7 = vpack.c.bf16 %v4495_v53, %v4494_v60  ;;  %6275 = verf.f32 %v4450_v41  ;;  %v4451_v15 = vmul.f32 0.70710677, %v4399_v5  ;;  %v4435_v28 = vmul.f32 0.5, %v4399_v5 }
 0xf41   : > { %6277 = verf.f32 %v4453_v10 }
 0xf42   : > { %6279 = verf.f32 %v4451_v15  ;;  %v5720_v50 = vpop.f32.mrb[92].mxu0  ;;  %5734 = vmatprep.mubr.msk.bf16.mxu0 %vm4553_vm10, %v4508_v7 }
 0xf43   : > { %v4420_v52 = vadd.f32 %v5720_v50, %v8268_v3  ;;  %v4411_v1 = vpop.f32.mrb[93].mxu0  ;;  %5735 = vmatmul.mubr.msk.bf16.gmra.mrb[100].mxu0 %vm4553_vm10, %v4509_v34  ;;  %v5116_v50 = vld [vmem:[%s901_s18] ss:$0 sm:$0xff] }
 0xf44   : > { %v4412_v12 = vadd.f32 %v8268_v3, %v4411_v1  ;;  %v5721_v13 = vpop.f32.mrb[94].mxu0 }
 0xf45   : > { %v4456_v32 = vmul.f32 0.70710677, %v4420_v52  ;;  %v4423_v55 = vadd.f32 %v5721_v13, %v8268_v3  ;;  %v4414_v46 = vpop.f32.mrb[95].mxu0  ;;  %v4440_v45 = vmul.f32 0.5, %v4420_v52 }
 0xf46   : > { %v4454_v2 = vmul.f32 0.70710677, %v4412_v12  ;;  %v4415_v11 = vadd.f32 %v8268_v3, %v4414_v46  ;;  %v4438_v14 = vmul.f32 0.5, %v4412_v12 }
 0xf47   : > { %6281 = verf.f32 %v4456_v32  ;;  %v4457_v33 = vmul.f32 0.70710677, %v4423_v55  ;;  %v4441_v23 = vmul.f32 0.5, %v4423_v55 }
 0xf48   : > { %6283 = verf.f32 %v4454_v2  ;;  %v4455_v57 = vmul.f32 0.70710677, %v4415_v11  ;;  %v4439_v60 = vmul.f32 0.5, %v4415_v11 }
 0xf49   : > { %v6274_v0 = vpop.eup %6273  ;;  %6285 = verf.f32 %v4457_v33 }
 0xf4a   : > { %v6276_v9 = vpop.eup %6275  ;;  %v4484_v51 = vadd.f32 1.0, %v6274_v0  ;;  %6287 = verf.f32 %v4455_v57 }
 0xf4b   : > { %v6278_v17 = vpop.eup %6277  ;;  %v4482_v36 = vadd.f32 1.0, %v6276_v9 }
 0xf4c   : > { %v6280_v25 = vpop.eup %6279  ;;  %v4485_v43 = vadd.f32 1.0, %v6278_v17  ;;  %v4500_v38 = vmul.f32 %v4484_v51, %v4436_v42 }
 0xf4d   : > { %v4483_v61 = vadd.f32 1.0, %v6280_v25  ;;  %v4498_v16 = vmul.f32 %v4482_v36, %v4434_v37 }
 0xf4e   : > { %v4501_v3 = vmul.f32 %v4485_v43, %v4437_v47 }
 0xf4f   : > { %v4499_v31 = vmul.f32 %v4483_v61, %v4435_v28 }
 0xf50   : > { %v4511_v27 = vpack.c.bf16 %v4501_v3, %v4500_v38 }
 0xf51   : > { %v6282_v18 = vpop.eup %6281  ;;  %v4510_v29 = vpack.c.bf16 %v4499_v31, %v4498_v16 }
 0xf52   : > { %v6284_v4 = vpop.eup %6283  ;;  %v4488_v49 = vadd.f32 1.0, %v6282_v18 }
 0xf53   : > { %v6286_v30 = vpop.eup %6285  ;;  %v4486_v24 = vadd.f32 1.0, %v6284_v4  ;;  %5738 = vmatprep.mubr.msk.bf16.mxu0 %vm4553_vm10, %v4510_v29 }
 0xf54   : > { %v6288_v39 = vpop.eup %6287  ;;  %v4489_v58 = vadd.f32 1.0, %v6286_v30  ;;  %5739 = vmatmul.mubr.msk.bf16.gmra.mrb[104].mxu0 %vm4553_vm10, %v4511_v27  ;;  %v4504_v41 = vmul.f32 %v4488_v49, %v4440_v45 }
 0xf55   : > { %v4487_v53 = vadd.f32 1.0, %v6288_v39  ;;  %v4502_v34 = vmul.f32 %v4486_v24, %v4438_v14 }
 0xf56   : > { %v4505_v5 = vmul.f32 %v4489_v58, %v4441_v23 }
 0xf57   : > { %v4503_v10 = vmul.f32 %v4487_v53, %v4439_v60  ;;  %v6418_v60 = vmov (!%p5129_p1), 0.0   ;;  %v6305_v53 = vld [vmem:[%s8534_s21 + $0x8] sm:$0xff] (!%p5129_p1)  }
 0xf58   : > { %v4513_v7 = vpack.c.bf16 %v4505_v5, %v4504_v41  ;;  %5746 = vmatprep.subr.bf16.mxu0 (!%p5129_p1), %v6418_v60 }
 0xf59   : > { %v4512_v15 = vpack.c.bf16 %v4503_v10, %v4502_v34 }
 0xf5b   : > { %5742 = vmatprep.mubr.msk.bf16.mxu0 %vm4553_vm10, %v4512_v15 }
 0xf5c   : > { %5743 = vmatmul.mubr.msk.bf16.gmra.mrb[108].mxu0 %vm4553_vm10, %v4513_v7  ;;  %v4711_v7 = vld [vmem:[%s8535_s22] sm:$0x1] (!%p5129_p1) }
 0xf5d   : > { %5750 = vmatprep.mubr.msk.bf16.mxu0 (!%p5129_p1), %vm6419_vm12, %v6418_v60 }
0x100b   : > { %v5732_v52 = vpop.f32.mrb[96].mxu0 }
0x100c   : > { %v4621_v1 = vadd.f32 %v5732_v52, %v5116_v50  ;;  %v4612_v12 = vpop.f32.mrb[97].mxu0 }
0x100d   : > { %v4613_v13 = vadd.f32 %v5116_v50, %v4612_v12  ;;  %v5733_v32 = vpop.f32.mrb[98].mxu0 }
0x100e   : > { %v4677_v55 = vadd.f32 %v4621_v1, %v8013_v19  ;;  %v4624_v46 = vadd.f32 %v5733_v32, %v5116_v50  ;;  %v4615_v2 = vpop.f32.mrb[99].mxu0 }
0x100f   : > { %v8301_v11 = vadd.f32 %v4613_v13, %v8015_v62  ;;  %v4616_v33 = vadd.f32 %v5116_v50, %v4615_v2  ;;  %v4734_v13 = vld [vmem:[%s8537_s25] sm:$0x1] (!%p5129_p1) }
0x1010   : > { %4693 = vst.msk [vmem:[#allocation2 + $0x10] sm:$0xff] %vm1077_vm4, %v4677_v55  ;;  %v4678_v57 = vadd.f32 %v4624_v46, %v8020_v26 }
0x1011   : > { %4691 = vst.msk [vmem:[#allocation2] sm:$0xff] %vm1077_vm4, %v8301_v11  ;;  %v4676_v0 = vadd.f32 %v4616_v33, %v8028_v6 }
0x1012   : > { %4694 = vst.msk [vmem:[#allocation2 + $0x18] sm:$0xff] %vm1077_vm4, %v4678_v57 }
0x1013   : > { %4692 = vst.msk [vmem:[#allocation2 + $0x8] sm:$0xff] %vm1077_vm4, %v4676_v0 }
0x1016   : > { %v5736_v19 = vpop.f32.mrb[100].mxu0 }
0x1017   : > { %v4637_v9 = vadd.f32 %v5736_v19, %v5116_v50  ;;  %v4628_v51 = vpop.f32.mrb[101].mxu0 }
0x1018   : > { %v4629_v17 = vadd.f32 %v5116_v50, %v4628_v51  ;;  %v5737_v62 = vpop.f32.mrb[102].mxu0 }
0x1019   : > { %v4681_v36 = vadd.f32 %v4637_v9, %v8026_v44  ;;  %v4640_v25 = vadd.f32 %v5737_v62, %v5116_v50  ;;  %v4631_v42 = vpop.f32.mrb[103].mxu0 }
0x101a   : > { %v4679_v26 = vadd.f32 %v4629_v17, %v8035_v8  ;;  %v4632_v47 = vadd.f32 %v5116_v50, %v4631_v42 }
0x101b   : > { %4697 = vst.msk [vmem:[#allocation2 + $0x30] sm:$0xff] %vm1077_vm4, %v4681_v36  ;;  %v4682_v6 = vadd.f32 %v4640_v25, %v8040_v22 }
0x101c   : > { %4695 = vst.msk [vmem:[#allocation2 + $0x20] sm:$0xff] %vm1077_vm4, %v4679_v26  ;;  %v4680_v43 = vadd.f32 %v4632_v47, %v8045_v54 }
0x101d   : > { %4698 = vst.msk [vmem:[#allocation2 + $0x38] sm:$0xff] %vm1077_vm4, %v4682_v6 }
0x101e   : > { %4696 = vst.msk [vmem:[#allocation2 + $0x28] sm:$0xff] %vm1077_vm4, %v4680_v43 }
0x1027   : > { %v5740_v37 = vpop.f32.mrb[104].mxu0 }
0x1028   : > { %v4653_v28 = vadd.f32 %v5740_v37, %v5116_v50  ;;  %v4644_v44 = vpop.f32.mrb[105].mxu0 }
0x1029   : > { %v4645_v61 = vadd.f32 %v5116_v50, %v4644_v44  ;;  %v5741_v38 = vpop.f32.mrb[106].mxu0 }
0x102a   : > { %v4685_v8 = vadd.f32 %v4653_v28, %v8053_v56  ;;  %v4656_v3 = vadd.f32 %v5741_v38, %v5116_v50  ;;  %v4647_v16 = vpop.f32.mrb[107].mxu0 }
0x102b   : > { %v4683_v31 = vadd.f32 %v4645_v61, %v8060_v63  ;;  %v4648_v22 = vadd.f32 %v5116_v50, %v4647_v16 }
0x102c   : > { %4701 = vst.msk [vmem:[#allocation2 + $0x50] sm:$0xff] %vm1077_vm4, %v4685_v8  ;;  %v4686_v54 = vadd.f32 %v4656_v3, %v8065_v35 }
0x102d   : > { %4699 = vst.msk [vmem:[#allocation2 + $0x40] sm:$0xff] %vm1077_vm4, %v4683_v31  ;;  %v4684_v27 = vadd.f32 %v4648_v22, %v8070_v20 }
0x102e   : > { %4702 = vst.msk [vmem:[#allocation2 + $0x58] sm:$0xff] %vm1077_vm4, %v4686_v54 }
0x102f   : > { %4700 = vst.msk [vmem:[#allocation2 + $0x48] sm:$0xff] %vm1077_vm4, %v4684_v27  ;;  %v5744_v18 = vpop.f32.mrb[108].mxu0 }
0x1030   : > { %v4669_v29 = vadd.f32 %v5744_v18, %v5116_v50  ;;  %v4660_v56 = vpop.f32.mrb[109].mxu0 }
0x1031   : > { %v4661_v4 = vadd.f32 %v5116_v50, %v4660_v56  ;;  %v5745_v49 = vpop.f32.mrb[110].mxu0  ;;  %4710 = sbr.rel (%p5129_p1) target bundleno = 4676 (0x1244), region = 116 }
0x1032   : > { %v4689_v63 = vadd.f32 %v4669_v29, %v8051_v21  ;;  %v4672_v30 = vadd.f32 %v5745_v49, %v5116_v50  ;;  %v4663_v24 = vpop.f32.mrb[111].mxu0  ;;  %v4714_v21 = vsel (!%p5129_p1), %vm4713_vm11, %v8301_v11, 0.0 }
0x1033   : > { %v4687_v39 = vadd.f32 %v4661_v4, %v8075_v59  ;;  %v4664_v35 = vadd.f32 %v5116_v50, %v4663_v24  ;;  %4715 = vadd.xlane.f32.xlu0 (!%p5129_p1), %v4714_v21  ;;  %v4712_v50 = vld [vmem:[%s8536_s20] sm:$0x1] (!%p5129_p1) }
0x1034   : > { %4705 = vst.msk [vmem:[#allocation2 + $0x70] sm:$0xff] %vm1077_vm4, %v4689_v63  ;;  %v4690_v20 = vadd.f32 %v4672_v30, %v8085_v40 }
0x1035   : > { %4703 = vst.msk [vmem:[#allocation2 + $0x60] sm:$0xff] %vm1077_vm4, %v4687_v39  ;;  %v4688_v45 = vadd.f32 %v4664_v35, %v8081_v48  ;;  %v6304_v48 = vld [vmem:[%s8533_s1] sm:$0xff] (!%p5129_p1)  }
0x1036   : > { %4706 = vst.msk [vmem:[#allocation2 + $0x78] sm:$0xff] %vm1077_vm4, %v4690_v20  ;;  %5747 = vmatpush3.bf16.msra.mxu0 (!%p5129_p1), %v6304_v48 }
0x1037   : > { %4704 = vst.msk [vmem:[#allocation2 + $0x68] sm:$0xff] %vm1077_vm4, %v4688_v45  ;;  %5748 = vmatprep.subr.bf16.mxu0 (!%p5129_p1), %v6418_v60 }
0x103a   : > { %5749 = vmatpush3.bf16.msra.mxu0 %v6305_v53 }
0x10c0   : > { %v4716_v59 = vpop.xlane.xlu0 %4715 }
0x10c1   : > { %v4717_v23 = vmul.f32 0.03125, %v4716_v59 }
0x10c3   : > { %v4718_v58 = vsub.f32 %v8301_v11, %v4717_v23 }
0x10c5   : > { %v4719_v40 = vmul.f32 %v4718_v58, %v4718_v58 }
0x10c7   : > { %v4720_v14 = vsel %vm4713_vm11, %v4719_v40, 0.0 }
0x10c8   : > { %4721 = vadd.xlane.f32.xlu0 %v4720_v14 }
0x1155   : > { %v4722_v41 = vpop.xlane.xlu0 %4721 }
0x1156   : > { %v4723_v5 = vmul.f32 0.03125, %v4722_v41 }
0x1158   : > { %v4724_v34 = vadd.f32 1e-06, %v4723_v5 }
0x115a   : > { %6306 = vrsqrt.f32 %v4724_v34 }
0x1164   : > { %v6307_v10 = vpop.eup %6306 }
0x1165   : > { %v4726_v15 = vmul.f32 %v6307_v10, %v4718_v58 }
0x1167   : > { %v4727_v52 = vmul.f32 %v4726_v15, %v4711_v7 }
0x1169   : > { %v4728_v1 = vadd.f32 %v4727_v52, %v4712_v50 }
0x116b   : > { %v4729_v12 = vpack.c.bf16 %v4728_v1, %v4728_v1 }
0x116d   : > { %5751 = vmatmul.mubr.msk.bf16.vlgmr.msra.gmra.mrb[0].mxu0 %vm1077_vm4, %v4729_v12 }
0x1240   : > { %v4784_v32 = vpop.f32.mrb[0].mxu0 }
0x1241   : > { %v4785_v55 = vadd.f32 %v4784_v32, %v4734_v13  ;;  %v5752_v46 = vpop.f32.mrb[1].mxu0 }
0x1242   : > { %v4787_v2 = vpop.f32.mrb[2].mxu0 }
0x1243   : > { %4790 = vst [vmem:[%s6679_s5] sm:$0x1] %v4785_v55  ;;  %v5753_v11 = vpop.f32.mrb[3].mxu0 }
0x1244 PF: > { %s8538_s0 = sld [smem:[#allocation9_spill]]  ;;  %s8540_s1 = sld [smem:[#allocation41_spill]] }
0x1245   : > { %s4804_s19 = sshll.u32 %s6679_s5, 4  ;;  %s8542_s24 = sand.u32 1, %s6378_s28   ;;  %s4805_s19 = int_to_ptr.vmem [resolvable:$true] %s4804_s19 }
0x1246   : > { %s4792_s22 = scalar_lea.sflag [#allocation4], %s8542_s24  ;;  %s6308_s27 = scalar_lea.vmem %s4805_s19, 16 }
0x1247   : > { %p6309_p2 = scmp.ne.s32.totalorder %s4805_s19, %s6308_s27  ;;  %s6420_s29 = smov [#allocation3]  }
0x1248   : > { %s6312_s20 = sshll.u32 %s6420_s29, 4  ;;  %s6313_s20 = int_to_ptr.vmem [resolvable:$false] %s6312_s20 }
0x1249   : > { %p6310_p4 = pnand %p6309_p2, %p6585_p3  ;;  %s6314_s23 = scalar_lea.vmem %s6313_s20, 32 }
0x124a   : > { %s5133_s3 = sshll.u32 %s8538_s0, 4  ;;  %s8541_s2 = smov %s8540_s1 }
0x124b   : > { %s8358_s4 = scalar_lea.hbm %s8540_s1, %s5133_s3  ;;  %p6311_p5 = pneg %p6310_p4 }
0x124c   : > { %p6315_p6 = scmp.lt.s32.totalorder %s4805_s19, %s6313_s20  ;;  %p6316_p7 = scmp.lt.s32.totalorder %s6314_s23, %s6308_s27 }
0x124e   : > { %p6317_p8 = por %p6316_p7, %p6315_p6 }
0x1250   : > { %p6318_p10 = pnand %p6317_p8, %p6311_p5 }
0x1252   : > { %6321 = shalt.err (!%p6318_p10)
}
0x1253   : > { %s6322_s5 = scalar_lea.hbm %s8358_s4, 16  ;;  %s6326_s0 = scalar_lea.hbm %s8541_s2, 32 }
0x1254   : > { %p6323_p11 = scmp.ne.s32.totalorder %s8358_s4, %s6322_s5  ;;  %p6327_p0 = scmp.lt.u32.totalorder %s8358_s4, %s8541_s2 }
0x1255   : > { %p6328_p1 = scmp.lt.u32.totalorder %s6326_s0, %s6322_s5  ;;  %p6330_p4 = scmp.lt.u32.totalorder %s6322_s5, %s8358_s4 }
0x1256   : > { %p6324_p12 = pnand %p6323_p11, %p6585_p3 }
0x1257   : > { %p6329_p2 = por %p6328_p1, %p6327_p0 }
0x1258   : > { %p6325_p13 = pneg %p6324_p12 }
0x1259   : > { %p6331_p5 = por %p6330_p4, %p6329_p2 }
0x125b   : > { %p6332_p6 = pnand %p6331_p5, %p6325_p13 }
0x125d   : > { %6335 = shalt.err (!%p6332_p6)
}
0x125e   : > { %5838 = dma.vmem_to_hbm [thread:$0]  (%p6585_p3), %s4805_s19, 16, %s8358_s4, %s4792_s22  }
0x125f PF: > { %s8543_s30 = sld [smem:[#allocation12_spill]]  ;;  %s8544_s1 = sld [smem:[#allocation6_spill]] }
0x1265   : > { %p5844_p7 = scmp.ge.s32.totalorder %s8543_s30, 2  ;;  %s4816_s27 = sand.u32 1, %s8544_s1  }
0x1266   : > { %s4817_s29 = scalar_lea.sflag [#allocation4], %s4816_s27 }
0x1267   : > { %p5841_p8 = pnand %p5844_p7, %p6595_p9 }
0x1269   : > { %6369 = dma.done.wait (!%p5841_p8), %s4817_s29, 16  }
0x126a   : > { %6371 = vsyncadd (!%p5841_p8), %s4817_s29, 4294967280  ;;  %s35_s1 = sadd.s32 1, %s8543_s30   ;;  %s8546_s20 = sld [smem:[#allocation7_spill]] }
0x126b   : > { %p32_p10 = scmp.ge.s32.totalorder %s35_s1, 6   ;;  %s8547_s29 = sld [smem:[#allocation17_spill]] }
0x126c   : > { %s8548_s30 = sld [smem:[#allocation10_spill]]  ;;  %s8549_s4 = sld [smem:[#allocation11_spill]] }
0x126d   : > { %s8550_s0 = sld [smem:[#allocation13_spill]]  ;;  %s8551_s23 = sld [smem:[#allocation15_spill]] }
0x126e   : > { %s8552_s3 = smov %s6378_s28  ;;  %34 = sbr.rel (!%p32_p10) target bundleno = 20 (0x14), region = 190 }
0x1270   : > { %s8553_s28 = smov %s8546_s20 }
0x1275   :  { %4821 = vsyncpa [#allocation4], 1 }
0x1276   :  { %4823 = vsyncpa [#allocation4 + $0x1], 1 }

</bundles_post_ra>
